<compile_context>
chip_gen: v5e
topology: v5e:2x2
jax: 0.10.0
libtpu: 0.0.40
codegen_flags: <defaults>
</compile_context>

<pallas_src>
import functools

import jax
import jax.numpy as jnp
from jax.experimental import pallas as pl
from jax.experimental.pallas import tpu as pltpu


# ----------------------------------------------------------------------------
# Fused kernel: all layers, both directions, and the final Linear.
# refs = [x, (wih_both, whh_f, whh_b, b_both) per layer, fc_w_t, fc_b,
#         out, act_scratch]
# ----------------------------------------------------------------------------
def _fused_bilstm_kernel(*refs, T, B, H, L, Din, O):
    nw = 4 * L
    x_ref = refs[0]
    w_refs = refs[1:1 + nw]
    fcw_ref = refs[1 + nw]
    fcb_ref = refs[2 + nw]
    out_ref = refs[3 + nw]
    act_ref = refs[4 + nw]          # (T*B, 2H): cols [0:H]=fwd, [H:2H]=bwd, time-major rows

    H3 = 3 * H
    H4 = 4 * H

    def cell(gates, c):
        # kernel gate order: [i, f, o, g] (reordered at prep time)
        s = jax.nn.sigmoid(gates[:, :H3])        # one sigmoid pass covers i, f, o
        i_g = s[:, 0:H]
        f_g = s[:, H:2 * H]
        o_g = s[:, 2 * H:H3]
        g_g = jnp.tanh(gates[:, H3:])
        c_new = f_g * c + i_g * g_g
        h_new = o_g * jnp.tanh(c_new)
        return h_new, c_new

    for layer in range(L):
        wih_ref, whhf_ref, whhb_ref, b_ref = w_refs[4 * layer:4 * layer + 4]
        wih = wih_ref[...]                       # (Din_layer, 8H) both directions
        bias = b_ref[...]                        # (1, 8H)

        # ---- hoisted input projection over the whole sequence (both directions) ----
        if layer == 0:
            x_all = x_ref[...]                   # (T*B, Din)
            if Din == 1:
                gx = x_all * wih + bias          # broadcast: avoid degenerate K=1 matmul
            else:
                gx = jnp.dot(x_all, wih, preferred_element_type=jnp.float32) + bias
        else:
            gx = jnp.dot(act_ref[...], wih,      # prev layer (T*B, 2H) -> (T*B, 8H)
                         preferred_element_type=jnp.float32) + bias
        gx_f = gx[:, 0:H4]
        gx_b = gx[:, H4:2 * H4]

        whh_f = whhf_ref[...]                    # (H, 4H), loop-invariant
        whh_b = whhb_ref[...]

        h_f = jnp.zeros((B, H), jnp.float32)
        c_f = jnp.zeros((B, H), jnp.float32)
        h_b = jnp.zeros((B, H), jnp.float32)
        c_b = jnp.zeros((B, H), jnp.float32)

        # Fully unrolled recurrence: only h @ W_hh stays on the serial path.
        for t in range(T):
            rf = t * B               # fwd processes original time t
            rb = (T - 1 - t) * B     # bwd processes original time T-1-t
            g_f = gx_f[rf:rf + B, :] + jnp.dot(
                h_f, whh_f, preferred_element_type=jnp.float32)
            g_b = gx_b[rb:rb + B, :] + jnp.dot(
                h_b, whh_b, preferred_element_type=jnp.float32)
            h_f, c_f = cell(g_f, c_f)
            h_b, c_b = cell(g_b, c_b)
            act_ref[rf:rf + B, 0:H] = h_f
            act_ref[rb:rb + B, H:2 * H] = h_b

    # ---- fused final Linear on last timestep (dropout = identity in eval) ----
    last = act_ref[(T - 1) * B:T * B, :]         # (B, 2H): [h_f(T-1) | h_b at pos T-1]
    out_ref[...] = (jnp.dot(last, fcw_ref[...], preferred_element_type=jnp.float32)
                    + fcb_ref[...])


# ----------------------------------------------------------------------------
# Parameter handling: raw params in PyTorch layout (gate order i, f, g, o),
# prepped into kernel layout (transposed, gates reordered to i, f, o, g,
# fwd/bwd input weights concatenated along the lane axis).
# ----------------------------------------------------------------------------
def _reorder_gates(a, H):
    # PyTorch gate blocks [i, f, g, o] along axis 0 -> kernel order [i, f, o, g]
    return jnp.concatenate([a[0:2 * H], a[3 * H:4 * H], a[2 * H:3 * H]], axis=0)


def _prep_direction(w_ih, w_hh, b_ih, b_hh, H):
    wih_t = _reorder_gates(w_ih, H).T                          # (Din, 4H)
    whh_t = _reorder_gates(w_hh, H).T                          # (H, 4H)
    bias = _reorder_gates(b_ih + b_hh, H).reshape(1, 4 * H)    # (1, 4H)
    return wih_t, whh_t, bias


def prep_params(raw):
    H = raw["layers"][0]["fwd"][1].shape[1]     # w_hh: (4H, H)
    layers = []
    for lp in raw["layers"]:
        wf, hf, bf = _prep_direction(*lp["fwd"], H)
        wb, hb, bb = _prep_direction(*lp["bwd"], H)
        layers.append({
            "wih_both": jnp.concatenate([wf, wb], axis=1),     # (Din, 8H)
            "whh_f": hf,                                       # (H, 4H)
            "whh_b": hb,                                       # (H, 4H)
            "b_both": jnp.concatenate([bf, bb], axis=1),       # (1, 8H)
        })
    return {
        "layers": layers,
        "fc_w_t": raw["fc_w"].T,                               # (2H, O)
        "fc_b": raw["fc_b"].reshape(1, -1),                    # (1, O)
    }


def init_raw_params(key, input_size, hidden, num_layers, output_size):
    """Random params mimicking PyTorch defaults, in PyTorch's native layout."""
    raw = {"layers": []}
    k = 1.0 / (hidden ** 0.5)
    for layer in range(num_layers):
        din = input_size if layer == 0 else 2 * hidden
        entry = {}
        for d in ("fwd", "bwd"):
            key, k1, k2, k3, k4 = jax.random.split(key, 5)
            entry[d] = (
                jax.random.uniform(k1, (4 * hidden, din), jnp.float32, -k, k),     # W_ih
                jax.random.uniform(k2, (4 * hidden, hidden), jnp.float32, -k, k),  # W_hh
                jax.random.uniform(k3, (4 * hidden,), jnp.float32, -k, k),         # b_ih
                jax.random.uniform(k4, (4 * hidden,), jnp.float32, -k, k),         # b_hh
            )
        raw["layers"].append(entry)
    key, k1, k2 = jax.random.split(key, 3)
    kf = 1.0 / ((2 * hidden) ** 0.5)
    raw["fc_w"] = jax.random.uniform(k1, (output_size, 2 * hidden), jnp.float32, -kf, kf)
    raw["fc_b"] = jax.random.uniform(k2, (output_size,), jnp.float32, -kf, kf)
    return raw


# ----------------------------------------------------------------------------
# Public forward (matches BiLSTMModel.forward in eval mode, batch_first=True).
# ----------------------------------------------------------------------------
def bilstm_forward(x_btd, params):
    B, T, Din = x_btd.shape
    layers = params["layers"]
    L = len(layers)
    H = layers[0]["whh_f"].shape[0]             # whh_t: (H, 4H)
    O = params["fc_b"].shape[-1]

    # time-major, flattened to (T*B, Din): row t*B + b <-> (time t, batch b)
    x_flat = jnp.transpose(x_btd.astype(jnp.float32), (1, 0, 2)).reshape(T * B, Din)

    flat_args = [x_flat]
    for lp in layers:
        flat_args.extend([lp["wih_both"], lp["whh_f"], lp["whh_b"], lp["b_both"]])
    flat_args.append(params["fc_w_t"])
    flat_args.append(params["fc_b"])

    kernel = functools.partial(_fused_bilstm_kernel, T=T, B=B, H=H, L=L, Din=Din, O=O)

    # TODO(synk): on v7x (2 TensorCores) the independent fwd/bwd directions could be
    # split across cores via pl.core_map; at these shapes the single fused kernel wins.
    return pl.pallas_call(
        kernel,
        out_shape=jax.ShapeDtypeStruct((B, O), jnp.float32),
        scratch_shapes=[
            pltpu.VMEM((T * B, 2 * H), jnp.float32),   # [fwd | bwd] hidden, time-major
        ],
    )(*flat_args)


# ----------------------------------------------------------------------------
# Pure-JAX reference (PyTorch semantics) for a correctness check.
# ----------------------------------------------------------------------------
def bilstm_reference(x_btd, raw):
    x = x_btd.astype(jnp.float32)
    B, T, _ = x.shape
    H = raw["layers"][0]["fwd"][1].shape[1]
    seq = x
    for lp in raw["layers"]:
        outs = []
        for d, rev in (("fwd", False), ("bwd", True)):
            w_ih, w_hh, b_ih, b_hh = lp[d]
            xs = seq[:, ::-1, :] if rev else seq
            h = jnp.zeros((B, H), jnp.float32)
            c = jnp.zeros((B, H), jnp.float32)
            hs = []
            for t in range(T):
                g = xs[:, t, :] @ w_ih.T + h @ w_hh.T + b_ih + b_hh
                i = jax.nn.sigmoid(g[:, 0:H])
                f = jax.nn.sigmoid(g[:, H:2 * H])
                gg = jnp.tanh(g[:, 2 * H:3 * H])
                o = jax.nn.sigmoid(g[:, 3 * H:4 * H])
                c = f * c + i * gg
                h = o * jnp.tanh(c)
                hs.append(h)
            out = jnp.stack(hs, axis=1)
            if rev:
                out = out[:, ::-1, :]
            outs.append(out)
        seq = jnp.concatenate(outs, axis=-1)
        # inter-layer dropout is training-only -> identity in eval
    last = seq[:, -1, :]
    return last @ raw["fc_w"].T + raw["fc_b"]


if __name__ == "__main__":
    B, T = 2, 8
    INPUT_SIZE, HIDDEN, NUM_LAYERS, OUTPUT_SIZE = 1, 32, 3, 3

    key = jax.random.PRNGKey(0)
    key, pkey, xkey = jax.random.split(key, 3)
    raw = init_raw_params(pkey, INPUT_SIZE, HIDDEN, NUM_LAYERS, OUTPUT_SIZE)
    params = prep_params(raw)
    x = jax.random.normal(xkey, (B, T, INPUT_SIZE), dtype=jnp.float32)

    y = jax.jit(bilstm_forward)(x, params)
    jax.block_until_ready(y)
    assert y.shape == (B, OUTPUT_SIZE)

    y_ref = jax.jit(bilstm_reference)(x, raw)
    assert jnp.allclose(y, y_ref, atol=1e-2, rtol=1e-2), (y, y_ref)

    print("KERNEL_OK")
</pallas_src>

<mosaic_0001>
module attributes {stable_mosaic.version = 11 : i64} {
  func.func @_fused_bilstm_kernel(%arg0: memref<16x1xf32, #tpu.memory_space<vmem>>, %arg1: memref<1x256xf32, #tpu.memory_space<vmem>>, %arg2: memref<32x128xf32, #tpu.memory_space<vmem>>, %arg3: memref<32x128xf32, #tpu.memory_space<vmem>>, %arg4: memref<1x256xf32, #tpu.memory_space<vmem>>, %arg5: memref<64x256xf32, #tpu.memory_space<vmem>>, %arg6: memref<32x128xf32, #tpu.memory_space<vmem>>, %arg7: memref<32x128xf32, #tpu.memory_space<vmem>>, %arg8: memref<1x256xf32, #tpu.memory_space<vmem>>, %arg9: memref<64x256xf32, #tpu.memory_space<vmem>>, %arg10: memref<32x128xf32, #tpu.memory_space<vmem>>, %arg11: memref<32x128xf32, #tpu.memory_space<vmem>>, %arg12: memref<1x256xf32, #tpu.memory_space<vmem>>, %arg13: memref<64x3xf32, #tpu.memory_space<vmem>>, %arg14: memref<1x3xf32, #tpu.memory_space<vmem>>, %arg15: memref<2x3xf32, #tpu.memory_space<vmem>>, %arg16: memref<16x64xf32, #tpu.memory_space<vmem>>) attributes {dimension_semantics = [], scalar_prefetch = 0 : i64, scratch_operands = 1 : i64, tpu.core_type = #tpu.core_type<tc>} {
    %c0 = arith.constant 0 : index
    %c0_0 = arith.constant 0 : index
    %0 = vector.load %arg1[%c0, %c0_0] : memref<1x256xf32, #tpu.memory_space<vmem>>, vector<1x256xf32>
    %c0_1 = arith.constant 0 : index
    %c0_2 = arith.constant 0 : index
    %1 = vector.load %arg4[%c0_1, %c0_2] : memref<1x256xf32, #tpu.memory_space<vmem>>, vector<1x256xf32>
    %c0_3 = arith.constant 0 : index
    %c0_4 = arith.constant 0 : index
    %2 = vector.load %arg0[%c0_3, %c0_4] : memref<16x1xf32, #tpu.memory_space<vmem>>, vector<16x1xf32>
    %3 = vector.broadcast %2 : vector<16x1xf32> to vector<16x256xf32>
    %4 = vector.broadcast %0 : vector<1x256xf32> to vector<16x256xf32>
    %5 = arith.mulf %3, %4 : vector<16x256xf32>
    %6 = vector.broadcast %1 : vector<1x256xf32> to vector<16x256xf32>
    %7 = arith.addf %5, %6 : vector<16x256xf32>
    %8 = vector.extract_strided_slice %7 {offsets = [0, 0], sizes = [16, 128], strides = [1, 1]} : vector<16x256xf32> to vector<16x128xf32>
    %9 = vector.extract_strided_slice %7 {offsets = [0, 128], sizes = [16, 128], strides = [1, 1]} : vector<16x256xf32> to vector<16x128xf32>
    %c0_5 = arith.constant 0 : index
    %c0_6 = arith.constant 0 : index
    %10 = vector.load %arg2[%c0_5, %c0_6] : memref<32x128xf32, #tpu.memory_space<vmem>>, vector<32x128xf32>
    %c0_7 = arith.constant 0 : index
    %c0_8 = arith.constant 0 : index
    %11 = vector.load %arg3[%c0_7, %c0_8] : memref<32x128xf32, #tpu.memory_space<vmem>>, vector<32x128xf32>
    %cst = arith.constant 0.000000e+00 : f32
    %12 = vector.broadcast %cst : f32 to vector<2x32xf32>
    %cst_9 = arith.constant 0.000000e+00 : f32
    %13 = vector.broadcast %cst_9 : f32 to vector<2x32xf32>
    %cst_10 = arith.constant 0.000000e+00 : f32
    %14 = vector.broadcast %cst_10 : f32 to vector<2x32xf32>
    %cst_11 = arith.constant 0.000000e+00 : f32
    %15 = vector.broadcast %cst_11 : f32 to vector<2x32xf32>
    %16 = vector.extract_strided_slice %8 {offsets = [0, 0], sizes = [2, 128], strides = [1, 1]} : vector<16x128xf32> to vector<2x128xf32>
    %cst_12 = arith.constant dense<0.000000e+00> : vector<2x128xf32>
    %17 = tpu.matmul %12, %10, %cst_12 {dimension_numbers = #tpu.dot_dimension_numbers<[1], [0], [0], [1], [0, 0, 1, 1], [], []>} : vector<2x32xf32>, vector<32x128xf32>, vector<2x128xf32> -> vector<2x128xf32>
    %18 = arith.addf %16, %17 : vector<2x128xf32>
    %19 = vector.extract_strided_slice %9 {offsets = [14, 0], sizes = [2, 128], strides = [1, 1]} : vector<16x128xf32> to vector<2x128xf32>
    %cst_13 = arith.constant dense<0.000000e+00> : vector<2x128xf32>
    %20 = tpu.matmul %14, %11, %cst_13 {dimension_numbers = #tpu.dot_dimension_numbers<[1], [0], [0], [1], [0, 0, 1, 1], [], []>} : vector<2x32xf32>, vector<32x128xf32>, vector<2x128xf32> -> vector<2x128xf32>
    %21 = arith.addf %19, %20 : vector<2x128xf32>
    %22 = vector.extract_strided_slice %18 {offsets = [0, 0], sizes = [2, 96], strides = [1, 1]} : vector<2x128xf32> to vector<2x96xf32>
    %23 = arith.negf %22 : vector<2x96xf32>
    %24 = math.exp %23 : vector<2x96xf32>
    %cst_14 = arith.constant 1.000000e+00 : f32
    %25 = vector.broadcast %cst_14 : f32 to vector<2x96xf32>
    %26 = arith.addf %25, %24 : vector<2x96xf32>
    %27 = arith.divf %25, %26 : vector<2x96xf32>
    %28 = vector.extract_strided_slice %27 {offsets = [0, 0], sizes = [2, 32], strides = [1, 1]} : vector<2x96xf32> to vector<2x32xf32>
    %29 = vector.extract_strided_slice %27 {offsets = [0, 32], sizes = [2, 32], strides = [1, 1]} : vector<2x96xf32> to vector<2x32xf32>
    %30 = vector.extract_strided_slice %27 {offsets = [0, 64], sizes = [2, 32], strides = [1, 1]} : vector<2x96xf32> to vector<2x32xf32>
    %31 = vector.extract_strided_slice %18 {offsets = [0, 96], sizes = [2, 32], strides = [1, 1]} : vector<2x128xf32> to vector<2x32xf32>
    %32 = math.tanh %31 : vector<2x32xf32>
    %33 = arith.mulf %29, %13 : vector<2x32xf32>
    %34 = arith.mulf %28, %32 : vector<2x32xf32>
    %35 = arith.addf %33, %34 : vector<2x32xf32>
    %36 = math.tanh %35 : vector<2x32xf32>
    %37 = arith.mulf %30, %36 : vector<2x32xf32>
    %38 = vector.extract_strided_slice %21 {offsets = [0, 0], sizes = [2, 96], strides = [1, 1]} : vector<2x128xf32> to vector<2x96xf32>
    %39 = arith.negf %38 : vector<2x96xf32>
    %40 = math.exp %39 : vector<2x96xf32>
    %cst_15 = arith.constant 1.000000e+00 : f32
    %41 = vector.broadcast %cst_15 : f32 to vector<2x96xf32>
    %42 = arith.addf %41, %40 : vector<2x96xf32>
    %43 = arith.divf %41, %42 : vector<2x96xf32>
    %44 = vector.extract_strided_slice %43 {offsets = [0, 0], sizes = [2, 32], strides = [1, 1]} : vector<2x96xf32> to vector<2x32xf32>
    %45 = vector.extract_strided_slice %43 {offsets = [0, 32], sizes = [2, 32], strides = [1, 1]} : vector<2x96xf32> to vector<2x32xf32>
    %46 = vector.extract_strided_slice %43 {offsets = [0, 64], sizes = [2, 32], strides = [1, 1]} : vector<2x96xf32> to vector<2x32xf32>
    %47 = vector.extract_strided_slice %21 {offsets = [0, 96], sizes = [2, 32], strides = [1, 1]} : vector<2x128xf32> to vector<2x32xf32>
    %48 = math.tanh %47 : vector<2x32xf32>
    %49 = arith.mulf %45, %15 : vector<2x32xf32>
    %50 = arith.mulf %44, %48 : vector<2x32xf32>
    %51 = arith.addf %49, %50 : vector<2x32xf32>
    %52 = math.tanh %51 : vector<2x32xf32>
    %53 = arith.mulf %46, %52 : vector<2x32xf32>
    %c0_16 = arith.constant 0 : index
    %c0_17 = arith.constant 0 : index
    %54 = vector.load %arg16[%c0_16, %c0_17] : memref<16x64xf32, #tpu.memory_space<vmem>>, vector<2x32xf32>
    tpu.vector_store %arg16[%c0_16, %c0_17], %37 {strides = array<i32>} : memref<16x64xf32, #tpu.memory_space<vmem>>, vector<2x32xf32>,
    %c14 = arith.constant 14 : index
    %c32 = arith.constant 32 : index
    %55 = vector.load %arg16[%c14, %c32] : memref<16x64xf32, #tpu.memory_space<vmem>>, vector<2x32xf32>
    tpu.vector_store %arg16[%c14, %c32], %53 {strides = array<i32>} : memref<16x64xf32, #tpu.memory_space<vmem>>, vector<2x32xf32>,
    %56 = vector.extract_strided_slice %8 {offsets = [2, 0], sizes = [2, 128], strides = [1, 1]} : vector<16x128xf32> to vector<2x128xf32>
    %cst_18 = arith.constant dense<0.000000e+00> : vector<2x128xf32>
    %57 = tpu.matmul %37, %10, %cst_18 {dimension_numbers = #tpu.dot_dimension_numbers<[1], [0], [0], [1], [0, 0, 1, 1], [], []>} : vector<2x32xf32>, vector<32x128xf32>, vector<2x128xf32> -> vector<2x128xf32>
    %58 = arith.addf %56, %57 : vector<2x128xf32>
    %59 = vector.extract_strided_slice %9 {offsets = [12, 0], sizes = [2, 128], strides = [1, 1]} : vector<16x128xf32> to vector<2x128xf32>
    %cst_19 = arith.constant dense<0.000000e+00> : vector<2x128xf32>
    %60 = tpu.matmul %53, %11, %cst_19 {dimension_numbers = #tpu.dot_dimension_numbers<[1], [0], [0], [1], [0, 0, 1, 1], [], []>} : vector<2x32xf32>, vector<32x128xf32>, vector<2x128xf32> -> vector<2x128xf32>
    %61 = arith.addf %59, %60 : vector<2x128xf32>
    %62 = vector.extract_strided_slice %58 {offsets = [0, 0], sizes = [2, 96], strides = [1, 1]} : vector<2x128xf32> to vector<2x96xf32>
    %63 = arith.negf %62 : vector<2x96xf32>
    %64 = math.exp %63 : vector<2x96xf32>
    %cst_20 = arith.constant 1.000000e+00 : f32
    %65 = vector.broadcast %cst_20 : f32 to vector<2x96xf32>
    %66 = arith.addf %65, %64 : vector<2x96xf32>
    %67 = arith.divf %65, %66 : vector<2x96xf32>
    %68 = vector.extract_strided_slice %67 {offsets = [0, 0], sizes = [2, 32], strides = [1, 1]} : vector<2x96xf32> to vector<2x32xf32>
    %69 = vector.extract_strided_slice %67 {offsets = [0, 32], sizes = [2, 32], strides = [1, 1]} : vector<2x96xf32> to vector<2x32xf32>
    %70 = vector.extract_strided_slice %67 {offsets = [0, 64], sizes = [2, 32], strides = [1, 1]} : vector<2x96xf32> to vector<2x32xf32>
    %71 = vector.extract_strided_slice %58 {offsets = [0, 96], sizes = [2, 32], strides = [1, 1]} : vector<2x128xf32> to vector<2x32xf32>
    %72 = math.tanh %71 : vector<2x32xf32>
    %73 = arith.mulf %69, %35 : vector<2x32xf32>
    %74 = arith.mulf %68, %72 : vector<2x32xf32>
    %75 = arith.addf %73, %74 : vector<2x32xf32>
    %76 = math.tanh %75 : vector<2x32xf32>
    %77 = arith.mulf %70, %76 : vector<2x32xf32>
    %78 = vector.extract_strided_slice %61 {offsets = [0, 0], sizes = [2, 96], strides = [1, 1]} : vector<2x128xf32> to vector<2x96xf32>
    %79 = arith.negf %78 : vector<2x96xf32>
    %80 = math.exp %79 : vector<2x96xf32>
    %cst_21 = arith.constant 1.000000e+00 : f32
    %81 = vector.broadcast %cst_21 : f32 to vector<2x96xf32>
    %82 = arith.addf %81, %80 : vector<2x96xf32>
    %83 = arith.divf %81, %82 : vector<2x96xf32>
    %84 = vector.extract_strided_slice %83 {offsets = [0, 0], sizes = [2, 32], strides = [1, 1]} : vector<2x96xf32> to vector<2x32xf32>
    %85 = vector.extract_strided_slice %83 {offsets = [0, 32], sizes = [2, 32], strides = [1, 1]} : vector<2x96xf32> to vector<2x32xf32>
    %86 = vector.extract_strided_slice %83 {offsets = [0, 64], sizes = [2, 32], strides = [1, 1]} : vector<2x96xf32> to vector<2x32xf32>
    %87 = vector.extract_strided_slice %61 {offsets = [0, 96], sizes = [2, 32], strides = [1, 1]} : vector<2x128xf32> to vector<2x32xf32>
    %88 = math.tanh %87 : vector<2x32xf32>
    %89 = arith.mulf %85, %51 : vector<2x32xf32>
    %90 = arith.mulf %84, %88 : vector<2x32xf32>
    %91 = arith.addf %89, %90 : vector<2x32xf32>
    %92 = math.tanh %91 : vector<2x32xf32>
    %93 = arith.mulf %86, %92 : vector<2x32xf32>
    %c2 = arith.constant 2 : index
    %c0_22 = arith.constant 0 : index
    %94 = vector.load %arg16[%c2, %c0_22] : memref<16x64xf32, #tpu.memory_space<vmem>>, vector<2x32xf32>
    tpu.vector_store %arg16[%c2, %c0_22], %77 {strides = array<i32>} : memref<16x64xf32, #tpu.memory_space<vmem>>, vector<2x32xf32>,
    %c12 = arith.constant 12 : index
    %c32_23 = arith.constant 32 : index
    %95 = vector.load %arg16[%c12, %c32_23] : memref<16x64xf32, #tpu.memory_space<vmem>>, vector<2x32xf32>
    tpu.vector_store %arg16[%c12, %c32_23], %93 {strides = array<i32>} : memref<16x64xf32, #tpu.memory_space<vmem>>, vector<2x32xf32>,
    %96 = vector.extract_strided_slice %8 {offsets = [4, 0], sizes = [2, 128], strides = [1, 1]} : vector<16x128xf32> to vector<2x128xf32>
    %cst_24 = arith.constant dense<0.000000e+00> : vector<2x128xf32>
    %97 = tpu.matmul %77, %10, %cst_24 {dimension_numbers = #tpu.dot_dimension_numbers<[1], [0], [0], [1], [0, 0, 1, 1], [], []>} : vector<2x32xf32>, vector<32x128xf32>, vector<2x128xf32> -> vector<2x128xf32>
    %98 = arith.addf %96, %97 : vector<2x128xf32>
    %99 = vector.extract_strided_slice %9 {offsets = [10, 0], sizes = [2, 128], strides = [1, 1]} : vector<16x128xf32> to vector<2x128xf32>
    %cst_25 = arith.constant dense<0.000000e+00> : vector<2x128xf32>
    %100 = tpu.matmul %93, %11, %cst_25 {dimension_numbers = #tpu.dot_dimension_numbers<[1], [0], [0], [1], [0, 0, 1, 1], [], []>} : vector<2x32xf32>, vector<32x128xf32>, vector<2x128xf32> -> vector<2x128xf32>
    %101 = arith.addf %99, %100 : vector<2x128xf32>
    %102 = vector.extract_strided_slice %98 {offsets = [0, 0], sizes = [2, 96], strides = [1, 1]} : vector<2x128xf32> to vector<2x96xf32>
    %103 = arith.negf %102 : vector<2x96xf32>
    %104 = math.exp %103 : vector<2x96xf32>
    %cst_26 = arith.constant 1.000000e+00 : f32
    %105 = vector.broadcast %cst_26 : f32 to vector<2x96xf32>
    %106 = arith.addf %105, %104 : vector<2x96xf32>
    %107 = arith.divf %105, %106 : vector<2x96xf32>
    %108 = vector.extract_strided_slice %107 {offsets = [0, 0], sizes = [2, 32], strides = [1, 1]} : vector<2x96xf32> to vector<2x32xf32>
    %109 = vector.extract_strided_slice %107 {offsets = [0, 32], sizes = [2, 32], strides = [1, 1]} : vector<2x96xf32> to vector<2x32xf32>
    %110 = vector.extract_strided_slice %107 {offsets = [0, 64], sizes = [2, 32], strides = [1, 1]} : vector<2x96xf32> to vector<2x32xf32>
    %111 = vector.extract_strided_slice %98 {offsets = [0, 96], sizes = [2, 32], strides = [1, 1]} : vector<2x128xf32> to vector<2x32xf32>
    %112 = math.tanh %111 : vector<2x32xf32>
    %113 = arith.mulf %109, %75 : vector<2x32xf32>
    %114 = arith.mulf %108, %112 : vector<2x32xf32>
    %115 = arith.addf %113, %114 : vector<2x32xf32>
    %116 = math.tanh %115 : vector<2x32xf32>
    %117 = arith.mulf %110, %116 : vector<2x32xf32>
    %118 = vector.extract_strided_slice %101 {offsets = [0, 0], sizes = [2, 96], strides = [1, 1]} : vector<2x128xf32> to vector<2x96xf32>
    %119 = arith.negf %118 : vector<2x96xf32>
    %120 = math.exp %119 : vector<2x96xf32>
    %cst_27 = arith.constant 1.000000e+00 : f32
    %121 = vector.broadcast %cst_27 : f32 to vector<2x96xf32>
    %122 = arith.addf %121, %120 : vector<2x96xf32>
    %123 = arith.divf %121, %122 : vector<2x96xf32>
    %124 = vector.extract_strided_slice %123 {offsets = [0, 0], sizes = [2, 32], strides = [1, 1]} : vector<2x96xf32> to vector<2x32xf32>
    %125 = vector.extract_strided_slice %123 {offsets = [0, 32], sizes = [2, 32], strides = [1, 1]} : vector<2x96xf32> to vector<2x32xf32>
    %126 = vector.extract_strided_slice %123 {offsets = [0, 64], sizes = [2, 32], strides = [1, 1]} : vector<2x96xf32> to vector<2x32xf32>
    %127 = vector.extract_strided_slice %101 {offsets = [0, 96], sizes = [2, 32], strides = [1, 1]} : vector<2x128xf32> to vector<2x32xf32>
    %128 = math.tanh %127 : vector<2x32xf32>
    %129 = arith.mulf %125, %91 : vector<2x32xf32>
    %130 = arith.mulf %124, %128 : vector<2x32xf32>
    %131 = arith.addf %129, %130 : vector<2x32xf32>
    %132 = math.tanh %131 : vector<2x32xf32>
    %133 = arith.mulf %126, %132 : vector<2x32xf32>
    %c4 = arith.constant 4 : index
    %c0_28 = arith.constant 0 : index
    %134 = vector.load %arg16[%c4, %c0_28] : memref<16x64xf32, #tpu.memory_space<vmem>>, vector<2x32xf32>
    tpu.vector_store %arg16[%c4, %c0_28], %117 {strides = array<i32>} : memref<16x64xf32, #tpu.memory_space<vmem>>, vector<2x32xf32>,
    %c10 = arith.constant 10 : index
    %c32_29 = arith.constant 32 : index
    %135 = vector.load %arg16[%c10, %c32_29] : memref<16x64xf32, #tpu.memory_space<vmem>>, vector<2x32xf32>
    tpu.vector_store %arg16[%c10, %c32_29], %133 {strides = array<i32>} : memref<16x64xf32, #tpu.memory_space<vmem>>, vector<2x32xf32>,
    %136 = vector.extract_strided_slice %8 {offsets = [6, 0], sizes = [2, 128], strides = [1, 1]} : vector<16x128xf32> to vector<2x128xf32>
    %cst_30 = arith.constant dense<0.000000e+00> : vector<2x128xf32>
    %137 = tpu.matmul %117, %10, %cst_30 {dimension_numbers = #tpu.dot_dimension_numbers<[1], [0], [0], [1], [0, 0, 1, 1], [], []>} : vector<2x32xf32>, vector<32x128xf32>, vector<2x128xf32> -> vector<2x128xf32>
    %138 = arith.addf %136, %137 : vector<2x128xf32>
    %139 = vector.extract_strided_slice %9 {offsets = [8, 0], sizes = [2, 128], strides = [1, 1]} : vector<16x128xf32> to vector<2x128xf32>
    %cst_31 = arith.constant dense<0.000000e+00> : vector<2x128xf32>
    %140 = tpu.matmul %133, %11, %cst_31 {dimension_numbers = #tpu.dot_dimension_numbers<[1], [0], [0], [1], [0, 0, 1, 1], [], []>} : vector<2x32xf32>, vector<32x128xf32>, vector<2x128xf32> -> vector<2x128xf32>
    %141 = arith.addf %139, %140 : vector<2x128xf32>
    %142 = vector.extract_strided_slice %138 {offsets = [0, 0], sizes = [2, 96], strides = [1, 1]} : vector<2x128xf32> to vector<2x96xf32>
    %143 = arith.negf %142 : vector<2x96xf32>
    %144 = math.exp %143 : vector<2x96xf32>
    %cst_32 = arith.constant 1.000000e+00 : f32
    %145 = vector.broadcast %cst_32 : f32 to vector<2x96xf32>
    %146 = arith.addf %145, %144 : vector<2x96xf32>
    %147 = arith.divf %145, %146 : vector<2x96xf32>
    %148 = vector.extract_strided_slice %147 {offsets = [0, 0], sizes = [2, 32], strides = [1, 1]} : vector<2x96xf32> to vector<2x32xf32>
    %149 = vector.extract_strided_slice %147 {offsets = [0, 32], sizes = [2, 32], strides = [1, 1]} : vector<2x96xf32> to vector<2x32xf32>
    %150 = vector.extract_strided_slice %147 {offsets = [0, 64], sizes = [2, 32], strides = [1, 1]} : vector<2x96xf32> to vector<2x32xf32>
    %151 = vector.extract_strided_slice %138 {offsets = [0, 96], sizes = [2, 32], strides = [1, 1]} : vector<2x128xf32> to vector<2x32xf32>
    %152 = math.tanh %151 : vector<2x32xf32>
    %153 = arith.mulf %149, %115 : vector<2x32xf32>
    %154 = arith.mulf %148, %152 : vector<2x32xf32>
    %155 = arith.addf %153, %154 : vector<2x32xf32>
    %156 = math.tanh %155 : vector<2x32xf32>
    %157 = arith.mulf %150, %156 : vector<2x32xf32>
    %158 = vector.extract_strided_slice %141 {offsets = [0, 0], sizes = [2, 96], strides = [1, 1]} : vector<2x128xf32> to vector<2x96xf32>
    %159 = arith.negf %158 : vector<2x96xf32>
    %160 = math.exp %159 : vector<2x96xf32>
    %cst_33 = arith.constant 1.000000e+00 : f32
    %161 = vector.broadcast %cst_33 : f32 to vector<2x96xf32>
    %162 = arith.addf %161, %160 : vector<2x96xf32>
    %163 = arith.divf %161, %162 : vector<2x96xf32>
    %164 = vector.extract_strided_slice %163 {offsets = [0, 0], sizes = [2, 32], strides = [1, 1]} : vector<2x96xf32> to vector<2x32xf32>
    %165 = vector.extract_strided_slice %163 {offsets = [0, 32], sizes = [2, 32], strides = [1, 1]} : vector<2x96xf32> to vector<2x32xf32>
    %166 = vector.extract_strided_slice %163 {offsets = [0, 64], sizes = [2, 32], strides = [1, 1]} : vector<2x96xf32> to vector<2x32xf32>
    %167 = vector.extract_strided_slice %141 {offsets = [0, 96], sizes = [2, 32], strides = [1, 1]} : vector<2x128xf32> to vector<2x32xf32>
    %168 = math.tanh %167 : vector<2x32xf32>
    %169 = arith.mulf %165, %131 : vector<2x32xf32>
    %170 = arith.mulf %164, %168 : vector<2x32xf32>
    %171 = arith.addf %169, %170 : vector<2x32xf32>
    %172 = math.tanh %171 : vector<2x32xf32>
    %173 = arith.mulf %166, %172 : vector<2x32xf32>
    %c6 = arith.constant 6 : index
    %c0_34 = arith.constant 0 : index
    %174 = vector.load %arg16[%c6, %c0_34] : memref<16x64xf32, #tpu.memory_space<vmem>>, vector<2x32xf32>
    tpu.vector_store %arg16[%c6, %c0_34], %157 {strides = array<i32>} : memref<16x64xf32, #tpu.memory_space<vmem>>, vector<2x32xf32>,
    %c8 = arith.constant 8 : index
    %c32_35 = arith.constant 32 : index
    %175 = vector.load %arg16[%c8, %c32_35] : memref<16x64xf32, #tpu.memory_space<vmem>>, vector<2x32xf32>
    tpu.vector_store %arg16[%c8, %c32_35], %173 {strides = array<i32>} : memref<16x64xf32, #tpu.memory_space<vmem>>, vector<2x32xf32>,
    %176 = vector.extract_strided_slice %8 {offsets = [8, 0], sizes = [2, 128], strides = [1, 1]} : vector<16x128xf32> to vector<2x128xf32>
    %cst_36 = arith.constant dense<0.000000e+00> : vector<2x128xf32>
    %177 = tpu.matmul %157, %10, %cst_36 {dimension_numbers = #tpu.dot_dimension_numbers<[1], [0], [0], [1], [0, 0, 1, 1], [], []>} : vector<2x32xf32>, vector<32x128xf32>, vector<2x128xf32> -> vector<2x128xf32>
    %178 = arith.addf %176, %177 : vector<2x128xf32>
    %179 = vector.extract_strided_slice %9 {offsets = [6, 0], sizes = [2, 128], strides = [1, 1]} : vector<16x128xf32> to vector<2x128xf32>
    %cst_37 = arith.constant dense<0.000000e+00> : vector<2x128xf32>
    %180 = tpu.matmul %173, %11, %cst_37 {dimension_numbers = #tpu.dot_dimension_numbers<[1], [0], [0], [1], [0, 0, 1, 1], [], []>} : vector<2x32xf32>, vector<32x128xf32>, vector<2x128xf32> -> vector<2x128xf32>
    %181 = arith.addf %179, %180 : vector<2x128xf32>
    %182 = vector.extract_strided_slice %178 {offsets = [0, 0], sizes = [2, 96], strides = [1, 1]} : vector<2x128xf32> to vector<2x96xf32>
    %183 = arith.negf %182 : vector<2x96xf32>
    %184 = math.exp %183 : vector<2x96xf32>
    %cst_38 = arith.constant 1.000000e+00 : f32
    %185 = vector.broadcast %cst_38 : f32 to vector<2x96xf32>
    %186 = arith.addf %185, %184 : vector<2x96xf32>
    %187 = arith.divf %185, %186 : vector<2x96xf32>
    %188 = vector.extract_strided_slice %187 {offsets = [0, 0], sizes = [2, 32], strides = [1, 1]} : vector<2x96xf32> to vector<2x32xf32>
    %189 = vector.extract_strided_slice %187 {offsets = [0, 32], sizes = [2, 32], strides = [1, 1]} : vector<2x96xf32> to vector<2x32xf32>
    %190 = vector.extract_strided_slice %187 {offsets = [0, 64], sizes = [2, 32], strides = [1, 1]} : vector<2x96xf32> to vector<2x32xf32>
    %191 = vector.extract_strided_slice %178 {offsets = [0, 96], sizes = [2, 32], strides = [1, 1]} : vector<2x128xf32> to vector<2x32xf32>
    %192 = math.tanh %191 : vector<2x32xf32>
    %193 = arith.mulf %189, %155 : vector<2x32xf32>
    %194 = arith.mulf %188, %192 : vector<2x32xf32>
    %195 = arith.addf %193, %194 : vector<2x32xf32>
    %196 = math.tanh %195 : vector<2x32xf32>
    %197 = arith.mulf %190, %196 : vector<2x32xf32>
    %198 = vector.extract_strided_slice %181 {offsets = [0, 0], sizes = [2, 96], strides = [1, 1]} : vector<2x128xf32> to vector<2x96xf32>
    %199 = arith.negf %198 : vector<2x96xf32>
    %200 = math.exp %199 : vector<2x96xf32>
    %cst_39 = arith.constant 1.000000e+00 : f32
    %201 = vector.broadcast %cst_39 : f32 to vector<2x96xf32>
    %202 = arith.addf %201, %200 : vector<2x96xf32>
    %203 = arith.divf %201, %202 : vector<2x96xf32>
    %204 = vector.extract_strided_slice %203 {offsets = [0, 0], sizes = [2, 32], strides = [1, 1]} : vector<2x96xf32> to vector<2x32xf32>
    %205 = vector.extract_strided_slice %203 {offsets = [0, 32], sizes = [2, 32], strides = [1, 1]} : vector<2x96xf32> to vector<2x32xf32>
    %206 = vector.extract_strided_slice %203 {offsets = [0, 64], sizes = [2, 32], strides = [1, 1]} : vector<2x96xf32> to vector<2x32xf32>
    %207 = vector.extract_strided_slice %181 {offsets = [0, 96], sizes = [2, 32], strides = [1, 1]} : vector<2x128xf32> to vector<2x32xf32>
    %208 = math.tanh %207 : vector<2x32xf32>
    %209 = arith.mulf %205, %171 : vector<2x32xf32>
    %210 = arith.mulf %204, %208 : vector<2x32xf32>
    %211 = arith.addf %209, %210 : vector<2x32xf32>
    %212 = math.tanh %211 : vector<2x32xf32>
    %213 = arith.mulf %206, %212 : vector<2x32xf32>
    %c8_40 = arith.constant 8 : index
    %c0_41 = arith.constant 0 : index
    %214 = vector.load %arg16[%c8_40, %c0_41] : memref<16x64xf32, #tpu.memory_space<vmem>>, vector<2x32xf32>
    tpu.vector_store %arg16[%c8_40, %c0_41], %197 {strides = array<i32>} : memref<16x64xf32, #tpu.memory_space<vmem>>, vector<2x32xf32>,
    %c6_42 = arith.constant 6 : index
    %c32_43 = arith.constant 32 : index
    %215 = vector.load %arg16[%c6_42, %c32_43] : memref<16x64xf32, #tpu.memory_space<vmem>>, vector<2x32xf32>
    tpu.vector_store %arg16[%c6_42, %c32_43], %213 {strides = array<i32>} : memref<16x64xf32, #tpu.memory_space<vmem>>, vector<2x32xf32>,
    %216 = vector.extract_strided_slice %8 {offsets = [10, 0], sizes = [2, 128], strides = [1, 1]} : vector<16x128xf32> to vector<2x128xf32>
    %cst_44 = arith.constant dense<0.000000e+00> : vector<2x128xf32>
    %217 = tpu.matmul %197, %10, %cst_44 {dimension_numbers = #tpu.dot_dimension_numbers<[1], [0], [0], [1], [0, 0, 1, 1], [], []>} : vector<2x32xf32>, vector<32x128xf32>, vector<2x128xf32> -> vector<2x128xf32>
    %218 = arith.addf %216, %217 : vector<2x128xf32>
    %219 = vector.extract_strided_slice %9 {offsets = [4, 0], sizes = [2, 128], strides = [1, 1]} : vector<16x128xf32> to vector<2x128xf32>
    %cst_45 = arith.constant dense<0.000000e+00> : vector<2x128xf32>
    %220 = tpu.matmul %213, %11, %cst_45 {dimension_numbers = #tpu.dot_dimension_numbers<[1], [0], [0], [1], [0, 0, 1, 1], [], []>} : vector<2x32xf32>, vector<32x128xf32>, vector<2x128xf32> -> vector<2x128xf32>
    %221 = arith.addf %219, %220 : vector<2x128xf32>
    %222 = vector.extract_strided_slice %218 {offsets = [0, 0], sizes = [2, 96], strides = [1, 1]} : vector<2x128xf32> to vector<2x96xf32>
    %223 = arith.negf %222 : vector<2x96xf32>
    %224 = math.exp %223 : vector<2x96xf32>
    %cst_46 = arith.constant 1.000000e+00 : f32
    %225 = vector.broadcast %cst_46 : f32 to vector<2x96xf32>
    %226 = arith.addf %225, %224 : vector<2x96xf32>
    %227 = arith.divf %225, %226 : vector<2x96xf32>
    %228 = vector.extract_strided_slice %227 {offsets = [0, 0], sizes = [2, 32], strides = [1, 1]} : vector<2x96xf32> to vector<2x32xf32>
    %229 = vector.extract_strided_slice %227 {offsets = [0, 32], sizes = [2, 32], strides = [1, 1]} : vector<2x96xf32> to vector<2x32xf32>
    %230 = vector.extract_strided_slice %227 {offsets = [0, 64], sizes = [2, 32], strides = [1, 1]} : vector<2x96xf32> to vector<2x32xf32>
    %231 = vector.extract_strided_slice %218 {offsets = [0, 96], sizes = [2, 32], strides = [1, 1]} : vector<2x128xf32> to vector<2x32xf32>
    %232 = math.tanh %231 : vector<2x32xf32>
    %233 = arith.mulf %229, %195 : vector<2x32xf32>
    %234 = arith.mulf %228, %232 : vector<2x32xf32>
    %235 = arith.addf %233, %234 : vector<2x32xf32>
    %236 = math.tanh %235 : vector<2x32xf32>
    %237 = arith.mulf %230, %236 : vector<2x32xf32>
    %238 = vector.extract_strided_slice %221 {offsets = [0, 0], sizes = [2, 96], strides = [1, 1]} : vector<2x128xf32> to vector<2x96xf32>
    %239 = arith.negf %238 : vector<2x96xf32>
    %240 = math.exp %239 : vector<2x96xf32>
    %cst_47 = arith.constant 1.000000e+00 : f32
    %241 = vector.broadcast %cst_47 : f32 to vector<2x96xf32>
    %242 = arith.addf %241, %240 : vector<2x96xf32>
    %243 = arith.divf %241, %242 : vector<2x96xf32>
    %244 = vector.extract_strided_slice %243 {offsets = [0, 0], sizes = [2, 32], strides = [1, 1]} : vector<2x96xf32> to vector<2x32xf32>
    %245 = vector.extract_strided_slice %243 {offsets = [0, 32], sizes = [2, 32], strides = [1, 1]} : vector<2x96xf32> to vector<2x32xf32>
    %246 = vector.extract_strided_slice %243 {offsets = [0, 64], sizes = [2, 32], strides = [1, 1]} : vector<2x96xf32> to vector<2x32xf32>
    %247 = vector.extract_strided_slice %221 {offsets = [0, 96], sizes = [2, 32], strides = [1, 1]} : vector<2x128xf32> to vector<2x32xf32>
    %248 = math.tanh %247 : vector<2x32xf32>
    %249 = arith.mulf %245, %211 : vector<2x32xf32>
    %250 = arith.mulf %244, %248 : vector<2x32xf32>
    %251 = arith.addf %249, %250 : vector<2x32xf32>
    %252 = math.tanh %251 : vector<2x32xf32>
    %253 = arith.mulf %246, %252 : vector<2x32xf32>
    %c10_48 = arith.constant 10 : index
    %c0_49 = arith.constant 0 : index
    %254 = vector.load %arg16[%c10_48, %c0_49] : memref<16x64xf32, #tpu.memory_space<vmem>>, vector<2x32xf32>
    tpu.vector_store %arg16[%c10_48, %c0_49], %237 {strides = array<i32>} : memref<16x64xf32, #tpu.memory_space<vmem>>, vector<2x32xf32>,
    %c4_50 = arith.constant 4 : index
    %c32_51 = arith.constant 32 : index
    %255 = vector.load %arg16[%c4_50, %c32_51] : memref<16x64xf32, #tpu.memory_space<vmem>>, vector<2x32xf32>
    tpu.vector_store %arg16[%c4_50, %c32_51], %253 {strides = array<i32>} : memref<16x64xf32, #tpu.memory_space<vmem>>, vector<2x32xf32>,
    %256 = vector.extract_strided_slice %8 {offsets = [12, 0], sizes = [2, 128], strides = [1, 1]} : vector<16x128xf32> to vector<2x128xf32>
    %cst_52 = arith.constant dense<0.000000e+00> : vector<2x128xf32>
    %257 = tpu.matmul %237, %10, %cst_52 {dimension_numbers = #tpu.dot_dimension_numbers<[1], [0], [0], [1], [0, 0, 1, 1], [], []>} : vector<2x32xf32>, vector<32x128xf32>, vector<2x128xf32> -> vector<2x128xf32>
    %258 = arith.addf %256, %257 : vector<2x128xf32>
    %259 = vector.extract_strided_slice %9 {offsets = [2, 0], sizes = [2, 128], strides = [1, 1]} : vector<16x128xf32> to vector<2x128xf32>
    %cst_53 = arith.constant dense<0.000000e+00> : vector<2x128xf32>
    %260 = tpu.matmul %253, %11, %cst_53 {dimension_numbers = #tpu.dot_dimension_numbers<[1], [0], [0], [1], [0, 0, 1, 1], [], []>} : vector<2x32xf32>, vector<32x128xf32>, vector<2x128xf32> -> vector<2x128xf32>
    %261 = arith.addf %259, %260 : vector<2x128xf32>
    %262 = vector.extract_strided_slice %258 {offsets = [0, 0], sizes = [2, 96], strides = [1, 1]} : vector<2x128xf32> to vector<2x96xf32>
    %263 = arith.negf %262 : vector<2x96xf32>
    %264 = math.exp %263 : vector<2x96xf32>
    %cst_54 = arith.constant 1.000000e+00 : f32
    %265 = vector.broadcast %cst_54 : f32 to vector<2x96xf32>
    %266 = arith.addf %265, %264 : vector<2x96xf32>
    %267 = arith.divf %265, %266 : vector<2x96xf32>
    %268 = vector.extract_strided_slice %267 {offsets = [0, 0], sizes = [2, 32], strides = [1, 1]} : vector<2x96xf32> to vector<2x32xf32>
    %269 = vector.extract_strided_slice %267 {offsets = [0, 32], sizes = [2, 32], strides = [1, 1]} : vector<2x96xf32> to vector<2x32xf32>
    %270 = vector.extract_strided_slice %267 {offsets = [0, 64], sizes = [2, 32], strides = [1, 1]} : vector<2x96xf32> to vector<2x32xf32>
    %271 = vector.extract_strided_slice %258 {offsets = [0, 96], sizes = [2, 32], strides = [1, 1]} : vector<2x128xf32> to vector<2x32xf32>
    %272 = math.tanh %271 : vector<2x32xf32>
    %273 = arith.mulf %269, %235 : vector<2x32xf32>
    %274 = arith.mulf %268, %272 : vector<2x32xf32>
    %275 = arith.addf %273, %274 : vector<2x32xf32>
    %276 = math.tanh %275 : vector<2x32xf32>
    %277 = arith.mulf %270, %276 : vector<2x32xf32>
    %278 = vector.extract_strided_slice %261 {offsets = [0, 0], sizes = [2, 96], strides = [1, 1]} : vector<2x128xf32> to vector<2x96xf32>
    %279 = arith.negf %278 : vector<2x96xf32>
    %280 = math.exp %279 : vector<2x96xf32>
    %cst_55 = arith.constant 1.000000e+00 : f32
    %281 = vector.broadcast %cst_55 : f32 to vector<2x96xf32>
    %282 = arith.addf %281, %280 : vector<2x96xf32>
    %283 = arith.divf %281, %282 : vector<2x96xf32>
    %284 = vector.extract_strided_slice %283 {offsets = [0, 0], sizes = [2, 32], strides = [1, 1]} : vector<2x96xf32> to vector<2x32xf32>
    %285 = vector.extract_strided_slice %283 {offsets = [0, 32], sizes = [2, 32], strides = [1, 1]} : vector<2x96xf32> to vector<2x32xf32>
    %286 = vector.extract_strided_slice %283 {offsets = [0, 64], sizes = [2, 32], strides = [1, 1]} : vector<2x96xf32> to vector<2x32xf32>
    %287 = vector.extract_strided_slice %261 {offsets = [0, 96], sizes = [2, 32], strides = [1, 1]} : vector<2x128xf32> to vector<2x32xf32>
    %288 = math.tanh %287 : vector<2x32xf32>
    %289 = arith.mulf %285, %251 : vector<2x32xf32>
    %290 = arith.mulf %284, %288 : vector<2x32xf32>
    %291 = arith.addf %289, %290 : vector<2x32xf32>
    %292 = math.tanh %291 : vector<2x32xf32>
    %293 = arith.mulf %286, %292 : vector<2x32xf32>
    %c12_56 = arith.constant 12 : index
    %c0_57 = arith.constant 0 : index
    %294 = vector.load %arg16[%c12_56, %c0_57] : memref<16x64xf32, #tpu.memory_space<vmem>>, vector<2x32xf32>
    tpu.vector_store %arg16[%c12_56, %c0_57], %277 {strides = array<i32>} : memref<16x64xf32, #tpu.memory_space<vmem>>, vector<2x32xf32>,
    %c2_58 = arith.constant 2 : index
    %c32_59 = arith.constant 32 : index
    %295 = vector.load %arg16[%c2_58, %c32_59] : memref<16x64xf32, #tpu.memory_space<vmem>>, vector<2x32xf32>
    tpu.vector_store %arg16[%c2_58, %c32_59], %293 {strides = array<i32>} : memref<16x64xf32, #tpu.memory_space<vmem>>, vector<2x32xf32>,
    %296 = vector.extract_strided_slice %8 {offsets = [14, 0], sizes = [2, 128], strides = [1, 1]} : vector<16x128xf32> to vector<2x128xf32>
    %cst_60 = arith.constant dense<0.000000e+00> : vector<2x128xf32>
    %297 = tpu.matmul %277, %10, %cst_60 {dimension_numbers = #tpu.dot_dimension_numbers<[1], [0], [0], [1], [0, 0, 1, 1], [], []>} : vector<2x32xf32>, vector<32x128xf32>, vector<2x128xf32> -> vector<2x128xf32>
    %298 = arith.addf %296, %297 : vector<2x128xf32>
    %299 = vector.extract_strided_slice %9 {offsets = [0, 0], sizes = [2, 128], strides = [1, 1]} : vector<16x128xf32> to vector<2x128xf32>
    %cst_61 = arith.constant dense<0.000000e+00> : vector<2x128xf32>
    %300 = tpu.matmul %293, %11, %cst_61 {dimension_numbers = #tpu.dot_dimension_numbers<[1], [0], [0], [1], [0, 0, 1, 1], [], []>} : vector<2x32xf32>, vector<32x128xf32>, vector<2x128xf32> -> vector<2x128xf32>
    %301 = arith.addf %299, %300 : vector<2x128xf32>
    %302 = vector.extract_strided_slice %298 {offsets = [0, 0], sizes = [2, 96], strides = [1, 1]} : vector<2x128xf32> to vector<2x96xf32>
    %303 = arith.negf %302 : vector<2x96xf32>
    %304 = math.exp %303 : vector<2x96xf32>
    %cst_62 = arith.constant 1.000000e+00 : f32
    %305 = vector.broadcast %cst_62 : f32 to vector<2x96xf32>
    %306 = arith.addf %305, %304 : vector<2x96xf32>
    %307 = arith.divf %305, %306 : vector<2x96xf32>
    %308 = vector.extract_strided_slice %307 {offsets = [0, 0], sizes = [2, 32], strides = [1, 1]} : vector<2x96xf32> to vector<2x32xf32>
    %309 = vector.extract_strided_slice %307 {offsets = [0, 32], sizes = [2, 32], strides = [1, 1]} : vector<2x96xf32> to vector<2x32xf32>
    %310 = vector.extract_strided_slice %307 {offsets = [0, 64], sizes = [2, 32], strides = [1, 1]} : vector<2x96xf32> to vector<2x32xf32>
    %311 = vector.extract_strided_slice %298 {offsets = [0, 96], sizes = [2, 32], strides = [1, 1]} : vector<2x128xf32> to vector<2x32xf32>
    %312 = math.tanh %311 : vector<2x32xf32>
    %313 = arith.mulf %309, %275 : vector<2x32xf32>
    %314 = arith.mulf %308, %312 : vector<2x32xf32>
    %315 = arith.addf %313, %314 : vector<2x32xf32>
    %316 = math.tanh %315 : vector<2x32xf32>
    %317 = arith.mulf %310, %316 : vector<2x32xf32>
    %318 = vector.extract_strided_slice %301 {offsets = [0, 0], sizes = [2, 96], strides = [1, 1]} : vector<2x128xf32> to vector<2x96xf32>
    %319 = arith.negf %318 : vector<2x96xf32>
    %320 = math.exp %319 : vector<2x96xf32>
    %cst_63 = arith.constant 1.000000e+00 : f32
    %321 = vector.broadcast %cst_63 : f32 to vector<2x96xf32>
    %322 = arith.addf %321, %320 : vector<2x96xf32>
    %323 = arith.divf %321, %322 : vector<2x96xf32>
    %324 = vector.extract_strided_slice %323 {offsets = [0, 0], sizes = [2, 32], strides = [1, 1]} : vector<2x96xf32> to vector<2x32xf32>
    %325 = vector.extract_strided_slice %323 {offsets = [0, 32], sizes = [2, 32], strides = [1, 1]} : vector<2x96xf32> to vector<2x32xf32>
    %326 = vector.extract_strided_slice %323 {offsets = [0, 64], sizes = [2, 32], strides = [1, 1]} : vector<2x96xf32> to vector<2x32xf32>
    %327 = vector.extract_strided_slice %301 {offsets = [0, 96], sizes = [2, 32], strides = [1, 1]} : vector<2x128xf32> to vector<2x32xf32>
    %328 = math.tanh %327 : vector<2x32xf32>
    %329 = arith.mulf %325, %291 : vector<2x32xf32>
    %330 = arith.mulf %324, %328 : vector<2x32xf32>
    %331 = arith.addf %329, %330 : vector<2x32xf32>
    %332 = math.tanh %331 : vector<2x32xf32>
    %333 = arith.mulf %326, %332 : vector<2x32xf32>
    %c14_64 = arith.constant 14 : index
    %c0_65 = arith.constant 0 : index
    %334 = vector.load %arg16[%c14_64, %c0_65] : memref<16x64xf32, #tpu.memory_space<vmem>>, vector<2x32xf32>
    tpu.vector_store %arg16[%c14_64, %c0_65], %317 {strides = array<i32>} : memref<16x64xf32, #tpu.memory_space<vmem>>, vector<2x32xf32>,
    %c0_66 = arith.constant 0 : index
    %c32_67 = arith.constant 32 : index
    %335 = vector.load %arg16[%c0_66, %c32_67] : memref<16x64xf32, #tpu.memory_space<vmem>>, vector<2x32xf32>
    tpu.vector_store %arg16[%c0_66, %c32_67], %333 {strides = array<i32>} : memref<16x64xf32, #tpu.memory_space<vmem>>, vector<2x32xf32>,
    %c0_68 = arith.constant 0 : index
    %c0_69 = arith.constant 0 : index
    %336 = vector.load %arg5[%c0_68, %c0_69] : memref<64x256xf32, #tpu.memory_space<vmem>>, vector<64x256xf32>
    %c0_70 = arith.constant 0 : index
    %c0_71 = arith.constant 0 : index
    %337 = vector.load %arg8[%c0_70, %c0_71] : memref<1x256xf32, #tpu.memory_space<vmem>>, vector<1x256xf32>
    %c0_72 = arith.constant 0 : index
    %c0_73 = arith.constant 0 : index
    %338 = vector.load %arg16[%c0_72, %c0_73] : memref<16x64xf32, #tpu.memory_space<vmem>>, vector<16x64xf32>
    %cst_74 = arith.constant dense<0.000000e+00> : vector<16x256xf32>
    %339 = tpu.matmul %338, %336, %cst_74 {dimension_numbers = #tpu.dot_dimension_numbers<[1], [0], [0], [1], [0, 0, 1, 1], [], []>} : vector<16x64xf32>, vector<64x256xf32>, vector<16x256xf32> -> vector<16x256xf32>
    %340 = vector.broadcast %337 : vector<1x256xf32> to vector<16x256xf32>
    %341 = arith.addf %339, %340 : vector<16x256xf32>
    %342 = vector.extract_strided_slice %341 {offsets = [0, 0], sizes = [16, 128], strides = [1, 1]} : vector<16x256xf32> to vector<16x128xf32>
    %343 = vector.extract_strided_slice %341 {offsets = [0, 128], sizes = [16, 128], strides = [1, 1]} : vector<16x256xf32> to vector<16x128xf32>
    %c0_75 = arith.constant 0 : index
    %c0_76 = arith.constant 0 : index
    %344 = vector.load %arg6[%c0_75, %c0_76] : memref<32x128xf32, #tpu.memory_space<vmem>>, vector<32x128xf32>
    %c0_77 = arith.constant 0 : index
    %c0_78 = arith.constant 0 : index
    %345 = vector.load %arg7[%c0_77, %c0_78] : memref<32x128xf32, #tpu.memory_space<vmem>>, vector<32x128xf32>
    %cst_79 = arith.constant 0.000000e+00 : f32
    %346 = vector.broadcast %cst_79 : f32 to vector<2x32xf32>
    %cst_80 = arith.constant 0.000000e+00 : f32
    %347 = vector.broadcast %cst_80 : f32 to vector<2x32xf32>
    %cst_81 = arith.constant 0.000000e+00 : f32
    %348 = vector.broadcast %cst_81 : f32 to vector<2x32xf32>
    %cst_82 = arith.constant 0.000000e+00 : f32
    %349 = vector.broadcast %cst_82 : f32 to vector<2x32xf32>
    %350 = vector.extract_strided_slice %342 {offsets = [0, 0], sizes = [2, 128], strides = [1, 1]} : vector<16x128xf32> to vector<2x128xf32>
    %cst_83 = arith.constant dense<0.000000e+00> : vector<2x128xf32>
    %351 = tpu.matmul %346, %344, %cst_83 {dimension_numbers = #tpu.dot_dimension_numbers<[1], [0], [0], [1], [0, 0, 1, 1], [], []>} : vector<2x32xf32>, vector<32x128xf32>, vector<2x128xf32> -> vector<2x128xf32>
    %352 = arith.addf %350, %351 : vector<2x128xf32>
    %353 = vector.extract_strided_slice %343 {offsets = [14, 0], sizes = [2, 128], strides = [1, 1]} : vector<16x128xf32> to vector<2x128xf32>
    %cst_84 = arith.constant dense<0.000000e+00> : vector<2x128xf32>
    %354 = tpu.matmul %348, %345, %cst_84 {dimension_numbers = #tpu.dot_dimension_numbers<[1], [0], [0], [1], [0, 0, 1, 1], [], []>} : vector<2x32xf32>, vector<32x128xf32>, vector<2x128xf32> -> vector<2x128xf32>
    %355 = arith.addf %353, %354 : vector<2x128xf32>
    %356 = vector.extract_strided_slice %352 {offsets = [0, 0], sizes = [2, 96], strides = [1, 1]} : vector<2x128xf32> to vector<2x96xf32>
    %357 = arith.negf %356 : vector<2x96xf32>
    %358 = math.exp %357 : vector<2x96xf32>
    %cst_85 = arith.constant 1.000000e+00 : f32
    %359 = vector.broadcast %cst_85 : f32 to vector<2x96xf32>
    %360 = arith.addf %359, %358 : vector<2x96xf32>
    %361 = arith.divf %359, %360 : vector<2x96xf32>
    %362 = vector.extract_strided_slice %361 {offsets = [0, 0], sizes = [2, 32], strides = [1, 1]} : vector<2x96xf32> to vector<2x32xf32>
    %363 = vector.extract_strided_slice %361 {offsets = [0, 32], sizes = [2, 32], strides = [1, 1]} : vector<2x96xf32> to vector<2x32xf32>
    %364 = vector.extract_strided_slice %361 {offsets = [0, 64], sizes = [2, 32], strides = [1, 1]} : vector<2x96xf32> to vector<2x32xf32>
    %365 = vector.extract_strided_slice %352 {offsets = [0, 96], sizes = [2, 32], strides = [1, 1]} : vector<2x128xf32> to vector<2x32xf32>
    %366 = math.tanh %365 : vector<2x32xf32>
    %367 = arith.mulf %363, %347 : vector<2x32xf32>
    %368 = arith.mulf %362, %366 : vector<2x32xf32>
    %369 = arith.addf %367, %368 : vector<2x32xf32>
    %370 = math.tanh %369 : vector<2x32xf32>
    %371 = arith.mulf %364, %370 : vector<2x32xf32>
    %372 = vector.extract_strided_slice %355 {offsets = [0, 0], sizes = [2, 96], strides = [1, 1]} : vector<2x128xf32> to vector<2x96xf32>
    %373 = arith.negf %372 : vector<2x96xf32>
    %374 = math.exp %373 : vector<2x96xf32>
    %cst_86 = arith.constant 1.000000e+00 : f32
    %375 = vector.broadcast %cst_86 : f32 to vector<2x96xf32>
    %376 = arith.addf %375, %374 : vector<2x96xf32>
    %377 = arith.divf %375, %376 : vector<2x96xf32>
    %378 = vector.extract_strided_slice %377 {offsets = [0, 0], sizes = [2, 32], strides = [1, 1]} : vector<2x96xf32> to vector<2x32xf32>
    %379 = vector.extract_strided_slice %377 {offsets = [0, 32], sizes = [2, 32], strides = [1, 1]} : vector<2x96xf32> to vector<2x32xf32>
    %380 = vector.extract_strided_slice %377 {offsets = [0, 64], sizes = [2, 32], strides = [1, 1]} : vector<2x96xf32> to vector<2x32xf32>
    %381 = vector.extract_strided_slice %355 {offsets = [0, 96], sizes = [2, 32], strides = [1, 1]} : vector<2x128xf32> to vector<2x32xf32>
    %382 = math.tanh %381 : vector<2x32xf32>
    %383 = arith.mulf %379, %349 : vector<2x32xf32>
    %384 = arith.mulf %378, %382 : vector<2x32xf32>
    %385 = arith.addf %383, %384 : vector<2x32xf32>
    %386 = math.tanh %385 : vector<2x32xf32>
    %387 = arith.mulf %380, %386 : vector<2x32xf32>
    %c0_87 = arith.constant 0 : index
    %c0_88 = arith.constant 0 : index
    %388 = vector.load %arg16[%c0_87, %c0_88] : memref<16x64xf32, #tpu.memory_space<vmem>>, vector<2x32xf32>
    tpu.vector_store %arg16[%c0_87, %c0_88], %371 {strides = array<i32>} : memref<16x64xf32, #tpu.memory_space<vmem>>, vector<2x32xf32>,
    %c14_89 = arith.constant 14 : index
    %c32_90 = arith.constant 32 : index
    %389 = vector.load %arg16[%c14_89, %c32_90] : memref<16x64xf32, #tpu.memory_space<vmem>>, vector<2x32xf32>
    tpu.vector_store %arg16[%c14_89, %c32_90], %387 {strides = array<i32>} : memref<16x64xf32, #tpu.memory_space<vmem>>, vector<2x32xf32>,
    %390 = vector.extract_strided_slice %342 {offsets = [2, 0], sizes = [2, 128], strides = [1, 1]} : vector<16x128xf32> to vector<2x128xf32>
    %cst_91 = arith.constant dense<0.000000e+00> : vector<2x128xf32>
    %391 = tpu.matmul %371, %344, %cst_91 {dimension_numbers = #tpu.dot_dimension_numbers<[1], [0], [0], [1], [0, 0, 1, 1], [], []>} : vector<2x32xf32>, vector<32x128xf32>, vector<2x128xf32> -> vector<2x128xf32>
    %392 = arith.addf %390, %391 : vector<2x128xf32>
    %393 = vector.extract_strided_slice %343 {offsets = [12, 0], sizes = [2, 128], strides = [1, 1]} : vector<16x128xf32> to vector<2x128xf32>
    %cst_92 = arith.constant dense<0.000000e+00> : vector<2x128xf32>
    %394 = tpu.matmul %387, %345, %cst_92 {dimension_numbers = #tpu.dot_dimension_numbers<[1], [0], [0], [1], [0, 0, 1, 1], [], []>} : vector<2x32xf32>, vector<32x128xf32>, vector<2x128xf32> -> vector<2x128xf32>
    %395 = arith.addf %393, %394 : vector<2x128xf32>
    %396 = vector.extract_strided_slice %392 {offsets = [0, 0], sizes = [2, 96], strides = [1, 1]} : vector<2x128xf32> to vector<2x96xf32>
    %397 = arith.negf %396 : vector<2x96xf32>
    %398 = math.exp %397 : vector<2x96xf32>
    %cst_93 = arith.constant 1.000000e+00 : f32
    %399 = vector.broadcast %cst_93 : f32 to vector<2x96xf32>
    %400 = arith.addf %399, %398 : vector<2x96xf32>
    %401 = arith.divf %399, %400 : vector<2x96xf32>
    %402 = vector.extract_strided_slice %401 {offsets = [0, 0], sizes = [2, 32], strides = [1, 1]} : vector<2x96xf32> to vector<2x32xf32>
    %403 = vector.extract_strided_slice %401 {offsets = [0, 32], sizes = [2, 32], strides = [1, 1]} : vector<2x96xf32> to vector<2x32xf32>
    %404 = vector.extract_strided_slice %401 {offsets = [0, 64], sizes = [2, 32], strides = [1, 1]} : vector<2x96xf32> to vector<2x32xf32>
    %405 = vector.extract_strided_slice %392 {offsets = [0, 96], sizes = [2, 32], strides = [1, 1]} : vector<2x128xf32> to vector<2x32xf32>
    %406 = math.tanh %405 : vector<2x32xf32>
    %407 = arith.mulf %403, %369 : vector<2x32xf32>
    %408 = arith.mulf %402, %406 : vector<2x32xf32>
    %409 = arith.addf %407, %408 : vector<2x32xf32>
    %410 = math.tanh %409 : vector<2x32xf32>
    %411 = arith.mulf %404, %410 : vector<2x32xf32>
    %412 = vector.extract_strided_slice %395 {offsets = [0, 0], sizes = [2, 96], strides = [1, 1]} : vector<2x128xf32> to vector<2x96xf32>
    %413 = arith.negf %412 : vector<2x96xf32>
    %414 = math.exp %413 : vector<2x96xf32>
    %cst_94 = arith.constant 1.000000e+00 : f32
    %415 = vector.broadcast %cst_94 : f32 to vector<2x96xf32>
    %416 = arith.addf %415, %414 : vector<2x96xf32>
    %417 = arith.divf %415, %416 : vector<2x96xf32>
    %418 = vector.extract_strided_slice %417 {offsets = [0, 0], sizes = [2, 32], strides = [1, 1]} : vector<2x96xf32> to vector<2x32xf32>
    %419 = vector.extract_strided_slice %417 {offsets = [0, 32], sizes = [2, 32], strides = [1, 1]} : vector<2x96xf32> to vector<2x32xf32>
    %420 = vector.extract_strided_slice %417 {offsets = [0, 64], sizes = [2, 32], strides = [1, 1]} : vector<2x96xf32> to vector<2x32xf32>
    %421 = vector.extract_strided_slice %395 {offsets = [0, 96], sizes = [2, 32], strides = [1, 1]} : vector<2x128xf32> to vector<2x32xf32>
    %422 = math.tanh %421 : vector<2x32xf32>
    %423 = arith.mulf %419, %385 : vector<2x32xf32>
    %424 = arith.mulf %418, %422 : vector<2x32xf32>
    %425 = arith.addf %423, %424 : vector<2x32xf32>
    %426 = math.tanh %425 : vector<2x32xf32>
    %427 = arith.mulf %420, %426 : vector<2x32xf32>
    %c2_95 = arith.constant 2 : index
    %c0_96 = arith.constant 0 : index
    %428 = vector.load %arg16[%c2_95, %c0_96] : memref<16x64xf32, #tpu.memory_space<vmem>>, vector<2x32xf32>
    tpu.vector_store %arg16[%c2_95, %c0_96], %411 {strides = array<i32>} : memref<16x64xf32, #tpu.memory_space<vmem>>, vector<2x32xf32>,
    %c12_97 = arith.constant 12 : index
    %c32_98 = arith.constant 32 : index
    %429 = vector.load %arg16[%c12_97, %c32_98] : memref<16x64xf32, #tpu.memory_space<vmem>>, vector<2x32xf32>
    tpu.vector_store %arg16[%c12_97, %c32_98], %427 {strides = array<i32>} : memref<16x64xf32, #tpu.memory_space<vmem>>, vector<2x32xf32>,
    %430 = vector.extract_strided_slice %342 {offsets = [4, 0], sizes = [2, 128], strides = [1, 1]} : vector<16x128xf32> to vector<2x128xf32>
    %cst_99 = arith.constant dense<0.000000e+00> : vector<2x128xf32>
    %431 = tpu.matmul %411, %344, %cst_99 {dimension_numbers = #tpu.dot_dimension_numbers<[1], [0], [0], [1], [0, 0, 1, 1], [], []>} : vector<2x32xf32>, vector<32x128xf32>, vector<2x128xf32> -> vector<2x128xf32>
    %432 = arith.addf %430, %431 : vector<2x128xf32>
    %433 = vector.extract_strided_slice %343 {offsets = [10, 0], sizes = [2, 128], strides = [1, 1]} : vector<16x128xf32> to vector<2x128xf32>
    %cst_100 = arith.constant dense<0.000000e+00> : vector<2x128xf32>
    %434 = tpu.matmul %427, %345, %cst_100 {dimension_numbers = #tpu.dot_dimension_numbers<[1], [0], [0], [1], [0, 0, 1, 1], [], []>} : vector<2x32xf32>, vector<32x128xf32>, vector<2x128xf32> -> vector<2x128xf32>
    %435 = arith.addf %433, %434 : vector<2x128xf32>
    %436 = vector.extract_strided_slice %432 {offsets = [0, 0], sizes = [2, 96], strides = [1, 1]} : vector<2x128xf32> to vector<2x96xf32>
    %437 = arith.negf %436 : vector<2x96xf32>
    %438 = math.exp %437 : vector<2x96xf32>
    %cst_101 = arith.constant 1.000000e+00 : f32
    %439 = vector.broadcast %cst_101 : f32 to vector<2x96xf32>
    %440 = arith.addf %439, %438 : vector<2x96xf32>
    %441 = arith.divf %439, %440 : vector<2x96xf32>
    %442 = vector.extract_strided_slice %441 {offsets = [0, 0], sizes = [2, 32], strides = [1, 1]} : vector<2x96xf32> to vector<2x32xf32>
    %443 = vector.extract_strided_slice %441 {offsets = [0, 32], sizes = [2, 32], strides = [1, 1]} : vector<2x96xf32> to vector<2x32xf32>
    %444 = vector.extract_strided_slice %441 {offsets = [0, 64], sizes = [2, 32], strides = [1, 1]} : vector<2x96xf32> to vector<2x32xf32>
    %445 = vector.extract_strided_slice %432 {offsets = [0, 96], sizes = [2, 32], strides = [1, 1]} : vector<2x128xf32> to vector<2x32xf32>
    %446 = math.tanh %445 : vector<2x32xf32>
    %447 = arith.mulf %443, %409 : vector<2x32xf32>
    %448 = arith.mulf %442, %446 : vector<2x32xf32>
    %449 = arith.addf %447, %448 : vector<2x32xf32>
    %450 = math.tanh %449 : vector<2x32xf32>
    %451 = arith.mulf %444, %450 : vector<2x32xf32>
    %452 = vector.extract_strided_slice %435 {offsets = [0, 0], sizes = [2, 96], strides = [1, 1]} : vector<2x128xf32> to vector<2x96xf32>
    %453 = arith.negf %452 : vector<2x96xf32>
    %454 = math.exp %453 : vector<2x96xf32>
    %cst_102 = arith.constant 1.000000e+00 : f32
    %455 = vector.broadcast %cst_102 : f32 to vector<2x96xf32>
    %456 = arith.addf %455, %454 : vector<2x96xf32>
    %457 = arith.divf %455, %456 : vector<2x96xf32>
    %458 = vector.extract_strided_slice %457 {offsets = [0, 0], sizes = [2, 32], strides = [1, 1]} : vector<2x96xf32> to vector<2x32xf32>
    %459 = vector.extract_strided_slice %457 {offsets = [0, 32], sizes = [2, 32], strides = [1, 1]} : vector<2x96xf32> to vector<2x32xf32>
    %460 = vector.extract_strided_slice %457 {offsets = [0, 64], sizes = [2, 32], strides = [1, 1]} : vector<2x96xf32> to vector<2x32xf32>
    %461 = vector.extract_strided_slice %435 {offsets = [0, 96], sizes = [2, 32], strides = [1, 1]} : vector<2x128xf32> to vector<2x32xf32>
    %462 = math.tanh %461 : vector<2x32xf32>
    %463 = arith.mulf %459, %425 : vector<2x32xf32>
    %464 = arith.mulf %458, %462 : vector<2x32xf32>
    %465 = arith.addf %463, %464 : vector<2x32xf32>
    %466 = math.tanh %465 : vector<2x32xf32>
    %467 = arith.mulf %460, %466 : vector<2x32xf32>
    %c4_103 = arith.constant 4 : index
    %c0_104 = arith.constant 0 : index
    %468 = vector.load %arg16[%c4_103, %c0_104] : memref<16x64xf32, #tpu.memory_space<vmem>>, vector<2x32xf32>
    tpu.vector_store %arg16[%c4_103, %c0_104], %451 {strides = array<i32>} : memref<16x64xf32, #tpu.memory_space<vmem>>, vector<2x32xf32>,
    %c10_105 = arith.constant 10 : index
    %c32_106 = arith.constant 32 : index
    %469 = vector.load %arg16[%c10_105, %c32_106] : memref<16x64xf32, #tpu.memory_space<vmem>>, vector<2x32xf32>
    tpu.vector_store %arg16[%c10_105, %c32_106], %467 {strides = array<i32>} : memref<16x64xf32, #tpu.memory_space<vmem>>, vector<2x32xf32>,
    %470 = vector.extract_strided_slice %342 {offsets = [6, 0], sizes = [2, 128], strides = [1, 1]} : vector<16x128xf32> to vector<2x128xf32>
    %cst_107 = arith.constant dense<0.000000e+00> : vector<2x128xf32>
    %471 = tpu.matmul %451, %344, %cst_107 {dimension_numbers = #tpu.dot_dimension_numbers<[1], [0], [0], [1], [0, 0, 1, 1], [], []>} : vector<2x32xf32>, vector<32x128xf32>, vector<2x128xf32> -> vector<2x128xf32>
    %472 = arith.addf %470, %471 : vector<2x128xf32>
    %473 = vector.extract_strided_slice %343 {offsets = [8, 0], sizes = [2, 128], strides = [1, 1]} : vector<16x128xf32> to vector<2x128xf32>
    %cst_108 = arith.constant dense<0.000000e+00> : vector<2x128xf32>
    %474 = tpu.matmul %467, %345, %cst_108 {dimension_numbers = #tpu.dot_dimension_numbers<[1], [0], [0], [1], [0, 0, 1, 1], [], []>} : vector<2x32xf32>, vector<32x128xf32>, vector<2x128xf32> -> vector<2x128xf32>
    %475 = arith.addf %473, %474 : vector<2x128xf32>
    %476 = vector.extract_strided_slice %472 {offsets = [0, 0], sizes = [2, 96], strides = [1, 1]} : vector<2x128xf32> to vector<2x96xf32>
    %477 = arith.negf %476 : vector<2x96xf32>
    %478 = math.exp %477 : vector<2x96xf32>
    %cst_109 = arith.constant 1.000000e+00 : f32
    %479 = vector.broadcast %cst_109 : f32 to vector<2x96xf32>
    %480 = arith.addf %479, %478 : vector<2x96xf32>
    %481 = arith.divf %479, %480 : vector<2x96xf32>
    %482 = vector.extract_strided_slice %481 {offsets = [0, 0], sizes = [2, 32], strides = [1, 1]} : vector<2x96xf32> to vector<2x32xf32>
    %483 = vector.extract_strided_slice %481 {offsets = [0, 32], sizes = [2, 32], strides = [1, 1]} : vector<2x96xf32> to vector<2x32xf32>
    %484 = vector.extract_strided_slice %481 {offsets = [0, 64], sizes = [2, 32], strides = [1, 1]} : vector<2x96xf32> to vector<2x32xf32>
    %485 = vector.extract_strided_slice %472 {offsets = [0, 96], sizes = [2, 32], strides = [1, 1]} : vector<2x128xf32> to vector<2x32xf32>
    %486 = math.tanh %485 : vector<2x32xf32>
    %487 = arith.mulf %483, %449 : vector<2x32xf32>
    %488 = arith.mulf %482, %486 : vector<2x32xf32>
    %489 = arith.addf %487, %488 : vector<2x32xf32>
    %490 = math.tanh %489 : vector<2x32xf32>
    %491 = arith.mulf %484, %490 : vector<2x32xf32>
    %492 = vector.extract_strided_slice %475 {offsets = [0, 0], sizes = [2, 96], strides = [1, 1]} : vector<2x128xf32> to vector<2x96xf32>
    %493 = arith.negf %492 : vector<2x96xf32>
    %494 = math.exp %493 : vector<2x96xf32>
    %cst_110 = arith.constant 1.000000e+00 : f32
    %495 = vector.broadcast %cst_110 : f32 to vector<2x96xf32>
    %496 = arith.addf %495, %494 : vector<2x96xf32>
    %497 = arith.divf %495, %496 : vector<2x96xf32>
    %498 = vector.extract_strided_slice %497 {offsets = [0, 0], sizes = [2, 32], strides = [1, 1]} : vector<2x96xf32> to vector<2x32xf32>
    %499 = vector.extract_strided_slice %497 {offsets = [0, 32], sizes = [2, 32], strides = [1, 1]} : vector<2x96xf32> to vector<2x32xf32>
    %500 = vector.extract_strided_slice %497 {offsets = [0, 64], sizes = [2, 32], strides = [1, 1]} : vector<2x96xf32> to vector<2x32xf32>
    %501 = vector.extract_strided_slice %475 {offsets = [0, 96], sizes = [2, 32], strides = [1, 1]} : vector<2x128xf32> to vector<2x32xf32>
    %502 = math.tanh %501 : vector<2x32xf32>
    %503 = arith.mulf %499, %465 : vector<2x32xf32>
    %504 = arith.mulf %498, %502 : vector<2x32xf32>
    %505 = arith.addf %503, %504 : vector<2x32xf32>
    %506 = math.tanh %505 : vector<2x32xf32>
    %507 = arith.mulf %500, %506 : vector<2x32xf32>
    %c6_111 = arith.constant 6 : index
    %c0_112 = arith.constant 0 : index
    %508 = vector.load %arg16[%c6_111, %c0_112] : memref<16x64xf32, #tpu.memory_space<vmem>>, vector<2x32xf32>
    tpu.vector_store %arg16[%c6_111, %c0_112], %491 {strides = array<i32>} : memref<16x64xf32, #tpu.memory_space<vmem>>, vector<2x32xf32>,
    %c8_113 = arith.constant 8 : index
    %c32_114 = arith.constant 32 : index
    %509 = vector.load %arg16[%c8_113, %c32_114] : memref<16x64xf32, #tpu.memory_space<vmem>>, vector<2x32xf32>
    tpu.vector_store %arg16[%c8_113, %c32_114], %507 {strides = array<i32>} : memref<16x64xf32, #tpu.memory_space<vmem>>, vector<2x32xf32>,
    %510 = vector.extract_strided_slice %342 {offsets = [8, 0], sizes = [2, 128], strides = [1, 1]} : vector<16x128xf32> to vector<2x128xf32>
    %cst_115 = arith.constant dense<0.000000e+00> : vector<2x128xf32>
    %511 = tpu.matmul %491, %344, %cst_115 {dimension_numbers = #tpu.dot_dimension_numbers<[1], [0], [0], [1], [0, 0, 1, 1], [], []>} : vector<2x32xf32>, vector<32x128xf32>, vector<2x128xf32> -> vector<2x128xf32>
    %512 = arith.addf %510, %511 : vector<2x128xf32>
    %513 = vector.extract_strided_slice %343 {offsets = [6, 0], sizes = [2, 128], strides = [1, 1]} : vector<16x128xf32> to vector<2x128xf32>
    %cst_116 = arith.constant dense<0.000000e+00> : vector<2x128xf32>
    %514 = tpu.matmul %507, %345, %cst_116 {dimension_numbers = #tpu.dot_dimension_numbers<[1], [0], [0], [1], [0, 0, 1, 1], [], []>} : vector<2x32xf32>, vector<32x128xf32>, vector<2x128xf32> -> vector<2x128xf32>
    %515 = arith.addf %513, %514 : vector<2x128xf32>
    %516 = vector.extract_strided_slice %512 {offsets = [0, 0], sizes = [2, 96], strides = [1, 1]} : vector<2x128xf32> to vector<2x96xf32>
    %517 = arith.negf %516 : vector<2x96xf32>
    %518 = math.exp %517 : vector<2x96xf32>
    %cst_117 = arith.constant 1.000000e+00 : f32
    %519 = vector.broadcast %cst_117 : f32 to vector<2x96xf32>
    %520 = arith.addf %519, %518 : vector<2x96xf32>
    %521 = arith.divf %519, %520 : vector<2x96xf32>
    %522 = vector.extract_strided_slice %521 {offsets = [0, 0], sizes = [2, 32], strides = [1, 1]} : vector<2x96xf32> to vector<2x32xf32>
    %523 = vector.extract_strided_slice %521 {offsets = [0, 32], sizes = [2, 32], strides = [1, 1]} : vector<2x96xf32> to vector<2x32xf32>
    %524 = vector.extract_strided_slice %521 {offsets = [0, 64], sizes = [2, 32], strides = [1, 1]} : vector<2x96xf32> to vector<2x32xf32>
    %525 = vector.extract_strided_slice %512 {offsets = [0, 96], sizes = [2, 32], strides = [1, 1]} : vector<2x128xf32> to vector<2x32xf32>
    %526 = math.tanh %525 : vector<2x32xf32>
    %527 = arith.mulf %523, %489 : vector<2x32xf32>
    %528 = arith.mulf %522, %526 : vector<2x32xf32>
    %529 = arith.addf %527, %528 : vector<2x32xf32>
    %530 = math.tanh %529 : vector<2x32xf32>
    %531 = arith.mulf %524, %530 : vector<2x32xf32>
    %532 = vector.extract_strided_slice %515 {offsets = [0, 0], sizes = [2, 96], strides = [1, 1]} : vector<2x128xf32> to vector<2x96xf32>
    %533 = arith.negf %532 : vector<2x96xf32>
    %534 = math.exp %533 : vector<2x96xf32>
    %cst_118 = arith.constant 1.000000e+00 : f32
    %535 = vector.broadcast %cst_118 : f32 to vector<2x96xf32>
    %536 = arith.addf %535, %534 : vector<2x96xf32>
    %537 = arith.divf %535, %536 : vector<2x96xf32>
    %538 = vector.extract_strided_slice %537 {offsets = [0, 0], sizes = [2, 32], strides = [1, 1]} : vector<2x96xf32> to vector<2x32xf32>
    %539 = vector.extract_strided_slice %537 {offsets = [0, 32], sizes = [2, 32], strides = [1, 1]} : vector<2x96xf32> to vector<2x32xf32>
    %540 = vector.extract_strided_slice %537 {offsets = [0, 64], sizes = [2, 32], strides = [1, 1]} : vector<2x96xf32> to vector<2x32xf32>
    %541 = vector.extract_strided_slice %515 {offsets = [0, 96], sizes = [2, 32], strides = [1, 1]} : vector<2x128xf32> to vector<2x32xf32>
    %542 = math.tanh %541 : vector<2x32xf32>
    %543 = arith.mulf %539, %505 : vector<2x32xf32>
    %544 = arith.mulf %538, %542 : vector<2x32xf32>
    %545 = arith.addf %543, %544 : vector<2x32xf32>
    %546 = math.tanh %545 : vector<2x32xf32>
    %547 = arith.mulf %540, %546 : vector<2x32xf32>
    %c8_119 = arith.constant 8 : index
    %c0_120 = arith.constant 0 : index
    %548 = vector.load %arg16[%c8_119, %c0_120] : memref<16x64xf32, #tpu.memory_space<vmem>>, vector<2x32xf32>
    tpu.vector_store %arg16[%c8_119, %c0_120], %531 {strides = array<i32>} : memref<16x64xf32, #tpu.memory_space<vmem>>, vector<2x32xf32>,
    %c6_121 = arith.constant 6 : index
    %c32_122 = arith.constant 32 : index
    %549 = vector.load %arg16[%c6_121, %c32_122] : memref<16x64xf32, #tpu.memory_space<vmem>>, vector<2x32xf32>
    tpu.vector_store %arg16[%c6_121, %c32_122], %547 {strides = array<i32>} : memref<16x64xf32, #tpu.memory_space<vmem>>, vector<2x32xf32>,
    %550 = vector.extract_strided_slice %342 {offsets = [10, 0], sizes = [2, 128], strides = [1, 1]} : vector<16x128xf32> to vector<2x128xf32>
    %cst_123 = arith.constant dense<0.000000e+00> : vector<2x128xf32>
    %551 = tpu.matmul %531, %344, %cst_123 {dimension_numbers = #tpu.dot_dimension_numbers<[1], [0], [0], [1], [0, 0, 1, 1], [], []>} : vector<2x32xf32>, vector<32x128xf32>, vector<2x128xf32> -> vector<2x128xf32>
    %552 = arith.addf %550, %551 : vector<2x128xf32>
    %553 = vector.extract_strided_slice %343 {offsets = [4, 0], sizes = [2, 128], strides = [1, 1]} : vector<16x128xf32> to vector<2x128xf32>
    %cst_124 = arith.constant dense<0.000000e+00> : vector<2x128xf32>
    %554 = tpu.matmul %547, %345, %cst_124 {dimension_numbers = #tpu.dot_dimension_numbers<[1], [0], [0], [1], [0, 0, 1, 1], [], []>} : vector<2x32xf32>, vector<32x128xf32>, vector<2x128xf32> -> vector<2x128xf32>
    %555 = arith.addf %553, %554 : vector<2x128xf32>
    %556 = vector.extract_strided_slice %552 {offsets = [0, 0], sizes = [2, 96], strides = [1, 1]} : vector<2x128xf32> to vector<2x96xf32>
    %557 = arith.negf %556 : vector<2x96xf32>
    %558 = math.exp %557 : vector<2x96xf32>
    %cst_125 = arith.constant 1.000000e+00 : f32
    %559 = vector.broadcast %cst_125 : f32 to vector<2x96xf32>
    %560 = arith.addf %559, %558 : vector<2x96xf32>
    %561 = arith.divf %559, %560 : vector<2x96xf32>
    %562 = vector.extract_strided_slice %561 {offsets = [0, 0], sizes = [2, 32], strides = [1, 1]} : vector<2x96xf32> to vector<2x32xf32>
    %563 = vector.extract_strided_slice %561 {offsets = [0, 32], sizes = [2, 32], strides = [1, 1]} : vector<2x96xf32> to vector<2x32xf32>
    %564 = vector.extract_strided_slice %561 {offsets = [0, 64], sizes = [2, 32], strides = [1, 1]} : vector<2x96xf32> to vector<2x32xf32>
    %565 = vector.extract_strided_slice %552 {offsets = [0, 96], sizes = [2, 32], strides = [1, 1]} : vector<2x128xf32> to vector<2x32xf32>
    %566 = math.tanh %565 : vector<2x32xf32>
    %567 = arith.mulf %563, %529 : vector<2x32xf32>
    %568 = arith.mulf %562, %566 : vector<2x32xf32>
    %569 = arith.addf %567, %568 : vector<2x32xf32>
    %570 = math.tanh %569 : vector<2x32xf32>
    %571 = arith.mulf %564, %570 : vector<2x32xf32>
    %572 = vector.extract_strided_slice %555 {offsets = [0, 0], sizes = [2, 96], strides = [1, 1]} : vector<2x128xf32> to vector<2x96xf32>
    %573 = arith.negf %572 : vector<2x96xf32>
    %574 = math.exp %573 : vector<2x96xf32>
    %cst_126 = arith.constant 1.000000e+00 : f32
    %575 = vector.broadcast %cst_126 : f32 to vector<2x96xf32>
    %576 = arith.addf %575, %574 : vector<2x96xf32>
    %577 = arith.divf %575, %576 : vector<2x96xf32>
    %578 = vector.extract_strided_slice %577 {offsets = [0, 0], sizes = [2, 32], strides = [1, 1]} : vector<2x96xf32> to vector<2x32xf32>
    %579 = vector.extract_strided_slice %577 {offsets = [0, 32], sizes = [2, 32], strides = [1, 1]} : vector<2x96xf32> to vector<2x32xf32>
    %580 = vector.extract_strided_slice %577 {offsets = [0, 64], sizes = [2, 32], strides = [1, 1]} : vector<2x96xf32> to vector<2x32xf32>
    %581 = vector.extract_strided_slice %555 {offsets = [0, 96], sizes = [2, 32], strides = [1, 1]} : vector<2x128xf32> to vector<2x32xf32>
    %582 = math.tanh %581 : vector<2x32xf32>
    %583 = arith.mulf %579, %545 : vector<2x32xf32>
    %584 = arith.mulf %578, %582 : vector<2x32xf32>
    %585 = arith.addf %583, %584 : vector<2x32xf32>
    %586 = math.tanh %585 : vector<2x32xf32>
    %587 = arith.mulf %580, %586 : vector<2x32xf32>
    %c10_127 = arith.constant 10 : index
    %c0_128 = arith.constant 0 : index
    %588 = vector.load %arg16[%c10_127, %c0_128] : memref<16x64xf32, #tpu.memory_space<vmem>>, vector<2x32xf32>
    tpu.vector_store %arg16[%c10_127, %c0_128], %571 {strides = array<i32>} : memref<16x64xf32, #tpu.memory_space<vmem>>, vector<2x32xf32>,
    %c4_129 = arith.constant 4 : index
    %c32_130 = arith.constant 32 : index
    %589 = vector.load %arg16[%c4_129, %c32_130] : memref<16x64xf32, #tpu.memory_space<vmem>>, vector<2x32xf32>
    tpu.vector_store %arg16[%c4_129, %c32_130], %587 {strides = array<i32>} : memref<16x64xf32, #tpu.memory_space<vmem>>, vector<2x32xf32>,
    %590 = vector.extract_strided_slice %342 {offsets = [12, 0], sizes = [2, 128], strides = [1, 1]} : vector<16x128xf32> to vector<2x128xf32>
    %cst_131 = arith.constant dense<0.000000e+00> : vector<2x128xf32>
    %591 = tpu.matmul %571, %344, %cst_131 {dimension_numbers = #tpu.dot_dimension_numbers<[1], [0], [0], [1], [0, 0, 1, 1], [], []>} : vector<2x32xf32>, vector<32x128xf32>, vector<2x128xf32> -> vector<2x128xf32>
    %592 = arith.addf %590, %591 : vector<2x128xf32>
    %593 = vector.extract_strided_slice %343 {offsets = [2, 0], sizes = [2, 128], strides = [1, 1]} : vector<16x128xf32> to vector<2x128xf32>
    %cst_132 = arith.constant dense<0.000000e+00> : vector<2x128xf32>
    %594 = tpu.matmul %587, %345, %cst_132 {dimension_numbers = #tpu.dot_dimension_numbers<[1], [0], [0], [1], [0, 0, 1, 1], [], []>} : vector<2x32xf32>, vector<32x128xf32>, vector<2x128xf32> -> vector<2x128xf32>
    %595 = arith.addf %593, %594 : vector<2x128xf32>
    %596 = vector.extract_strided_slice %592 {offsets = [0, 0], sizes = [2, 96], strides = [1, 1]} : vector<2x128xf32> to vector<2x96xf32>
    %597 = arith.negf %596 : vector<2x96xf32>
    %598 = math.exp %597 : vector<2x96xf32>
    %cst_133 = arith.constant 1.000000e+00 : f32
    %599 = vector.broadcast %cst_133 : f32 to vector<2x96xf32>
    %600 = arith.addf %599, %598 : vector<2x96xf32>
    %601 = arith.divf %599, %600 : vector<2x96xf32>
    %602 = vector.extract_strided_slice %601 {offsets = [0, 0], sizes = [2, 32], strides = [1, 1]} : vector<2x96xf32> to vector<2x32xf32>
    %603 = vector.extract_strided_slice %601 {offsets = [0, 32], sizes = [2, 32], strides = [1, 1]} : vector<2x96xf32> to vector<2x32xf32>
    %604 = vector.extract_strided_slice %601 {offsets = [0, 64], sizes = [2, 32], strides = [1, 1]} : vector<2x96xf32> to vector<2x32xf32>
    %605 = vector.extract_strided_slice %592 {offsets = [0, 96], sizes = [2, 32], strides = [1, 1]} : vector<2x128xf32> to vector<2x32xf32>
    %606 = math.tanh %605 : vector<2x32xf32>
    %607 = arith.mulf %603, %569 : vector<2x32xf32>
    %608 = arith.mulf %602, %606 : vector<2x32xf32>
    %609 = arith.addf %607, %608 : vector<2x32xf32>
    %610 = math.tanh %609 : vector<2x32xf32>
    %611 = arith.mulf %604, %610 : vector<2x32xf32>
    %612 = vector.extract_strided_slice %595 {offsets = [0, 0], sizes = [2, 96], strides = [1, 1]} : vector<2x128xf32> to vector<2x96xf32>
    %613 = arith.negf %612 : vector<2x96xf32>
    %614 = math.exp %613 : vector<2x96xf32>
    %cst_134 = arith.constant 1.000000e+00 : f32
    %615 = vector.broadcast %cst_134 : f32 to vector<2x96xf32>
    %616 = arith.addf %615, %614 : vector<2x96xf32>
    %617 = arith.divf %615, %616 : vector<2x96xf32>
    %618 = vector.extract_strided_slice %617 {offsets = [0, 0], sizes = [2, 32], strides = [1, 1]} : vector<2x96xf32> to vector<2x32xf32>
    %619 = vector.extract_strided_slice %617 {offsets = [0, 32], sizes = [2, 32], strides = [1, 1]} : vector<2x96xf32> to vector<2x32xf32>
    %620 = vector.extract_strided_slice %617 {offsets = [0, 64], sizes = [2, 32], strides = [1, 1]} : vector<2x96xf32> to vector<2x32xf32>
    %621 = vector.extract_strided_slice %595 {offsets = [0, 96], sizes = [2, 32], strides = [1, 1]} : vector<2x128xf32> to vector<2x32xf32>
    %622 = math.tanh %621 : vector<2x32xf32>
    %623 = arith.mulf %619, %585 : vector<2x32xf32>
    %624 = arith.mulf %618, %622 : vector<2x32xf32>
    %625 = arith.addf %623, %624 : vector<2x32xf32>
    %626 = math.tanh %625 : vector<2x32xf32>
    %627 = arith.mulf %620, %626 : vector<2x32xf32>
    %c12_135 = arith.constant 12 : index
    %c0_136 = arith.constant 0 : index
    %628 = vector.load %arg16[%c12_135, %c0_136] : memref<16x64xf32, #tpu.memory_space<vmem>>, vector<2x32xf32>
    tpu.vector_store %arg16[%c12_135, %c0_136], %611 {strides = array<i32>} : memref<16x64xf32, #tpu.memory_space<vmem>>, vector<2x32xf32>,
    %c2_137 = arith.constant 2 : index
    %c32_138 = arith.constant 32 : index
    %629 = vector.load %arg16[%c2_137, %c32_138] : memref<16x64xf32, #tpu.memory_space<vmem>>, vector<2x32xf32>
    tpu.vector_store %arg16[%c2_137, %c32_138], %627 {strides = array<i32>} : memref<16x64xf32, #tpu.memory_space<vmem>>, vector<2x32xf32>,
    %630 = vector.extract_strided_slice %342 {offsets = [14, 0], sizes = [2, 128], strides = [1, 1]} : vector<16x128xf32> to vector<2x128xf32>
    %cst_139 = arith.constant dense<0.000000e+00> : vector<2x128xf32>
    %631 = tpu.matmul %611, %344, %cst_139 {dimension_numbers = #tpu.dot_dimension_numbers<[1], [0], [0], [1], [0, 0, 1, 1], [], []>} : vector<2x32xf32>, vector<32x128xf32>, vector<2x128xf32> -> vector<2x128xf32>
    %632 = arith.addf %630, %631 : vector<2x128xf32>
    %633 = vector.extract_strided_slice %343 {offsets = [0, 0], sizes = [2, 128], strides = [1, 1]} : vector<16x128xf32> to vector<2x128xf32>
    %cst_140 = arith.constant dense<0.000000e+00> : vector<2x128xf32>
    %634 = tpu.matmul %627, %345, %cst_140 {dimension_numbers = #tpu.dot_dimension_numbers<[1], [0], [0], [1], [0, 0, 1, 1], [], []>} : vector<2x32xf32>, vector<32x128xf32>, vector<2x128xf32> -> vector<2x128xf32>
    %635 = arith.addf %633, %634 : vector<2x128xf32>
    %636 = vector.extract_strided_slice %632 {offsets = [0, 0], sizes = [2, 96], strides = [1, 1]} : vector<2x128xf32> to vector<2x96xf32>
    %637 = arith.negf %636 : vector<2x96xf32>
    %638 = math.exp %637 : vector<2x96xf32>
    %cst_141 = arith.constant 1.000000e+00 : f32
    %639 = vector.broadcast %cst_141 : f32 to vector<2x96xf32>
    %640 = arith.addf %639, %638 : vector<2x96xf32>
    %641 = arith.divf %639, %640 : vector<2x96xf32>
    %642 = vector.extract_strided_slice %641 {offsets = [0, 0], sizes = [2, 32], strides = [1, 1]} : vector<2x96xf32> to vector<2x32xf32>
    %643 = vector.extract_strided_slice %641 {offsets = [0, 32], sizes = [2, 32], strides = [1, 1]} : vector<2x96xf32> to vector<2x32xf32>
    %644 = vector.extract_strided_slice %641 {offsets = [0, 64], sizes = [2, 32], strides = [1, 1]} : vector<2x96xf32> to vector<2x32xf32>
    %645 = vector.extract_strided_slice %632 {offsets = [0, 96], sizes = [2, 32], strides = [1, 1]} : vector<2x128xf32> to vector<2x32xf32>
    %646 = math.tanh %645 : vector<2x32xf32>
    %647 = arith.mulf %643, %609 : vector<2x32xf32>
    %648 = arith.mulf %642, %646 : vector<2x32xf32>
    %649 = arith.addf %647, %648 : vector<2x32xf32>
    %650 = math.tanh %649 : vector<2x32xf32>
    %651 = arith.mulf %644, %650 : vector<2x32xf32>
    %652 = vector.extract_strided_slice %635 {offsets = [0, 0], sizes = [2, 96], strides = [1, 1]} : vector<2x128xf32> to vector<2x96xf32>
    %653 = arith.negf %652 : vector<2x96xf32>
    %654 = math.exp %653 : vector<2x96xf32>
    %cst_142 = arith.constant 1.000000e+00 : f32
    %655 = vector.broadcast %cst_142 : f32 to vector<2x96xf32>
    %656 = arith.addf %655, %654 : vector<2x96xf32>
    %657 = arith.divf %655, %656 : vector<2x96xf32>
    %658 = vector.extract_strided_slice %657 {offsets = [0, 0], sizes = [2, 32], strides = [1, 1]} : vector<2x96xf32> to vector<2x32xf32>
    %659 = vector.extract_strided_slice %657 {offsets = [0, 32], sizes = [2, 32], strides = [1, 1]} : vector<2x96xf32> to vector<2x32xf32>
    %660 = vector.extract_strided_slice %657 {offsets = [0, 64], sizes = [2, 32], strides = [1, 1]} : vector<2x96xf32> to vector<2x32xf32>
    %661 = vector.extract_strided_slice %635 {offsets = [0, 96], sizes = [2, 32], strides = [1, 1]} : vector<2x128xf32> to vector<2x32xf32>
    %662 = math.tanh %661 : vector<2x32xf32>
    %663 = arith.mulf %659, %625 : vector<2x32xf32>
    %664 = arith.mulf %658, %662 : vector<2x32xf32>
    %665 = arith.addf %663, %664 : vector<2x32xf32>
    %666 = math.tanh %665 : vector<2x32xf32>
    %667 = arith.mulf %660, %666 : vector<2x32xf32>
    %c14_143 = arith.constant 14 : index
    %c0_144 = arith.constant 0 : index
    %668 = vector.load %arg16[%c14_143, %c0_144] : memref<16x64xf32, #tpu.memory_space<vmem>>, vector<2x32xf32>
    tpu.vector_store %arg16[%c14_143, %c0_144], %651 {strides = array<i32>} : memref<16x64xf32, #tpu.memory_space<vmem>>, vector<2x32xf32>,
    %c0_145 = arith.constant 0 : index
    %c32_146 = arith.constant 32 : index
    %669 = vector.load %arg16[%c0_145, %c32_146] : memref<16x64xf32, #tpu.memory_space<vmem>>, vector<2x32xf32>
    tpu.vector_store %arg16[%c0_145, %c32_146], %667 {strides = array<i32>} : memref<16x64xf32, #tpu.memory_space<vmem>>, vector<2x32xf32>,
    %c0_147 = arith.constant 0 : index
    %c0_148 = arith.constant 0 : index
    %670 = vector.load %arg9[%c0_147, %c0_148] : memref<64x256xf32, #tpu.memory_space<vmem>>, vector<64x256xf32>
    %c0_149 = arith.constant 0 : index
    %c0_150 = arith.constant 0 : index
    %671 = vector.load %arg12[%c0_149, %c0_150] : memref<1x256xf32, #tpu.memory_space<vmem>>, vector<1x256xf32>
    %c0_151 = arith.constant 0 : index
    %c0_152 = arith.constant 0 : index
    %672 = vector.load %arg16[%c0_151, %c0_152] : memref<16x64xf32, #tpu.memory_space<vmem>>, vector<16x64xf32>
    %cst_153 = arith.constant dense<0.000000e+00> : vector<16x256xf32>
    %673 = tpu.matmul %672, %670, %cst_153 {dimension_numbers = #tpu.dot_dimension_numbers<[1], [0], [0], [1], [0, 0, 1, 1], [], []>} : vector<16x64xf32>, vector<64x256xf32>, vector<16x256xf32> -> vector<16x256xf32>
    %674 = vector.broadcast %671 : vector<1x256xf32> to vector<16x256xf32>
    %675 = arith.addf %673, %674 : vector<16x256xf32>
    %676 = vector.extract_strided_slice %675 {offsets = [0, 0], sizes = [16, 128], strides = [1, 1]} : vector<16x256xf32> to vector<16x128xf32>
    %677 = vector.extract_strided_slice %675 {offsets = [0, 128], sizes = [16, 128], strides = [1, 1]} : vector<16x256xf32> to vector<16x128xf32>
    %c0_154 = arith.constant 0 : index
    %c0_155 = arith.constant 0 : index
    %678 = vector.load %arg10[%c0_154, %c0_155] : memref<32x128xf32, #tpu.memory_space<vmem>>, vector<32x128xf32>
    %c0_156 = arith.constant 0 : index
    %c0_157 = arith.constant 0 : index
    %679 = vector.load %arg11[%c0_156, %c0_157] : memref<32x128xf32, #tpu.memory_space<vmem>>, vector<32x128xf32>
    %cst_158 = arith.constant 0.000000e+00 : f32
    %680 = vector.broadcast %cst_158 : f32 to vector<2x32xf32>
    %cst_159 = arith.constant 0.000000e+00 : f32
    %681 = vector.broadcast %cst_159 : f32 to vector<2x32xf32>
    %cst_160 = arith.constant 0.000000e+00 : f32
    %682 = vector.broadcast %cst_160 : f32 to vector<2x32xf32>
    %cst_161 = arith.constant 0.000000e+00 : f32
    %683 = vector.broadcast %cst_161 : f32 to vector<2x32xf32>
    %684 = vector.extract_strided_slice %676 {offsets = [0, 0], sizes = [2, 128], strides = [1, 1]} : vector<16x128xf32> to vector<2x128xf32>
    %cst_162 = arith.constant dense<0.000000e+00> : vector<2x128xf32>
    %685 = tpu.matmul %680, %678, %cst_162 {dimension_numbers = #tpu.dot_dimension_numbers<[1], [0], [0], [1], [0, 0, 1, 1], [], []>} : vector<2x32xf32>, vector<32x128xf32>, vector<2x128xf32> -> vector<2x128xf32>
    %686 = arith.addf %684, %685 : vector<2x128xf32>
    %687 = vector.extract_strided_slice %677 {offsets = [14, 0], sizes = [2, 128], strides = [1, 1]} : vector<16x128xf32> to vector<2x128xf32>
    %cst_163 = arith.constant dense<0.000000e+00> : vector<2x128xf32>
    %688 = tpu.matmul %682, %679, %cst_163 {dimension_numbers = #tpu.dot_dimension_numbers<[1], [0], [0], [1], [0, 0, 1, 1], [], []>} : vector<2x32xf32>, vector<32x128xf32>, vector<2x128xf32> -> vector<2x128xf32>
    %689 = arith.addf %687, %688 : vector<2x128xf32>
    %690 = vector.extract_strided_slice %686 {offsets = [0, 0], sizes = [2, 96], strides = [1, 1]} : vector<2x128xf32> to vector<2x96xf32>
    %691 = arith.negf %690 : vector<2x96xf32>
    %692 = math.exp %691 : vector<2x96xf32>
    %cst_164 = arith.constant 1.000000e+00 : f32
    %693 = vector.broadcast %cst_164 : f32 to vector<2x96xf32>
    %694 = arith.addf %693, %692 : vector<2x96xf32>
    %695 = arith.divf %693, %694 : vector<2x96xf32>
    %696 = vector.extract_strided_slice %695 {offsets = [0, 0], sizes = [2, 32], strides = [1, 1]} : vector<2x96xf32> to vector<2x32xf32>
    %697 = vector.extract_strided_slice %695 {offsets = [0, 32], sizes = [2, 32], strides = [1, 1]} : vector<2x96xf32> to vector<2x32xf32>
    %698 = vector.extract_strided_slice %695 {offsets = [0, 64], sizes = [2, 32], strides = [1, 1]} : vector<2x96xf32> to vector<2x32xf32>
    %699 = vector.extract_strided_slice %686 {offsets = [0, 96], sizes = [2, 32], strides = [1, 1]} : vector<2x128xf32> to vector<2x32xf32>
    %700 = math.tanh %699 : vector<2x32xf32>
    %701 = arith.mulf %697, %681 : vector<2x32xf32>
    %702 = arith.mulf %696, %700 : vector<2x32xf32>
    %703 = arith.addf %701, %702 : vector<2x32xf32>
    %704 = math.tanh %703 : vector<2x32xf32>
    %705 = arith.mulf %698, %704 : vector<2x32xf32>
    %706 = vector.extract_strided_slice %689 {offsets = [0, 0], sizes = [2, 96], strides = [1, 1]} : vector<2x128xf32> to vector<2x96xf32>
    %707 = arith.negf %706 : vector<2x96xf32>
    %708 = math.exp %707 : vector<2x96xf32>
    %cst_165 = arith.constant 1.000000e+00 : f32
    %709 = vector.broadcast %cst_165 : f32 to vector<2x96xf32>
    %710 = arith.addf %709, %708 : vector<2x96xf32>
    %711 = arith.divf %709, %710 : vector<2x96xf32>
    %712 = vector.extract_strided_slice %711 {offsets = [0, 0], sizes = [2, 32], strides = [1, 1]} : vector<2x96xf32> to vector<2x32xf32>
    %713 = vector.extract_strided_slice %711 {offsets = [0, 32], sizes = [2, 32], strides = [1, 1]} : vector<2x96xf32> to vector<2x32xf32>
    %714 = vector.extract_strided_slice %711 {offsets = [0, 64], sizes = [2, 32], strides = [1, 1]} : vector<2x96xf32> to vector<2x32xf32>
    %715 = vector.extract_strided_slice %689 {offsets = [0, 96], sizes = [2, 32], strides = [1, 1]} : vector<2x128xf32> to vector<2x32xf32>
    %716 = math.tanh %715 : vector<2x32xf32>
    %717 = arith.mulf %713, %683 : vector<2x32xf32>
    %718 = arith.mulf %712, %716 : vector<2x32xf32>
    %719 = arith.addf %717, %718 : vector<2x32xf32>
    %720 = math.tanh %719 : vector<2x32xf32>
    %721 = arith.mulf %714, %720 : vector<2x32xf32>
    %c0_166 = arith.constant 0 : index
    %c0_167 = arith.constant 0 : index
    %722 = vector.load %arg16[%c0_166, %c0_167] : memref<16x64xf32, #tpu.memory_space<vmem>>, vector<2x32xf32>
    tpu.vector_store %arg16[%c0_166, %c0_167], %705 {strides = array<i32>} : memref<16x64xf32, #tpu.memory_space<vmem>>, vector<2x32xf32>,
    %c14_168 = arith.constant 14 : index
    %c32_169 = arith.constant 32 : index
    %723 = vector.load %arg16[%c14_168, %c32_169] : memref<16x64xf32, #tpu.memory_space<vmem>>, vector<2x32xf32>
    tpu.vector_store %arg16[%c14_168, %c32_169], %721 {strides = array<i32>} : memref<16x64xf32, #tpu.memory_space<vmem>>, vector<2x32xf32>,
    %724 = vector.extract_strided_slice %676 {offsets = [2, 0], sizes = [2, 128], strides = [1, 1]} : vector<16x128xf32> to vector<2x128xf32>
    %cst_170 = arith.constant dense<0.000000e+00> : vector<2x128xf32>
    %725 = tpu.matmul %705, %678, %cst_170 {dimension_numbers = #tpu.dot_dimension_numbers<[1], [0], [0], [1], [0, 0, 1, 1], [], []>} : vector<2x32xf32>, vector<32x128xf32>, vector<2x128xf32> -> vector<2x128xf32>
    %726 = arith.addf %724, %725 : vector<2x128xf32>
    %727 = vector.extract_strided_slice %677 {offsets = [12, 0], sizes = [2, 128], strides = [1, 1]} : vector<16x128xf32> to vector<2x128xf32>
    %cst_171 = arith.constant dense<0.000000e+00> : vector<2x128xf32>
    %728 = tpu.matmul %721, %679, %cst_171 {dimension_numbers = #tpu.dot_dimension_numbers<[1], [0], [0], [1], [0, 0, 1, 1], [], []>} : vector<2x32xf32>, vector<32x128xf32>, vector<2x128xf32> -> vector<2x128xf32>
    %729 = arith.addf %727, %728 : vector<2x128xf32>
    %730 = vector.extract_strided_slice %726 {offsets = [0, 0], sizes = [2, 96], strides = [1, 1]} : vector<2x128xf32> to vector<2x96xf32>
    %731 = arith.negf %730 : vector<2x96xf32>
    %732 = math.exp %731 : vector<2x96xf32>
    %cst_172 = arith.constant 1.000000e+00 : f32
    %733 = vector.broadcast %cst_172 : f32 to vector<2x96xf32>
    %734 = arith.addf %733, %732 : vector<2x96xf32>
    %735 = arith.divf %733, %734 : vector<2x96xf32>
    %736 = vector.extract_strided_slice %735 {offsets = [0, 0], sizes = [2, 32], strides = [1, 1]} : vector<2x96xf32> to vector<2x32xf32>
    %737 = vector.extract_strided_slice %735 {offsets = [0, 32], sizes = [2, 32], strides = [1, 1]} : vector<2x96xf32> to vector<2x32xf32>
    %738 = vector.extract_strided_slice %735 {offsets = [0, 64], sizes = [2, 32], strides = [1, 1]} : vector<2x96xf32> to vector<2x32xf32>
    %739 = vector.extract_strided_slice %726 {offsets = [0, 96], sizes = [2, 32], strides = [1, 1]} : vector<2x128xf32> to vector<2x32xf32>
    %740 = math.tanh %739 : vector<2x32xf32>
    %741 = arith.mulf %737, %703 : vector<2x32xf32>
    %742 = arith.mulf %736, %740 : vector<2x32xf32>
    %743 = arith.addf %741, %742 : vector<2x32xf32>
    %744 = math.tanh %743 : vector<2x32xf32>
    %745 = arith.mulf %738, %744 : vector<2x32xf32>
    %746 = vector.extract_strided_slice %729 {offsets = [0, 0], sizes = [2, 96], strides = [1, 1]} : vector<2x128xf32> to vector<2x96xf32>
    %747 = arith.negf %746 : vector<2x96xf32>
    %748 = math.exp %747 : vector<2x96xf32>
    %cst_173 = arith.constant 1.000000e+00 : f32
    %749 = vector.broadcast %cst_173 : f32 to vector<2x96xf32>
    %750 = arith.addf %749, %748 : vector<2x96xf32>
    %751 = arith.divf %749, %750 : vector<2x96xf32>
    %752 = vector.extract_strided_slice %751 {offsets = [0, 0], sizes = [2, 32], strides = [1, 1]} : vector<2x96xf32> to vector<2x32xf32>
    %753 = vector.extract_strided_slice %751 {offsets = [0, 32], sizes = [2, 32], strides = [1, 1]} : vector<2x96xf32> to vector<2x32xf32>
    %754 = vector.extract_strided_slice %751 {offsets = [0, 64], sizes = [2, 32], strides = [1, 1]} : vector<2x96xf32> to vector<2x32xf32>
    %755 = vector.extract_strided_slice %729 {offsets = [0, 96], sizes = [2, 32], strides = [1, 1]} : vector<2x128xf32> to vector<2x32xf32>
    %756 = math.tanh %755 : vector<2x32xf32>
    %757 = arith.mulf %753, %719 : vector<2x32xf32>
    %758 = arith.mulf %752, %756 : vector<2x32xf32>
    %759 = arith.addf %757, %758 : vector<2x32xf32>
    %760 = math.tanh %759 : vector<2x32xf32>
    %761 = arith.mulf %754, %760 : vector<2x32xf32>
    %c2_174 = arith.constant 2 : index
    %c0_175 = arith.constant 0 : index
    %762 = vector.load %arg16[%c2_174, %c0_175] : memref<16x64xf32, #tpu.memory_space<vmem>>, vector<2x32xf32>
    tpu.vector_store %arg16[%c2_174, %c0_175], %745 {strides = array<i32>} : memref<16x64xf32, #tpu.memory_space<vmem>>, vector<2x32xf32>,
    %c12_176 = arith.constant 12 : index
    %c32_177 = arith.constant 32 : index
    %763 = vector.load %arg16[%c12_176, %c32_177] : memref<16x64xf32, #tpu.memory_space<vmem>>, vector<2x32xf32>
    tpu.vector_store %arg16[%c12_176, %c32_177], %761 {strides = array<i32>} : memref<16x64xf32, #tpu.memory_space<vmem>>, vector<2x32xf32>,
    %764 = vector.extract_strided_slice %676 {offsets = [4, 0], sizes = [2, 128], strides = [1, 1]} : vector<16x128xf32> to vector<2x128xf32>
    %cst_178 = arith.constant dense<0.000000e+00> : vector<2x128xf32>
    %765 = tpu.matmul %745, %678, %cst_178 {dimension_numbers = #tpu.dot_dimension_numbers<[1], [0], [0], [1], [0, 0, 1, 1], [], []>} : vector<2x32xf32>, vector<32x128xf32>, vector<2x128xf32> -> vector<2x128xf32>
    %766 = arith.addf %764, %765 : vector<2x128xf32>
    %767 = vector.extract_strided_slice %677 {offsets = [10, 0], sizes = [2, 128], strides = [1, 1]} : vector<16x128xf32> to vector<2x128xf32>
    %cst_179 = arith.constant dense<0.000000e+00> : vector<2x128xf32>
    %768 = tpu.matmul %761, %679, %cst_179 {dimension_numbers = #tpu.dot_dimension_numbers<[1], [0], [0], [1], [0, 0, 1, 1], [], []>} : vector<2x32xf32>, vector<32x128xf32>, vector<2x128xf32> -> vector<2x128xf32>
    %769 = arith.addf %767, %768 : vector<2x128xf32>
    %770 = vector.extract_strided_slice %766 {offsets = [0, 0], sizes = [2, 96], strides = [1, 1]} : vector<2x128xf32> to vector<2x96xf32>
    %771 = arith.negf %770 : vector<2x96xf32>
    %772 = math.exp %771 : vector<2x96xf32>
    %cst_180 = arith.constant 1.000000e+00 : f32
    %773 = vector.broadcast %cst_180 : f32 to vector<2x96xf32>
    %774 = arith.addf %773, %772 : vector<2x96xf32>
    %775 = arith.divf %773, %774 : vector<2x96xf32>
    %776 = vector.extract_strided_slice %775 {offsets = [0, 0], sizes = [2, 32], strides = [1, 1]} : vector<2x96xf32> to vector<2x32xf32>
    %777 = vector.extract_strided_slice %775 {offsets = [0, 32], sizes = [2, 32], strides = [1, 1]} : vector<2x96xf32> to vector<2x32xf32>
    %778 = vector.extract_strided_slice %775 {offsets = [0, 64], sizes = [2, 32], strides = [1, 1]} : vector<2x96xf32> to vector<2x32xf32>
    %779 = vector.extract_strided_slice %766 {offsets = [0, 96], sizes = [2, 32], strides = [1, 1]} : vector<2x128xf32> to vector<2x32xf32>
    %780 = math.tanh %779 : vector<2x32xf32>
    %781 = arith.mulf %777, %743 : vector<2x32xf32>
    %782 = arith.mulf %776, %780 : vector<2x32xf32>
    %783 = arith.addf %781, %782 : vector<2x32xf32>
    %784 = math.tanh %783 : vector<2x32xf32>
    %785 = arith.mulf %778, %784 : vector<2x32xf32>
    %786 = vector.extract_strided_slice %769 {offsets = [0, 0], sizes = [2, 96], strides = [1, 1]} : vector<2x128xf32> to vector<2x96xf32>
    %787 = arith.negf %786 : vector<2x96xf32>
    %788 = math.exp %787 : vector<2x96xf32>
    %cst_181 = arith.constant 1.000000e+00 : f32
    %789 = vector.broadcast %cst_181 : f32 to vector<2x96xf32>
    %790 = arith.addf %789, %788 : vector<2x96xf32>
    %791 = arith.divf %789, %790 : vector<2x96xf32>
    %792 = vector.extract_strided_slice %791 {offsets = [0, 0], sizes = [2, 32], strides = [1, 1]} : vector<2x96xf32> to vector<2x32xf32>
    %793 = vector.extract_strided_slice %791 {offsets = [0, 32], sizes = [2, 32], strides = [1, 1]} : vector<2x96xf32> to vector<2x32xf32>
    %794 = vector.extract_strided_slice %791 {offsets = [0, 64], sizes = [2, 32], strides = [1, 1]} : vector<2x96xf32> to vector<2x32xf32>
    %795 = vector.extract_strided_slice %769 {offsets = [0, 96], sizes = [2, 32], strides = [1, 1]} : vector<2x128xf32> to vector<2x32xf32>
    %796 = math.tanh %795 : vector<2x32xf32>
    %797 = arith.mulf %793, %759 : vector<2x32xf32>
    %798 = arith.mulf %792, %796 : vector<2x32xf32>
    %799 = arith.addf %797, %798 : vector<2x32xf32>
    %800 = math.tanh %799 : vector<2x32xf32>
    %801 = arith.mulf %794, %800 : vector<2x32xf32>
    %c4_182 = arith.constant 4 : index
    %c0_183 = arith.constant 0 : index
    %802 = vector.load %arg16[%c4_182, %c0_183] : memref<16x64xf32, #tpu.memory_space<vmem>>, vector<2x32xf32>
    tpu.vector_store %arg16[%c4_182, %c0_183], %785 {strides = array<i32>} : memref<16x64xf32, #tpu.memory_space<vmem>>, vector<2x32xf32>,
    %c10_184 = arith.constant 10 : index
    %c32_185 = arith.constant 32 : index
    %803 = vector.load %arg16[%c10_184, %c32_185] : memref<16x64xf32, #tpu.memory_space<vmem>>, vector<2x32xf32>
    tpu.vector_store %arg16[%c10_184, %c32_185], %801 {strides = array<i32>} : memref<16x64xf32, #tpu.memory_space<vmem>>, vector<2x32xf32>,
    %804 = vector.extract_strided_slice %676 {offsets = [6, 0], sizes = [2, 128], strides = [1, 1]} : vector<16x128xf32> to vector<2x128xf32>
    %cst_186 = arith.constant dense<0.000000e+00> : vector<2x128xf32>
    %805 = tpu.matmul %785, %678, %cst_186 {dimension_numbers = #tpu.dot_dimension_numbers<[1], [0], [0], [1], [0, 0, 1, 1], [], []>} : vector<2x32xf32>, vector<32x128xf32>, vector<2x128xf32> -> vector<2x128xf32>
    %806 = arith.addf %804, %805 : vector<2x128xf32>
    %807 = vector.extract_strided_slice %677 {offsets = [8, 0], sizes = [2, 128], strides = [1, 1]} : vector<16x128xf32> to vector<2x128xf32>
    %cst_187 = arith.constant dense<0.000000e+00> : vector<2x128xf32>
    %808 = tpu.matmul %801, %679, %cst_187 {dimension_numbers = #tpu.dot_dimension_numbers<[1], [0], [0], [1], [0, 0, 1, 1], [], []>} : vector<2x32xf32>, vector<32x128xf32>, vector<2x128xf32> -> vector<2x128xf32>
    %809 = arith.addf %807, %808 : vector<2x128xf32>
    %810 = vector.extract_strided_slice %806 {offsets = [0, 0], sizes = [2, 96], strides = [1, 1]} : vector<2x128xf32> to vector<2x96xf32>
    %811 = arith.negf %810 : vector<2x96xf32>
    %812 = math.exp %811 : vector<2x96xf32>
    %cst_188 = arith.constant 1.000000e+00 : f32
    %813 = vector.broadcast %cst_188 : f32 to vector<2x96xf32>
    %814 = arith.addf %813, %812 : vector<2x96xf32>
    %815 = arith.divf %813, %814 : vector<2x96xf32>
    %816 = vector.extract_strided_slice %815 {offsets = [0, 0], sizes = [2, 32], strides = [1, 1]} : vector<2x96xf32> to vector<2x32xf32>
    %817 = vector.extract_strided_slice %815 {offsets = [0, 32], sizes = [2, 32], strides = [1, 1]} : vector<2x96xf32> to vector<2x32xf32>
    %818 = vector.extract_strided_slice %815 {offsets = [0, 64], sizes = [2, 32], strides = [1, 1]} : vector<2x96xf32> to vector<2x32xf32>
    %819 = vector.extract_strided_slice %806 {offsets = [0, 96], sizes = [2, 32], strides = [1, 1]} : vector<2x128xf32> to vector<2x32xf32>
    %820 = math.tanh %819 : vector<2x32xf32>
    %821 = arith.mulf %817, %783 : vector<2x32xf32>
    %822 = arith.mulf %816, %820 : vector<2x32xf32>
    %823 = arith.addf %821, %822 : vector<2x32xf32>
    %824 = math.tanh %823 : vector<2x32xf32>
    %825 = arith.mulf %818, %824 : vector<2x32xf32>
    %826 = vector.extract_strided_slice %809 {offsets = [0, 0], sizes = [2, 96], strides = [1, 1]} : vector<2x128xf32> to vector<2x96xf32>
    %827 = arith.negf %826 : vector<2x96xf32>
    %828 = math.exp %827 : vector<2x96xf32>
    %cst_189 = arith.constant 1.000000e+00 : f32
    %829 = vector.broadcast %cst_189 : f32 to vector<2x96xf32>
    %830 = arith.addf %829, %828 : vector<2x96xf32>
    %831 = arith.divf %829, %830 : vector<2x96xf32>
    %832 = vector.extract_strided_slice %831 {offsets = [0, 0], sizes = [2, 32], strides = [1, 1]} : vector<2x96xf32> to vector<2x32xf32>
    %833 = vector.extract_strided_slice %831 {offsets = [0, 32], sizes = [2, 32], strides = [1, 1]} : vector<2x96xf32> to vector<2x32xf32>
    %834 = vector.extract_strided_slice %831 {offsets = [0, 64], sizes = [2, 32], strides = [1, 1]} : vector<2x96xf32> to vector<2x32xf32>
    %835 = vector.extract_strided_slice %809 {offsets = [0, 96], sizes = [2, 32], strides = [1, 1]} : vector<2x128xf32> to vector<2x32xf32>
    %836 = math.tanh %835 : vector<2x32xf32>
    %837 = arith.mulf %833, %799 : vector<2x32xf32>
    %838 = arith.mulf %832, %836 : vector<2x32xf32>
    %839 = arith.addf %837, %838 : vector<2x32xf32>
    %840 = math.tanh %839 : vector<2x32xf32>
    %841 = arith.mulf %834, %840 : vector<2x32xf32>
    %c6_190 = arith.constant 6 : index
    %c0_191 = arith.constant 0 : index
    %842 = vector.load %arg16[%c6_190, %c0_191] : memref<16x64xf32, #tpu.memory_space<vmem>>, vector<2x32xf32>
    tpu.vector_store %arg16[%c6_190, %c0_191], %825 {strides = array<i32>} : memref<16x64xf32, #tpu.memory_space<vmem>>, vector<2x32xf32>,
    %c8_192 = arith.constant 8 : index
    %c32_193 = arith.constant 32 : index
    %843 = vector.load %arg16[%c8_192, %c32_193] : memref<16x64xf32, #tpu.memory_space<vmem>>, vector<2x32xf32>
    tpu.vector_store %arg16[%c8_192, %c32_193], %841 {strides = array<i32>} : memref<16x64xf32, #tpu.memory_space<vmem>>, vector<2x32xf32>,
    %844 = vector.extract_strided_slice %676 {offsets = [8, 0], sizes = [2, 128], strides = [1, 1]} : vector<16x128xf32> to vector<2x128xf32>
    %cst_194 = arith.constant dense<0.000000e+00> : vector<2x128xf32>
    %845 = tpu.matmul %825, %678, %cst_194 {dimension_numbers = #tpu.dot_dimension_numbers<[1], [0], [0], [1], [0, 0, 1, 1], [], []>} : vector<2x32xf32>, vector<32x128xf32>, vector<2x128xf32> -> vector<2x128xf32>
    %846 = arith.addf %844, %845 : vector<2x128xf32>
    %847 = vector.extract_strided_slice %677 {offsets = [6, 0], sizes = [2, 128], strides = [1, 1]} : vector<16x128xf32> to vector<2x128xf32>
    %cst_195 = arith.constant dense<0.000000e+00> : vector<2x128xf32>
    %848 = tpu.matmul %841, %679, %cst_195 {dimension_numbers = #tpu.dot_dimension_numbers<[1], [0], [0], [1], [0, 0, 1, 1], [], []>} : vector<2x32xf32>, vector<32x128xf32>, vector<2x128xf32> -> vector<2x128xf32>
    %849 = arith.addf %847, %848 : vector<2x128xf32>
    %850 = vector.extract_strided_slice %846 {offsets = [0, 0], sizes = [2, 96], strides = [1, 1]} : vector<2x128xf32> to vector<2x96xf32>
    %851 = arith.negf %850 : vector<2x96xf32>
    %852 = math.exp %851 : vector<2x96xf32>
    %cst_196 = arith.constant 1.000000e+00 : f32
    %853 = vector.broadcast %cst_196 : f32 to vector<2x96xf32>
    %854 = arith.addf %853, %852 : vector<2x96xf32>
    %855 = arith.divf %853, %854 : vector<2x96xf32>
    %856 = vector.extract_strided_slice %855 {offsets = [0, 0], sizes = [2, 32], strides = [1, 1]} : vector<2x96xf32> to vector<2x32xf32>
    %857 = vector.extract_strided_slice %855 {offsets = [0, 32], sizes = [2, 32], strides = [1, 1]} : vector<2x96xf32> to vector<2x32xf32>
    %858 = vector.extract_strided_slice %855 {offsets = [0, 64], sizes = [2, 32], strides = [1, 1]} : vector<2x96xf32> to vector<2x32xf32>
    %859 = vector.extract_strided_slice %846 {offsets = [0, 96], sizes = [2, 32], strides = [1, 1]} : vector<2x128xf32> to vector<2x32xf32>
    %860 = math.tanh %859 : vector<2x32xf32>
    %861 = arith.mulf %857, %823 : vector<2x32xf32>
    %862 = arith.mulf %856, %860 : vector<2x32xf32>
    %863 = arith.addf %861, %862 : vector<2x32xf32>
    %864 = math.tanh %863 : vector<2x32xf32>
    %865 = arith.mulf %858, %864 : vector<2x32xf32>
    %866 = vector.extract_strided_slice %849 {offsets = [0, 0], sizes = [2, 96], strides = [1, 1]} : vector<2x128xf32> to vector<2x96xf32>
    %867 = arith.negf %866 : vector<2x96xf32>
    %868 = math.exp %867 : vector<2x96xf32>
    %cst_197 = arith.constant 1.000000e+00 : f32
    %869 = vector.broadcast %cst_197 : f32 to vector<2x96xf32>
    %870 = arith.addf %869, %868 : vector<2x96xf32>
    %871 = arith.divf %869, %870 : vector<2x96xf32>
    %872 = vector.extract_strided_slice %871 {offsets = [0, 0], sizes = [2, 32], strides = [1, 1]} : vector<2x96xf32> to vector<2x32xf32>
    %873 = vector.extract_strided_slice %871 {offsets = [0, 32], sizes = [2, 32], strides = [1, 1]} : vector<2x96xf32> to vector<2x32xf32>
    %874 = vector.extract_strided_slice %871 {offsets = [0, 64], sizes = [2, 32], strides = [1, 1]} : vector<2x96xf32> to vector<2x32xf32>
    %875 = vector.extract_strided_slice %849 {offsets = [0, 96], sizes = [2, 32], strides = [1, 1]} : vector<2x128xf32> to vector<2x32xf32>
    %876 = math.tanh %875 : vector<2x32xf32>
    %877 = arith.mulf %873, %839 : vector<2x32xf32>
    %878 = arith.mulf %872, %876 : vector<2x32xf32>
    %879 = arith.addf %877, %878 : vector<2x32xf32>
    %880 = math.tanh %879 : vector<2x32xf32>
    %881 = arith.mulf %874, %880 : vector<2x32xf32>
    %c8_198 = arith.constant 8 : index
    %c0_199 = arith.constant 0 : index
    %882 = vector.load %arg16[%c8_198, %c0_199] : memref<16x64xf32, #tpu.memory_space<vmem>>, vector<2x32xf32>
    tpu.vector_store %arg16[%c8_198, %c0_199], %865 {strides = array<i32>} : memref<16x64xf32, #tpu.memory_space<vmem>>, vector<2x32xf32>,
    %c6_200 = arith.constant 6 : index
    %c32_201 = arith.constant 32 : index
    %883 = vector.load %arg16[%c6_200, %c32_201] : memref<16x64xf32, #tpu.memory_space<vmem>>, vector<2x32xf32>
    tpu.vector_store %arg16[%c6_200, %c32_201], %881 {strides = array<i32>} : memref<16x64xf32, #tpu.memory_space<vmem>>, vector<2x32xf32>,
    %884 = vector.extract_strided_slice %676 {offsets = [10, 0], sizes = [2, 128], strides = [1, 1]} : vector<16x128xf32> to vector<2x128xf32>
    %cst_202 = arith.constant dense<0.000000e+00> : vector<2x128xf32>
    %885 = tpu.matmul %865, %678, %cst_202 {dimension_numbers = #tpu.dot_dimension_numbers<[1], [0], [0], [1], [0, 0, 1, 1], [], []>} : vector<2x32xf32>, vector<32x128xf32>, vector<2x128xf32> -> vector<2x128xf32>
    %886 = arith.addf %884, %885 : vector<2x128xf32>
    %887 = vector.extract_strided_slice %677 {offsets = [4, 0], sizes = [2, 128], strides = [1, 1]} : vector<16x128xf32> to vector<2x128xf32>
    %cst_203 = arith.constant dense<0.000000e+00> : vector<2x128xf32>
    %888 = tpu.matmul %881, %679, %cst_203 {dimension_numbers = #tpu.dot_dimension_numbers<[1], [0], [0], [1], [0, 0, 1, 1], [], []>} : vector<2x32xf32>, vector<32x128xf32>, vector<2x128xf32> -> vector<2x128xf32>
    %889 = arith.addf %887, %888 : vector<2x128xf32>
    %890 = vector.extract_strided_slice %886 {offsets = [0, 0], sizes = [2, 96], strides = [1, 1]} : vector<2x128xf32> to vector<2x96xf32>
    %891 = arith.negf %890 : vector<2x96xf32>
    %892 = math.exp %891 : vector<2x96xf32>
    %cst_204 = arith.constant 1.000000e+00 : f32
    %893 = vector.broadcast %cst_204 : f32 to vector<2x96xf32>
    %894 = arith.addf %893, %892 : vector<2x96xf32>
    %895 = arith.divf %893, %894 : vector<2x96xf32>
    %896 = vector.extract_strided_slice %895 {offsets = [0, 0], sizes = [2, 32], strides = [1, 1]} : vector<2x96xf32> to vector<2x32xf32>
    %897 = vector.extract_strided_slice %895 {offsets = [0, 32], sizes = [2, 32], strides = [1, 1]} : vector<2x96xf32> to vector<2x32xf32>
    %898 = vector.extract_strided_slice %895 {offsets = [0, 64], sizes = [2, 32], strides = [1, 1]} : vector<2x96xf32> to vector<2x32xf32>
    %899 = vector.extract_strided_slice %886 {offsets = [0, 96], sizes = [2, 32], strides = [1, 1]} : vector<2x128xf32> to vector<2x32xf32>
    %900 = math.tanh %899 : vector<2x32xf32>
    %901 = arith.mulf %897, %863 : vector<2x32xf32>
    %902 = arith.mulf %896, %900 : vector<2x32xf32>
    %903 = arith.addf %901, %902 : vector<2x32xf32>
    %904 = math.tanh %903 : vector<2x32xf32>
    %905 = arith.mulf %898, %904 : vector<2x32xf32>
    %906 = vector.extract_strided_slice %889 {offsets = [0, 0], sizes = [2, 96], strides = [1, 1]} : vector<2x128xf32> to vector<2x96xf32>
    %907 = arith.negf %906 : vector<2x96xf32>
    %908 = math.exp %907 : vector<2x96xf32>
    %cst_205 = arith.constant 1.000000e+00 : f32
    %909 = vector.broadcast %cst_205 : f32 to vector<2x96xf32>
    %910 = arith.addf %909, %908 : vector<2x96xf32>
    %911 = arith.divf %909, %910 : vector<2x96xf32>
    %912 = vector.extract_strided_slice %911 {offsets = [0, 0], sizes = [2, 32], strides = [1, 1]} : vector<2x96xf32> to vector<2x32xf32>
    %913 = vector.extract_strided_slice %911 {offsets = [0, 32], sizes = [2, 32], strides = [1, 1]} : vector<2x96xf32> to vector<2x32xf32>
    %914 = vector.extract_strided_slice %911 {offsets = [0, 64], sizes = [2, 32], strides = [1, 1]} : vector<2x96xf32> to vector<2x32xf32>
    %915 = vector.extract_strided_slice %889 {offsets = [0, 96], sizes = [2, 32], strides = [1, 1]} : vector<2x128xf32> to vector<2x32xf32>
    %916 = math.tanh %915 : vector<2x32xf32>
    %917 = arith.mulf %913, %879 : vector<2x32xf32>
    %918 = arith.mulf %912, %916 : vector<2x32xf32>
    %919 = arith.addf %917, %918 : vector<2x32xf32>
    %920 = math.tanh %919 : vector<2x32xf32>
    %921 = arith.mulf %914, %920 : vector<2x32xf32>
    %c10_206 = arith.constant 10 : index
    %c0_207 = arith.constant 0 : index
    %922 = vector.load %arg16[%c10_206, %c0_207] : memref<16x64xf32, #tpu.memory_space<vmem>>, vector<2x32xf32>
    tpu.vector_store %arg16[%c10_206, %c0_207], %905 {strides = array<i32>} : memref<16x64xf32, #tpu.memory_space<vmem>>, vector<2x32xf32>,
    %c4_208 = arith.constant 4 : index
    %c32_209 = arith.constant 32 : index
    %923 = vector.load %arg16[%c4_208, %c32_209] : memref<16x64xf32, #tpu.memory_space<vmem>>, vector<2x32xf32>
    tpu.vector_store %arg16[%c4_208, %c32_209], %921 {strides = array<i32>} : memref<16x64xf32, #tpu.memory_space<vmem>>, vector<2x32xf32>,
    %924 = vector.extract_strided_slice %676 {offsets = [12, 0], sizes = [2, 128], strides = [1, 1]} : vector<16x128xf32> to vector<2x128xf32>
    %cst_210 = arith.constant dense<0.000000e+00> : vector<2x128xf32>
    %925 = tpu.matmul %905, %678, %cst_210 {dimension_numbers = #tpu.dot_dimension_numbers<[1], [0], [0], [1], [0, 0, 1, 1], [], []>} : vector<2x32xf32>, vector<32x128xf32>, vector<2x128xf32> -> vector<2x128xf32>
    %926 = arith.addf %924, %925 : vector<2x128xf32>
    %927 = vector.extract_strided_slice %677 {offsets = [2, 0], sizes = [2, 128], strides = [1, 1]} : vector<16x128xf32> to vector<2x128xf32>
    %cst_211 = arith.constant dense<0.000000e+00> : vector<2x128xf32>
    %928 = tpu.matmul %921, %679, %cst_211 {dimension_numbers = #tpu.dot_dimension_numbers<[1], [0], [0], [1], [0, 0, 1, 1], [], []>} : vector<2x32xf32>, vector<32x128xf32>, vector<2x128xf32> -> vector<2x128xf32>
    %929 = arith.addf %927, %928 : vector<2x128xf32>
    %930 = vector.extract_strided_slice %926 {offsets = [0, 0], sizes = [2, 96], strides = [1, 1]} : vector<2x128xf32> to vector<2x96xf32>
    %931 = arith.negf %930 : vector<2x96xf32>
    %932 = math.exp %931 : vector<2x96xf32>
    %cst_212 = arith.constant 1.000000e+00 : f32
    %933 = vector.broadcast %cst_212 : f32 to vector<2x96xf32>
    %934 = arith.addf %933, %932 : vector<2x96xf32>
    %935 = arith.divf %933, %934 : vector<2x96xf32>
    %936 = vector.extract_strided_slice %935 {offsets = [0, 0], sizes = [2, 32], strides = [1, 1]} : vector<2x96xf32> to vector<2x32xf32>
    %937 = vector.extract_strided_slice %935 {offsets = [0, 32], sizes = [2, 32], strides = [1, 1]} : vector<2x96xf32> to vector<2x32xf32>
    %938 = vector.extract_strided_slice %935 {offsets = [0, 64], sizes = [2, 32], strides = [1, 1]} : vector<2x96xf32> to vector<2x32xf32>
    %939 = vector.extract_strided_slice %926 {offsets = [0, 96], sizes = [2, 32], strides = [1, 1]} : vector<2x128xf32> to vector<2x32xf32>
    %940 = math.tanh %939 : vector<2x32xf32>
    %941 = arith.mulf %937, %903 : vector<2x32xf32>
    %942 = arith.mulf %936, %940 : vector<2x32xf32>
    %943 = arith.addf %941, %942 : vector<2x32xf32>
    %944 = math.tanh %943 : vector<2x32xf32>
    %945 = arith.mulf %938, %944 : vector<2x32xf32>
    %946 = vector.extract_strided_slice %929 {offsets = [0, 0], sizes = [2, 96], strides = [1, 1]} : vector<2x128xf32> to vector<2x96xf32>
    %947 = arith.negf %946 : vector<2x96xf32>
    %948 = math.exp %947 : vector<2x96xf32>
    %cst_213 = arith.constant 1.000000e+00 : f32
    %949 = vector.broadcast %cst_213 : f32 to vector<2x96xf32>
    %950 = arith.addf %949, %948 : vector<2x96xf32>
    %951 = arith.divf %949, %950 : vector<2x96xf32>
    %952 = vector.extract_strided_slice %951 {offsets = [0, 0], sizes = [2, 32], strides = [1, 1]} : vector<2x96xf32> to vector<2x32xf32>
    %953 = vector.extract_strided_slice %951 {offsets = [0, 32], sizes = [2, 32], strides = [1, 1]} : vector<2x96xf32> to vector<2x32xf32>
    %954 = vector.extract_strided_slice %951 {offsets = [0, 64], sizes = [2, 32], strides = [1, 1]} : vector<2x96xf32> to vector<2x32xf32>
    %955 = vector.extract_strided_slice %929 {offsets = [0, 96], sizes = [2, 32], strides = [1, 1]} : vector<2x128xf32> to vector<2x32xf32>
    %956 = math.tanh %955 : vector<2x32xf32>
    %957 = arith.mulf %953, %919 : vector<2x32xf32>
    %958 = arith.mulf %952, %956 : vector<2x32xf32>
    %959 = arith.addf %957, %958 : vector<2x32xf32>
    %960 = math.tanh %959 : vector<2x32xf32>
    %961 = arith.mulf %954, %960 : vector<2x32xf32>
    %c12_214 = arith.constant 12 : index
    %c0_215 = arith.constant 0 : index
    %962 = vector.load %arg16[%c12_214, %c0_215] : memref<16x64xf32, #tpu.memory_space<vmem>>, vector<2x32xf32>
    tpu.vector_store %arg16[%c12_214, %c0_215], %945 {strides = array<i32>} : memref<16x64xf32, #tpu.memory_space<vmem>>, vector<2x32xf32>,
    %c2_216 = arith.constant 2 : index
    %c32_217 = arith.constant 32 : index
    %963 = vector.load %arg16[%c2_216, %c32_217] : memref<16x64xf32, #tpu.memory_space<vmem>>, vector<2x32xf32>
    tpu.vector_store %arg16[%c2_216, %c32_217], %961 {strides = array<i32>} : memref<16x64xf32, #tpu.memory_space<vmem>>, vector<2x32xf32>,
    %964 = vector.extract_strided_slice %676 {offsets = [14, 0], sizes = [2, 128], strides = [1, 1]} : vector<16x128xf32> to vector<2x128xf32>
    %cst_218 = arith.constant dense<0.000000e+00> : vector<2x128xf32>
    %965 = tpu.matmul %945, %678, %cst_218 {dimension_numbers = #tpu.dot_dimension_numbers<[1], [0], [0], [1], [0, 0, 1, 1], [], []>} : vector<2x32xf32>, vector<32x128xf32>, vector<2x128xf32> -> vector<2x128xf32>
    %966 = arith.addf %964, %965 : vector<2x128xf32>
    %967 = vector.extract_strided_slice %677 {offsets = [0, 0], sizes = [2, 128], strides = [1, 1]} : vector<16x128xf32> to vector<2x128xf32>
    %cst_219 = arith.constant dense<0.000000e+00> : vector<2x128xf32>
    %968 = tpu.matmul %961, %679, %cst_219 {dimension_numbers = #tpu.dot_dimension_numbers<[1], [0], [0], [1], [0, 0, 1, 1], [], []>} : vector<2x32xf32>, vector<32x128xf32>, vector<2x128xf32> -> vector<2x128xf32>
    %969 = arith.addf %967, %968 : vector<2x128xf32>
    %970 = vector.extract_strided_slice %966 {offsets = [0, 0], sizes = [2, 96], strides = [1, 1]} : vector<2x128xf32> to vector<2x96xf32>
    %971 = arith.negf %970 : vector<2x96xf32>
    %972 = math.exp %971 : vector<2x96xf32>
    %cst_220 = arith.constant 1.000000e+00 : f32
    %973 = vector.broadcast %cst_220 : f32 to vector<2x96xf32>
    %974 = arith.addf %973, %972 : vector<2x96xf32>
    %975 = arith.divf %973, %974 : vector<2x96xf32>
    %976 = vector.extract_strided_slice %975 {offsets = [0, 0], sizes = [2, 32], strides = [1, 1]} : vector<2x96xf32> to vector<2x32xf32>
    %977 = vector.extract_strided_slice %975 {offsets = [0, 32], sizes = [2, 32], strides = [1, 1]} : vector<2x96xf32> to vector<2x32xf32>
    %978 = vector.extract_strided_slice %975 {offsets = [0, 64], sizes = [2, 32], strides = [1, 1]} : vector<2x96xf32> to vector<2x32xf32>
    %979 = vector.extract_strided_slice %966 {offsets = [0, 96], sizes = [2, 32], strides = [1, 1]} : vector<2x128xf32> to vector<2x32xf32>
    %980 = math.tanh %979 : vector<2x32xf32>
    %981 = arith.mulf %977, %943 : vector<2x32xf32>
    %982 = arith.mulf %976, %980 : vector<2x32xf32>
    %983 = arith.addf %981, %982 : vector<2x32xf32>
    %984 = math.tanh %983 : vector<2x32xf32>
    %985 = arith.mulf %978, %984 : vector<2x32xf32>
    %986 = vector.extract_strided_slice %969 {offsets = [0, 0], sizes = [2, 96], strides = [1, 1]} : vector<2x128xf32> to vector<2x96xf32>
    %987 = arith.negf %986 : vector<2x96xf32>
    %988 = math.exp %987 : vector<2x96xf32>
    %cst_221 = arith.constant 1.000000e+00 : f32
    %989 = vector.broadcast %cst_221 : f32 to vector<2x96xf32>
    %990 = arith.addf %989, %988 : vector<2x96xf32>
    %991 = arith.divf %989, %990 : vector<2x96xf32>
    %992 = vector.extract_strided_slice %991 {offsets = [0, 0], sizes = [2, 32], strides = [1, 1]} : vector<2x96xf32> to vector<2x32xf32>
    %993 = vector.extract_strided_slice %991 {offsets = [0, 32], sizes = [2, 32], strides = [1, 1]} : vector<2x96xf32> to vector<2x32xf32>
    %994 = vector.extract_strided_slice %991 {offsets = [0, 64], sizes = [2, 32], strides = [1, 1]} : vector<2x96xf32> to vector<2x32xf32>
    %995 = vector.extract_strided_slice %969 {offsets = [0, 96], sizes = [2, 32], strides = [1, 1]} : vector<2x128xf32> to vector<2x32xf32>
    %996 = math.tanh %995 : vector<2x32xf32>
    %997 = arith.mulf %993, %959 : vector<2x32xf32>
    %998 = arith.mulf %992, %996 : vector<2x32xf32>
    %999 = arith.addf %997, %998 : vector<2x32xf32>
    %1000 = math.tanh %999 : vector<2x32xf32>
    %1001 = arith.mulf %994, %1000 : vector<2x32xf32>
    %c14_222 = arith.constant 14 : index
    %c0_223 = arith.constant 0 : index
    %1002 = vector.load %arg16[%c14_222, %c0_223] : memref<16x64xf32, #tpu.memory_space<vmem>>, vector<2x32xf32>
    tpu.vector_store %arg16[%c14_222, %c0_223], %985 {strides = array<i32>} : memref<16x64xf32, #tpu.memory_space<vmem>>, vector<2x32xf32>,
    %c0_224 = arith.constant 0 : index
    %c32_225 = arith.constant 32 : index
    %1003 = vector.load %arg16[%c0_224, %c32_225] : memref<16x64xf32, #tpu.memory_space<vmem>>, vector<2x32xf32>
    tpu.vector_store %arg16[%c0_224, %c32_225], %1001 {strides = array<i32>} : memref<16x64xf32, #tpu.memory_space<vmem>>, vector<2x32xf32>,
    %c14_226 = arith.constant 14 : index
    %c0_227 = arith.constant 0 : index
    %1004 = vector.load %arg16[%c14_226, %c0_227] : memref<16x64xf32, #tpu.memory_space<vmem>>, vector<2x64xf32>
    %c0_228 = arith.constant 0 : index
    %c0_229 = arith.constant 0 : index
    %1005 = vector.load %arg13[%c0_228, %c0_229] : memref<64x3xf32, #tpu.memory_space<vmem>>, vector<64x3xf32>
    %cst_230 = arith.constant dense<0.000000e+00> : vector<2x3xf32>
    %1006 = tpu.matmul %1004, %1005, %cst_230 {dimension_numbers = #tpu.dot_dimension_numbers<[1], [0], [0], [1], [0, 0, 1, 1], [], []>} : vector<2x64xf32>, vector<64x3xf32>, vector<2x3xf32> -> vector<2x3xf32>
    %c0_231 = arith.constant 0 : index
    %c0_232 = arith.constant 0 : index
    %1007 = vector.load %arg14[%c0_231, %c0_232] : memref<1x3xf32, #tpu.memory_space<vmem>>, vector<1x3xf32>
    %1008 = vector.broadcast %1007 : vector<1x3xf32> to vector<2x3xf32>
    %1009 = arith.addf %1006, %1008 : vector<2x3xf32>
    %c0_233 = arith.constant 0 : index
    %c0_234 = arith.constant 0 : index
    %1010 = vector.load %arg15[%c0_233, %c0_234] : memref<2x3xf32, #tpu.memory_space<vmem>>, vector<2x3xf32>
    tpu.vector_store %arg15[%c0_233, %c0_234], %1009 {strides = array<i32>} : memref<2x3xf32, #tpu.memory_space<vmem>>, vector<2x3xf32>,
    return
  }
}

</mosaic_0001>

<bundles_post_ra>
// kernel: bilstm_forward.1
= control target key start
LH: loop header
LB: loop body
LE: loop exit
PB: predicated region body
PF: predicated region fallthrough
CT: control target
= control target key end

     0   :  { %20 = vsyncpa [#allocation4], 0  ;;  %s5712_s0 = inlined_call_operand.vmem [shape: f32[16,1], index: 0, kind: input, shape index: {}]   ;;  %s5713_s1 = inlined_call_operand.vmem [shape: f32[1,256], index: 1, kind: input, shape index: {}]   ;;  %s5714_s2 = inlined_call_operand.vmem [shape: f32[32,128], index: 2, kind: input, shape index: {}]   ;;  %s5715_s3 = inlined_call_operand.vmem [shape: f32[32,128], index: 3, kind: input, shape index: {}]   ;;  %s5716_s4 = inlined_call_operand.vmem [shape: f32[1,256], index: 4, kind: input, shape index: {}]   ;;  %s5717_s5 = inlined_call_operand.hbm [shape: f32[64,256], index: 5, kind: input, shape index: {}]   ;;  %s5718_s6 = inlined_call_operand.vmem [shape: f32[32,128], index: 6, kind: input, shape index: {}]   ;;  %s5719_s7 = inlined_call_operand.hbm [shape: f32[32,128], index: 7, kind: input, shape index: {}]   ;;  %s5720_s8 = inlined_call_operand.vmem [shape: f32[1,256], index: 8, kind: input, shape index: {}]   ;;  %s5721_s9 = inlined_call_operand.hbm [shape: f32[64,256], index: 9, kind: input, shape index: {}]   ;;  %s5722_s10 = inlined_call_operand.hbm [shape: f32[32,128], index: 10, kind: input, shape index: {}]   ;;  %s5723_s11 = inlined_call_operand.hbm [shape: f32[32,128], index: 11, kind: input, shape index: {}]   ;;  %s5724_s12 = inlined_call_operand.vmem [shape: f32[1,256], index: 12, kind: input, shape index: {}]   ;;  %s5725_s13 = inlined_call_operand.vmem [shape: f32[64,3], index: 13, kind: input, shape index: {}]   ;;  %s5726_s14 = inlined_call_operand.vmem [shape: f32[1,3], index: 14, kind: input, shape index: {}]   ;;  %s5727_s15 = inlined_call_operand.hbm [shape: f32[2,3], index: 15, kind: output, shape index: {}]  }
   0x1   :  { %21 = vsyncpa [#allocation7], 0 }
   0x2   :  { %22 = vsyncpa [#allocation10], 0  ;;  %s53_s20 = sshll.u32 %s5719_s7, 4  ;;  %s54_s20 = int_to_ptr.hbm [resolvable:$true] %s53_s20 }
   0x3   :  { %23 = vsyncpa [#allocation5], 0  ;;  %s4506_s21 = smov [#allocation6]   ;;  %s81_s25 = sshll.u32 %s5722_s10, 4  ;;  %s82_s25 = int_to_ptr.hbm [resolvable:$true] %s81_s25 }
   0x4   :  { %s55_s22 = sshll.u32 %s4506_s21, 4  ;;  %s4507_s26 = smov 128   ;;  %s56_s22 = int_to_ptr.vmem [resolvable:$true] %s55_s22 }
   0x5   :  { %s4508_s27 = smov 8   ;;  %s4509_s28 = smov [#allocation9]  }
   0x6   :  { %61 = dma.hbm_to_vmem [thread:$0]  %s54_s20, 512, %s56_s22, [#allocation7], %s4507_s26, %s4507_s26, %s4508_s27  }
   0x7   :  { %s83_s29 = sshll.u32 %s4509_s28, 4  ;;  %s38_s16 = sshll.u32 %s5717_s5, 4  ;;  %s84_s29 = int_to_ptr.vmem [resolvable:$true] %s83_s29  ;;  %s39_s16 = int_to_ptr.hbm [resolvable:$true] %s38_s16 }
   0x8   :  { %89 = dma.hbm_to_vmem [thread:$0]  %s82_s25, 512, %s84_s29, [#allocation10], %s4507_s26, %s4507_s26, %s4508_s27  }
   0x9   :  { %s4510_s10 = smov [#allocation3]   ;;  %s68_s20 = sshll.u32 %s5721_s9, 4  ;;  %s69_s20 = int_to_ptr.hbm [resolvable:$true] %s68_s20 }
   0xa   :  { %s40_s17 = sshll.u32 %s4510_s10, 4  ;;  %s4511_s21 = smov 256   ;;  %s41_s17 = int_to_ptr.vmem [resolvable:$true] %s40_s17 }
   0xb   :  { %s4512_s22 = smov 16   ;;  %s4513_s23 = smov [#allocation8]  }
   0xc   :  { %46 = dma.hbm_to_vmem [thread:$0]  %s39_s16, 2048, %s41_s17, [#allocation4], %s4511_s21, %s4511_s21, %s4512_s22  }
   0xd   :  { %s70_s24 = sshll.u32 %s4513_s23, 4  ;;  %s94_s30 = sshll.u32 %s5723_s11, 4  ;;  %s71_s24 = int_to_ptr.vmem [resolvable:$true] %s70_s24  ;;  %s95_s30 = int_to_ptr.hbm [resolvable:$true] %s94_s30 }
   0xe   :  { %76 = dma.hbm_to_vmem [thread:$0]  %s69_s20, 2048, %s71_s24, [#allocation7], %s4511_s21, %s4511_s21, %s4512_s22  }
   0xf   :  { %s4514_s25 = smov [#allocation11]  }
  0x10   :  { %s96_s29 = sshll.u32 %s4514_s25, 4  ;;  %s97_s29 = int_to_ptr.vmem [resolvable:$true] %s96_s29 }
  0x11   :  { %102 = dma.hbm_to_vmem [thread:$0]  %s95_s30, 512, %s97_s29, [#allocation10], %s4507_s26, %s4507_s26, %s4508_s27  }
  0x12   :  { %4498 = dma.done.wait [#allocation4], 2048  }
  0x13   :  { %4499 = vsyncadd [#allocation4], 4294965248 }
  0x14   :  { %4500 = dma.done.wait [#allocation7], 2560  }
  0x15   :  { %4501 = vsyncadd [#allocation7], 4294964736 }
  0x16   :  { %4502 = dma.done.wait [#allocation10], 1024  }
  0x17   :  { %4503 = vsyncadd [#allocation10], 4294966272  ;;  %v4515_v0 = vmov 0   ;;  %v4628_v1 = vld [vmem:[%s5714_s2 + $0x18] sm:$0xff]  ;;  %v4633_v2 = vld [vmem:[%s5714_s2 + $0x10] sm:$0xff]  ;;  %v4516_v11 = vmov 0.0  }
  0x18   :  { %3968 = vset.pattern.permute.xlu0 %v4515_v0  ;;  %185 = vmatpush.msra.mxu1 %v4628_v1  ;;  %v132_v3 = vld [vmem:[%s5712_s0 + $0x8] sm:$0xff]  ;;  %v4642_v4 = vld [vmem:[%s5715_s3 + $0x18] sm:$0xff]  ;;  %v4655_v6 = vld [vmem:[%s5715_s3 + $0x10] sm:$0xff]  ;;  %vm169_vm8 = vcmask 261120   ;;  %vm296_vm9 = vcmask 254976   ;;  %s4519_s11 = smov 96  }
  0x19   :  { %318 = vmatpush.msra.mxu2 %v4628_v1  ;;  %v4648_v5 = vld [vmem:[%s5714_s2 + $0x8] sm:$0xff]  ;;  %140 = vperm.xlu0 %3968, %v132_v3   ;;  %v4661_v7 = vld [vmem:[%s5714_s2] sm:$0xff]  ;;  %s4520_s27 = smov [#allocation12]   ;;  %s3842_s18 = sshll.u32 %s5727_s15, 4  ;;  %s3843_s18 = int_to_ptr.hbm [resolvable:$true] %s3842_s18 }
  0x1a   :  { %347 = vmatpush.msra.mxu3 %v4642_v4  ;;  %186 = vmatpush.msra.mxu1 %v4633_v2  ;;  %v4669_v8 = vld [vmem:[%s5715_s3 + $0x8] sm:$0xff]  ;;  %v4678_v9 = vld [vmem:[%s5715_s3] sm:$0xff]  ;;  %s3840_s10 = sshll.u32 %s4520_s27, 4  ;;  %s3841_s10 = int_to_ptr.vmem [resolvable:$true] %s3840_s10 }
  0x1b   :  { %319 = vmatpush.msra.mxu2 %v4633_v2  ;;  %468 = vmatpush.msra.mxu0 %v4628_v1  ;;  %v131_v10 = vld [vmem:[%s5712_s0] sm:$0xff] }
  0x1c   :  { %348 = vmatpush.msra.mxu3 %v4655_v6  ;;  %187 = vmatpush.msra.mxu1 %v4648_v5  ;;  %v129_v12 = vld [vmem:[%s5713_s1] sm:$0x3]  ;;  %s4517_s1 = smov 32  }
  0x1d   :  { %320 = vmatpush.msra.mxu2 %v4648_v5  ;;  %469 = vmatpush.msra.mxu0 %v4633_v2  ;;  %v130_v13 = vld [vmem:[%s5716_s4] sm:$0x3]  ;;  %v144_v14 = vperm.slane %v129_v12, 0  ;;  %v145_v19 = vperm.slane %v129_v12, 1  ;;  %s4518_s4 = smov 64  }
  0x1e   :  { %349 = vmatpush.msra.mxu3 %v4669_v8  ;;  %188 = vmatpush.msra.mxu1 %v4661_v7  ;;  %v153_v17 = vperm.slane %v130_v13, 0  ;;  %v154_v20 = vperm.slane %v130_v13, 1 }
  0x1f   :  { %321 = vmatpush.msra.mxu2 %v4661_v7  ;;  %189 = vmatmul.f32.vlgmr.msra.gmra.mxu1 %v4516_v11 }
  0x20   :  { %350 = vmatpush.msra.mxu3 %v4678_v9  ;;  %206 = vmatpush.msrb.mxu1 %v4642_v4 }
  0x21   :  { %470 = vmatpush.msra.mxu0 %v4648_v5  ;;  %135 = vperm.xlu0 %3968, %v131_v10  }
  0x22   :  { %647 = vmatpush.msrb.mxu3 %v4642_v4  ;;  %207 = vmatpush.msrb.mxu1 %v4655_v6 }
  0x23   :  { %471 = vmatpush.msra.mxu0 %v4661_v7  ;;  %618 = vmatpush.msrb.mxu2 %v4628_v1 }
  0x24   :  { %648 = vmatpush.msrb.mxu3 %v4655_v6  ;;  %208 = vmatpush.msrb.mxu1 %v4669_v8 }
  0x25   :  { %765 = vmatpush.msrb.mxu0 %v4628_v1  ;;  %619 = vmatpush.msrb.mxu2 %v4633_v2 }
  0x26   :  { %649 = vmatpush.msrb.mxu3 %v4669_v8  ;;  %209 = vmatpush.msrb.mxu1 %v4678_v9 }
  0x27   :  { %766 = vmatpush.msrb.mxu0 %v4633_v2  ;;  %210 = vmatmul.f32.vlgmr.msrb.gmra.mxu1 %v4516_v11 }
  0x28   :  { %650 = vmatpush.msrb.mxu3 %v4678_v9  ;;  %497 = vmatpush.msra.mxu1 %v4642_v4 }
  0x29   :  { %620 = vmatpush.msrb.mxu2 %v4648_v5  ;;  %767 = vmatpush.msrb.mxu0 %v4648_v5 }
  0x2a   :  { %498 = vmatpush.msra.mxu1 %v4655_v6 }
  0x2b   :  { %621 = vmatpush.msrb.mxu2 %v4661_v7  ;;  %768 = vmatpush.msrb.mxu0 %v4661_v7 }
  0x2c   :  { %499 = vmatpush.msra.mxu1 %v4669_v8 }
  0x2e   :  { %500 = vmatpush.msra.mxu1 %v4678_v9 }
  0x30   :  { %790 = vmatpush.msrb.mxu1 %v4642_v4 }
  0x32   :  { %791 = vmatpush.msrb.mxu1 %v4655_v6 }
  0x34   :  { %792 = vmatpush.msrb.mxu1 %v4669_v8 }
  0x36   :  { %793 = vmatpush.msrb.mxu1 %v4678_v9 }
  0x8b   :  { %v141_v15 = vpop.permute.xlu0 %140 }
  0x8c   :  { %v150_v16 = vmul.f32 %v144_v14, %v141_v15  ;;  %v151_v25 = vmul.f32 %v145_v19, %v141_v15 }
  0x8e   :  { %v4719_v18 = vadd.f32 %v153_v17, %v150_v16  ;;  %v4723_v26 = vadd.f32 %v154_v20, %v151_v25 }
  0x93   :  { %v136_v21 = vpop.permute.xlu0 %135 }
  0x94   :  { %v149_v22 = vmul.f32 %v145_v19, %v136_v21  ;;  %v148_v28 = vmul.f32 %v144_v14, %v136_v21 }
  0x96   :  { %v4721_v23 = vadd.f32 %v154_v20, %v149_v22  ;;  %v4726_v31 = vadd.f32 %v153_v17, %v148_v28 }
  0x9c   :  { %v190_v24 = vpop.f32.mrf.mxu1 }
  0x9d   :  { %v193_v32 = vadd.f32 %v190_v24, %v4726_v31 }
  0x9f   :  { %v3854_v36 = vmul.f32 -1.442695, %v193_v32 }
  0xa4   :  { %v211_v27 = vpop.f32.mrf.mxu1 }
  0xa5   :  { %v215_v29 = vrot.slane %v211_v27, 2 }
  0xa7   :  { %v217_v30 = vadd.f32 %v215_v29, %v4723_v26 }
  0xa9   :  { %3970 = vtanh.f32 %v217_v30  ;;  %v3855_v35 = vmul.f32 -1.442695, %v217_v30 }
  0xaa   :  { %3972 = vtanh.f32 %v193_v32 }
  0xab   :  { %3974 = vpow2.f32 %v3855_v35 }
  0xac   :  { %3976 = vpow2.f32 %v3854_v36 }
  0xaf   :  { %v3971_v33 = vpop.eup %3970 }
  0xb0   :  { %277 = vrot.lane.b32.xlu1 %v3971_v33, %s4517_s1  ;;  %v3973_v34 = vpop.eup %3972 }
  0xb1   :  { %v3975_v37 = vpop.eup %3974 }
  0xb2   :  { %v258_v38 = vadd.f32 1.0, %v3975_v37  ;;  %v3977_v39 = vpop.eup %3976 }
  0xb3   :  { %v221_v40 = vadd.f32 1.0, %v3977_v39 }
  0xb4   :  { %3978 = vrcp.f32 %v258_v38  ;;  %v270_v49 = vand.u32 2147483648, %v258_v38  ;;  %vm264_vm1 = vweird.f32 %v258_v38  ;;  %v268_v50 = vand.u32 2147483647, %v258_v38 }
  0xb5   :  { %3980 = vrcp.f32 %v221_v40  ;;  %v233_v58 = vand.u32 2147483648, %v221_v40  ;;  %vm227_vm5 = vweird.f32 %v221_v40  ;;  %v231_v59 = vand.u32 2147483647, %v221_v40 }
  0xb6   :  { %v271_v53 = vor.u32 1.1754944e-38, %v270_v49  ;;  %vm269_vm3 = vcmp.eq.f32.partialorder %v268_v50, 8.507059e+37 }
  0xb7   :  { %v234_v61 = vor.u32 1.1754944e-38, %v233_v58  ;;  %vm232_vm7 = vcmp.eq.f32.partialorder %v231_v59, 8.507059e+37 }
  0xb8   :  { %240 = vrot.lane.b32.xlu1 %v3973_v34, %s4517_s1 }
  0xba   :  { %v3979_v41 = vpop.eup %3978 }
  0xbb   :  { %v260_v42 = vmul.f32 %v3979_v41, %v258_v38  ;;  %v3981_v44 = vpop.eup %3980  ;;  %vm265_vm0 = vweird.f32 %v3979_v41 }
  0xbc   :  { %v223_v46 = vmul.f32 %v3981_v44, %v221_v40  ;;  %vm266_vm2 = vmor %vm264_vm1, %vm265_vm0  ;;  %vm228_vm4 = vweird.f32 %v3981_v44 }
  0xbd   :  { %v261_v43 = vsub.f32 1.0, %v260_v42  ;;  %vm229_vm6 = vmor %vm227_vm5, %vm228_vm4 }
  0xbe   :  { %v224_v48 = vsub.f32 1.0, %v223_v46 }
  0xbf   :  { %v262_v45 = vmul.f32 %v3979_v41, %v261_v43 }
  0xc0   :  { %v225_v52 = vmul.f32 %v3981_v44, %v224_v48 }
  0xc1   :  { %v263_v47 = vadd.f32 %v3979_v41, %v262_v45 }
  0xc2   :  { %v226_v57 = vadd.f32 %v3981_v44, %v225_v52 }
  0xc3   :  { %v267_v51 = vsel %vm266_vm2, %v3979_v41, %v263_v47 }
  0xc4   :  { %v272_v55 = vsel %vm269_vm3, %v271_v53, %v267_v51  ;;  %v230_v60 = vsel %vm229_vm6, %v3981_v44, %v226_v57 }
  0xc5   :  { %v235_v63 = vsel %vm232_vm7, %v234_v61, %v230_v60  ;;  %v275_v3 = vmul.f32 0.0, %v272_v55 }
  0xc6   :  { %v238_v13 = vmul.f32 0.0, %v235_v63 }
 0x122   :  { %v278_v54 = vpop.permute.xlu1 %277 }
 0x123   :  { %v280_v56 = vmul.f32 %v278_v54, %v272_v55 }
 0x125   :  { %282 = vrot.lane.b32.xlu2 %v280_v56, %s4517_s1 }
 0x12a   :  { %v241_v62 = vpop.permute.xlu1 %240 }
 0x12b   :  { %v243_v0 = vmul.f32 %v241_v62, %v235_v63 }
 0x12d   :  { %245 = vrot.lane.b32.xlu2 %v243_v0, %s4517_s1 }
 0x17f   :  { %v283_v10 = vpop.permute.xlu2 %282 }
 0x180   :  { %v4733_v12 = vadd.f32 %v283_v10, %v275_v3 }
 0x182   :  { %3982 = vtanh.f32 %v4733_v12 }
 0x187   :  { %v246_v14 = vpop.permute.xlu2 %245 }
 0x188   :  { %v3983_v15 = vpop.eup %3982  ;;  %v4736_v16 = vadd.f32 %v246_v14, %v238_v13  ;;  %v420_v13 = vrot.slane %v4733_v12, 2 }
 0x189   :  { %288 = vrot.lane.b32.xlu0 %v3983_v15, %s4517_s1 }
 0x18a   :  { %3984 = vtanh.f32 %v4736_v16 }
 0x190   :  { %v3985_v17 = vpop.eup %3984 }
 0x191   :  { %251 = vrot.lane.b32.xlu1 %v3985_v17, %s4517_s1 }
 0x1fb   :  { %v289_v19 = vpop.permute.xlu0 %288 }
 0x1fc   :  { %v4741_v20 = vmul.f32 %v289_v19, %v272_v55  ;;  %v380_v19 = vrot.slane %v4736_v16, 6 }
 0x1fe   :  { %v330_v21 = vrot.slane %v4741_v20, 6 }
 0x200   :  { %331 = vrot.lane.b32.xlu2 %v330_v21, %s4518_s4 }
 0x203   :  { %v252_v22 = vpop.permute.xlu1 %251 }
 0x204   :  { %v254_v24 = vmul.f32 %v252_v22, %v235_v63 }
 0x206   :  { %293 = vrot.lane.b32.xlu0 %v254_v24, %s4518_s4 }
 0x25a   :  { %v332_v25 = vpop.permute.xlu2 %331 }
 0x25b   :  { %3857 = vmatmul.msk.f32.vlgmr.msra.gmra.mxu3 %vm169_vm8, %v332_v25 }
 0x25c   :  { %935 = vmatpush.msra.mxu3 %v4642_v4 }
 0x25e   :  { %936 = vmatpush.msra.mxu3 %v4655_v6 }
 0x260   :  { %937 = vmatpush.msra.mxu3 %v4669_v8 }
 0x262   :  { %938 = vmatpush.msra.mxu3 %v4678_v9 }
 0x278   :  { %v294_v27 = vpop.permute.xlu0 %293 }
 0x279   :  { %297 = vst.msk [vmem:[#allocation2] sm:$0x3] %vm296_vm9, %v294_v27  ;;  %3856 = vmatmul.msk.f32.vlgmr.msra.gmra.mxu2 %vm169_vm8, %v294_v27 }
 0x27a   :  { %906 = vmatpush.msra.mxu2 %v4628_v1 }
 0x27c   :  { %907 = vmatpush.msra.mxu2 %v4633_v2 }
 0x27e   :  { %908 = vmatpush.msra.mxu2 %v4648_v5 }
 0x280   :  { %909 = vmatpush.msra.mxu2 %v4661_v7 }
 0x2de   :  { %v352_v28 = vpop.f32.mrf.mxu3 }
 0x2df   :  { %v356_v29 = vrot.slane %v352_v28, 4 }
 0x2e1   :  { %v358_v30 = vadd.f32 %v356_v29, %v4723_v26 }
 0x2e3   :  { %3986 = vtanh.f32 %v358_v30  ;;  %v3859_v37 = vmul.f32 -1.442695, %v358_v30 }
 0x2e9   :  { %v3987_v32 = vpop.eup %3986 }
 0x2ea   :  { %424 = vrot.lane.b32.xlu1 %v3987_v32, %s4517_s1 }
 0x2fc   :  { %v323_v33 = vpop.f32.mrf.mxu2 }
 0x2fd   :  { %v327_v34 = vrot.slane %v323_v33, 6 }
 0x2ff   :  { %v329_v35 = vadd.f32 %v327_v34, %v4726_v31 }
 0x301   :  { %3988 = vtanh.f32 %v329_v35  ;;  %v3858_v38 = vmul.f32 -1.442695, %v329_v35 }
 0x302   :  { %3990 = vpow2.f32 %v3859_v37 }
 0x303   :  { %3992 = vpow2.f32 %v3858_v38 }
 0x307   :  { %v3989_v36 = vpop.eup %3988 }
 0x308   :  { %384 = vrot.lane.b32.xlu2 %v3989_v36, %s4517_s1  ;;  %v3991_v39 = vpop.eup %3990 }
 0x309   :  { %v402_v40 = vadd.f32 1.0, %v3991_v39  ;;  %v3993_v41 = vpop.eup %3992 }
 0x30a   :  { %v362_v42 = vadd.f32 1.0, %v3993_v41 }
 0x30b   :  { %3994 = vrcp.f32 %v402_v40  ;;  %v414_v51 = vand.u32 2147483648, %v402_v40  ;;  %vm408_vm11 = vweird.f32 %v402_v40  ;;  %v412_v52 = vand.u32 2147483647, %v402_v40 }
 0x30c   :  { %3996 = vrcp.f32 %v362_v42  ;;  %v374_v59 = vand.u32 2147483648, %v362_v42  ;;  %vm368_vm15 = vweird.f32 %v362_v42  ;;  %v372_v61 = vand.u32 2147483647, %v362_v42 }
 0x30d   :  { %v415_v55 = vor.u32 1.1754944e-38, %v414_v51  ;;  %vm413_vm13 = vcmp.eq.f32.partialorder %v412_v52, 8.507059e+37 }
 0x30e   :  { %v375_v63 = vor.u32 1.1754944e-38, %v374_v59  ;;  %vm373_vm1 = vcmp.eq.f32.partialorder %v372_v61, 8.507059e+37 }
 0x311   :  { %v3995_v43 = vpop.eup %3994 }
 0x312   :  { %v404_v44 = vmul.f32 %v3995_v43, %v402_v40  ;;  %v3997_v45 = vpop.eup %3996  ;;  %vm409_vm10 = vweird.f32 %v3995_v43 }
 0x313   :  { %v364_v47 = vmul.f32 %v3997_v45, %v362_v42  ;;  %vm410_vm12 = vmor %vm408_vm11, %vm409_vm10  ;;  %vm369_vm14 = vweird.f32 %v3997_v45 }
 0x314   :  { %v405_v46 = vsub.f32 1.0, %v404_v44  ;;  %vm370_vm0 = vmor %vm368_vm15, %vm369_vm14 }
 0x315   :  { %v365_v49 = vsub.f32 1.0, %v364_v47 }
 0x316   :  { %v406_v48 = vmul.f32 %v3995_v43, %v405_v46 }
 0x317   :  { %v366_v53 = vmul.f32 %v3997_v45, %v365_v49 }
 0x318   :  { %v407_v50 = vadd.f32 %v3995_v43, %v406_v48 }
 0x319   :  { %v367_v56 = vadd.f32 %v3997_v45, %v366_v53 }
 0x31a   :  { %v411_v54 = vsel %vm410_vm12, %v3995_v43, %v407_v50 }
 0x31b   :  { %v416_v57 = vsel %vm413_vm13, %v415_v55, %v411_v54  ;;  %v371_v62 = vsel %vm370_vm0, %v3997_v45, %v367_v56 }
 0x31c   :  { %v376_v3 = vsel %vm373_vm1, %v375_v63, %v371_v62  ;;  %v422_v14 = vmul.f32 %v420_v13, %v416_v57 }
 0x31d   :  { %v382_v21 = vmul.f32 %v380_v19, %v376_v3 }
 0x35c   :  { %v425_v58 = vpop.permute.xlu1 %424 }
 0x35d   :  { %v427_v60 = vmul.f32 %v425_v58, %v416_v57 }
 0x35f   :  { %429 = vrot.lane.b32.xlu0 %v427_v60, %s4517_s1 }
 0x362   :  { %v385_v0 = vpop.permute.xlu2 %384 }
 0x363   :  { %v387_v10 = vmul.f32 %v385_v0, %v376_v3 }
 0x365   :  { %389 = vrot.lane.b32.xlu1 %v387_v10, %s4517_s1 }
 0x3d1   :  { %v430_v15 = vpop.permute.xlu0 %429 }
 0x3d2   :  { %v4764_v17 = vadd.f32 %v430_v15, %v422_v14 }
 0x3d4   :  { %3998 = vtanh.f32 %v4764_v17 }
 0x3d7   :  { %v390_v22 = vpop.permute.xlu1 %389 }
 0x3d8   :  { %v4768_v24 = vadd.f32 %v390_v22, %v382_v21 }
 0x3da   :  { %v3999_v25 = vpop.eup %3998  ;;  %4000 = vtanh.f32 %v4768_v24 }
 0x3db   :  { %435 = vrot.lane.b32.xlu2 %v3999_v25, %s4517_s1  ;;  %v570_v25 = vrot.slane %v4764_v17, 2 }
 0x3e0   :  { %v4001_v27 = vpop.eup %4000 }
 0x3e1   :  { %395 = vrot.lane.b32.xlu0 %v4001_v27, %s4517_s1 }
 0x435   :  { %v436_v12 = vpop.permute.xlu2 %435 }
 0x436   :  { %v4773_v28 = vmul.f32 %v436_v12, %v416_v57 }
 0x438   :  { %v480_v29 = vrot.slane %v4773_v28, 4 }
 0x43a   :  { %481 = vrot.lane.b32.xlu1 %v480_v29, %s4518_s4 }
 0x453   :  { %v396_v16 = vpop.permute.xlu0 %395 }
 0x454   :  { %v4777_v30 = vmul.f32 %v396_v16, %v376_v3 }
 0x456   :  { %v451_v32 = vrot.slane %v4777_v30, 2 }
 0x458   :  { %452 = vrot.lane.b32.xlu2 %v451_v32, %s4518_s4  ;;  %v530_v32 = vrot.slane %v4768_v24, 6 }
 0x4ac   :  { %v482_v33 = vpop.permute.xlu1 %481 }
 0x4ad   :  { %3861 = vmatmul.msk.f32.vlgmr.msra.gmra.mxu1 %vm169_vm8, %v482_v33 }
 0x4ae   :  { %1083 = vmatpush.msra.mxu1 %v4642_v4 }
 0x4b0   :  { %1084 = vmatpush.msra.mxu1 %v4655_v6 }
 0x4b2   :  { %v453_v34 = vpop.permute.xlu2 %452  ;;  %1085 = vmatpush.msra.mxu1 %v4669_v8 }
 0x4b3   :  { %3860 = vmatmul.msk.f32.vlgmr.msra.gmra.mxu0 %vm169_vm8, %v453_v34 }
 0x4b4   :  { %1054 = vmatpush.msra.mxu0 %v4628_v1  ;;  %1086 = vmatpush.msra.mxu1 %v4678_v9 }
 0x4b6   :  { %1055 = vmatpush.msra.mxu0 %v4633_v2 }
 0x4b8   :  { %1056 = vmatpush.msra.mxu0 %v4648_v5 }
 0x4ba   :  { %1057 = vmatpush.msra.mxu0 %v4661_v7 }
 0x52a   :  { %v502_v35 = vpop.f32.mrf.mxu1 }
 0x52b   :  { %v506_v36 = vrot.slane %v502_v35, 6 }
 0x52d   :  { %v508_v37 = vadd.f32 %v506_v36, %v4723_v26 }
 0x52f   :  { %4002 = vtanh.f32 %v508_v37  ;;  %v3863_v43 = vmul.f32 -1.442695, %v508_v37 }
 0x530   :  { %v473_v38 = vpop.f32.mrf.mxu0 }
 0x531   :  { %v477_v39 = vrot.slane %v473_v38, 4 }
 0x533   :  { %v479_v40 = vadd.f32 %v477_v39, %v4726_v31 }
 0x535   :  { %v4003_v41 = vpop.eup %4002  ;;  %4004 = vtanh.f32 %v479_v40  ;;  %v3862_v44 = vmul.f32 -1.442695, %v479_v40 }
 0x536   :  { %574 = vrot.lane.b32.xlu0 %v4003_v41, %s4517_s1  ;;  %4006 = vpow2.f32 %v3863_v43 }
 0x537   :  { %4008 = vpow2.f32 %v3862_v44 }
 0x53b   :  { %v4005_v42 = vpop.eup %4004 }
 0x53c   :  { %534 = vrot.lane.b32.xlu1 %v4005_v42, %s4517_s1  ;;  %v4007_v45 = vpop.eup %4006 }
 0x53d   :  { %v552_v46 = vadd.f32 1.0, %v4007_v45  ;;  %v4009_v47 = vpop.eup %4008 }
 0x53e   :  { %v512_v48 = vadd.f32 1.0, %v4009_v47 }
 0x53f   :  { %4010 = vrcp.f32 %v552_v46  ;;  %v564_v57 = vand.u32 2147483648, %v552_v46  ;;  %vm558_vm3 = vweird.f32 %v552_v46  ;;  %v562_v58 = vand.u32 2147483647, %v552_v46 }
 0x540   :  { %4012 = vrcp.f32 %v512_v48  ;;  %v524_v3 = vand.u32 2147483648, %v512_v48  ;;  %vm518_vm7 = vweird.f32 %v512_v48  ;;  %v522_v13 = vand.u32 2147483647, %v512_v48 }
 0x541   :  { %v565_v61 = vor.u32 1.1754944e-38, %v564_v57  ;;  %vm563_vm5 = vcmp.eq.f32.partialorder %v562_v58, 8.507059e+37 }
 0x542   :  { %v525_v15 = vor.u32 1.1754944e-38, %v524_v3  ;;  %vm523_vm11 = vcmp.eq.f32.partialorder %v522_v13, 8.507059e+37 }
 0x545   :  { %v4011_v49 = vpop.eup %4010 }
 0x546   :  { %v554_v50 = vmul.f32 %v4011_v49, %v552_v46  ;;  %v4013_v51 = vpop.eup %4012  ;;  %vm559_vm2 = vweird.f32 %v4011_v49 }
 0x547   :  { %v514_v53 = vmul.f32 %v4013_v51, %v512_v48  ;;  %vm560_vm4 = vmor %vm558_vm3, %vm559_vm2  ;;  %vm519_vm6 = vweird.f32 %v4013_v51 }
 0x548   :  { %v555_v52 = vsub.f32 1.0, %v554_v50  ;;  %vm520_vm10 = vmor %vm518_vm7, %vm519_vm6 }
 0x549   :  { %v515_v55 = vsub.f32 1.0, %v514_v53 }
 0x54a   :  { %v556_v54 = vmul.f32 %v4011_v49, %v555_v52 }
 0x54b   :  { %v516_v59 = vmul.f32 %v4013_v51, %v515_v55 }
 0x54c   :  { %v557_v56 = vadd.f32 %v4011_v49, %v556_v54 }
 0x54d   :  { %v517_v62 = vadd.f32 %v4013_v51, %v516_v59 }
 0x54e   :  { %v561_v60 = vsel %vm560_vm4, %v4011_v49, %v557_v56 }
 0x54f   :  { %v566_v0 = vsel %vm563_vm5, %v565_v61, %v561_v60  ;;  %v521_v14 = vsel %vm520_vm10, %v4013_v51, %v517_v62 }
 0x550   :  { %v526_v19 = vsel %vm523_vm11, %v525_v15, %v521_v14  ;;  %v572_v27 = vmul.f32 %v570_v25, %v566_v0 }
 0x551   :  { %v532_v33 = vmul.f32 %v530_v32, %v526_v19 }
 0x5a8   :  { %v575_v63 = vpop.permute.xlu0 %574 }
 0x5a9   :  { %v577_v10 = vmul.f32 %v575_v63, %v566_v0 }
 0x5ab   :  { %579 = vrot.lane.b32.xlu2 %v577_v10, %s4517_s1 }
 0x5ae   :  { %v535_v21 = vpop.permute.xlu1 %534 }
 0x5af   :  { %v537_v22 = vmul.f32 %v535_v21, %v526_v19 }
 0x5b1   :  { %539 = vrot.lane.b32.xlu0 %v537_v22, %s4517_s1 }
 0x605   :  { %v580_v12 = vpop.permute.xlu2 %579 }
 0x606   :  { %v4798_v29 = vadd.f32 %v580_v12, %v572_v27 }
 0x608   :  { %4014 = vtanh.f32 %v4798_v29 }
 0x60e   :  { %v4015_v16 = vpop.eup %4014 }
 0x60f   :  { %585 = vrot.lane.b32.xlu1 %v4015_v16, %s4517_s1 }
 0x623   :  { %v540_v34 = vpop.permute.xlu0 %539 }
 0x624   :  { %v4803_v35 = vadd.f32 %v540_v34, %v532_v33 }
 0x626   :  { %4016 = vtanh.f32 %v4803_v35  ;;  %v677_v27 = vrot.slane %v4803_v35, 6 }
 0x62c   :  { %v4017_v36 = vpop.eup %4016 }
 0x62d   :  { %545 = vrot.lane.b32.xlu2 %v4017_v36, %s4517_s1 }
 0x681   :  { %v586_v17 = vpop.permute.xlu1 %585 }
 0x682   :  { %v4807_v37 = vmul.f32 %v586_v17, %v566_v0 }
 0x684   :  { %v630_v38 = vrot.slane %v4807_v37, 2 }
 0x686   :  { %631 = vrot.lane.b32.xlu0 %v630_v38, %s4518_s4 }
 0x687   :  { %v546_v39 = vpop.permute.xlu2 %545 }
 0x688   :  { %v4811_v40 = vmul.f32 %v546_v39, %v526_v19  ;;  %v717_v19 = vrot.slane %v4798_v29, 2 }
 0x68a   :  { %v601_v24 = vrot.slane %v4811_v40, 4 }
 0x68c   :  { %602 = vrot.lane.b32.xlu1 %v601_v24, %s4518_s4 }
 0x6f8   :  { %v632_v41 = vpop.permute.xlu0 %631 }
 0x6f9   :  { %3865 = vmatmul.msk.f32.vlgmr.msrb.gmra.mxu3 %vm169_vm8, %v632_v41 }
 0x6fa   :  { %1231 = vmatpush.msrb.mxu3 %v4642_v4 }
 0x6fc   :  { %1232 = vmatpush.msrb.mxu3 %v4655_v6 }
 0x6fe   :  { %v603_v42 = vpop.permute.xlu1 %602  ;;  %1233 = vmatpush.msrb.mxu3 %v4669_v8 }
 0x6ff   :  { %3864 = vmatmul.msk.f32.vlgmr.msrb.gmra.mxu2 %vm169_vm8, %v603_v42 }
 0x700   :  { %1234 = vmatpush.msrb.mxu3 %v4678_v9  ;;  %1202 = vmatpush.msrb.mxu2 %v4628_v1 }
 0x702   :  { %1203 = vmatpush.msrb.mxu2 %v4633_v2 }
 0x704   :  { %1204 = vmatpush.msrb.mxu2 %v4648_v5 }
 0x706   :  { %1205 = vmatpush.msrb.mxu2 %v4661_v7 }
 0x77c   :  { %v652_v43 = vpop.f32.mrf.mxu3 }
 0x77d   :  { %v655_v4 = vadd.f32 %v652_v43, %v4723_v26 }
 0x77f   :  { %4018 = vtanh.f32 %v655_v4  ;;  %v3867_v1 = vmul.f32 -1.442695, %v655_v4 }
 0x782   :  { %v623_v6 = vpop.f32.mrf.mxu2 }
 0x783   :  { %v627_v44 = vrot.slane %v623_v6, 2 }
 0x785   :  { %v4019_v45 = vpop.eup %4018  ;;  %v629_v8 = vadd.f32 %v627_v44, %v4726_v31 }
 0x786   :  { %721 = vrot.lane.b32.xlu2 %v4019_v45, %s4517_s1 }
 0x787   :  { %4020 = vtanh.f32 %v629_v8  ;;  %v3866_v47 = vmul.f32 -1.442695, %v629_v8 }
 0x788   :  { %4022 = vpow2.f32 %v3867_v1 }
 0x78d   :  { %v4021_v9 = vpop.eup %4020 }
 0x78e   :  { %681 = vrot.lane.b32.xlu0 %v4021_v9, %s4517_s1  ;;  %v4023_v2 = vpop.eup %4022 }
 0x78f   :  { %v699_v5 = vadd.f32 1.0, %v4023_v2 }
 0x791   :  { %4024 = vrcp.f32 %v699_v5  ;;  %v711_v31 = vand.u32 2147483648, %v699_v5  ;;  %vm705_vm13 = vweird.f32 %v699_v5  ;;  %v709_v50 = vand.u32 2147483647, %v699_v5 }
 0x792   :  { %4026 = vpow2.f32 %v3866_v47 }
 0x793   :  { %v712_v53 = vor.u32 1.1754944e-38, %v711_v31  ;;  %vm710_vm15 = vcmp.eq.f32.partialorder %v709_v50, 8.507059e+37 }
 0x797   :  { %v4025_v7 = vpop.eup %4024 }
 0x798   :  { %v701_v46 = vmul.f32 %v4025_v7, %v699_v5  ;;  %vm706_vm12 = vweird.f32 %v4025_v7  ;;  %v4027_v51 = vpop.eup %4026 }
 0x799   :  { %vm707_vm14 = vmor %vm705_vm13, %vm706_vm12  ;;  %v659_v54 = vadd.f32 1.0, %v4027_v51 }
 0x79a   :  { %v702_v26 = vsub.f32 1.0, %v701_v46 }
 0x79b   :  { %4028 = vrcp.f32 %v659_v54  ;;  %v671_v63 = vand.u32 2147483648, %v659_v54  ;;  %vm665_vm1 = vweird.f32 %v659_v54  ;;  %v669_v0 = vand.u32 2147483647, %v659_v54 }
 0x79c   :  { %v703_v48 = vmul.f32 %v4025_v7, %v702_v26 }
 0x79d   :  { %v672_v10 = vor.u32 1.1754944e-38, %v671_v63  ;;  %vm670_vm3 = vcmp.eq.f32.partialorder %v669_v0, 8.507059e+37 }
 0x79e   :  { %v704_v49 = vadd.f32 %v4025_v7, %v703_v48 }
 0x7a0   :  { %v708_v52 = vsel %vm707_vm14, %v4025_v7, %v704_v49 }
 0x7a1   :  { %v713_v56 = vsel %vm710_vm15, %v712_v53, %v708_v52  ;;  %v4029_v58 = vpop.eup %4028 }
 0x7a2   :  { %v661_v59 = vmul.f32 %v4029_v58, %v659_v54  ;;  %vm666_vm0 = vweird.f32 %v4029_v58  ;;  %v719_v21 = vmul.f32 %v717_v19, %v713_v56 }
 0x7a3   :  { %vm667_vm2 = vmor %vm665_vm1, %vm666_vm0 }
 0x7a4   :  { %v662_v60 = vsub.f32 1.0, %v661_v59 }
 0x7a6   :  { %v663_v61 = vmul.f32 %v4029_v58, %v662_v60 }
 0x7a8   :  { %v664_v62 = vadd.f32 %v4029_v58, %v663_v61 }
 0x7aa   :  { %v668_v3 = vsel %vm667_vm2, %v4029_v58, %v664_v62 }
 0x7ab   :  { %v673_v14 = vsel %vm670_vm3, %v672_v10, %v668_v3 }
 0x7ac   :  { %v679_v12 = vmul.f32 %v677_v27, %v673_v14 }
 0x7e0   :  { %v722_v55 = vpop.permute.xlu2 %721 }
 0x7e1   :  { %v724_v57 = vmul.f32 %v722_v55, %v713_v56 }
 0x7e3   :  { %726 = vrot.lane.b32.xlu1 %v724_v57, %s4517_s1 }
 0x800   :  { %v682_v13 = vpop.permute.xlu0 %681 }
 0x801   :  { %v684_v15 = vmul.f32 %v682_v13, %v673_v14 }
 0x803   :  { %686 = vrot.lane.b32.xlu2 %v684_v15, %s4517_s1 }
 0x855   :  { %v727_v22 = vpop.permute.xlu1 %726 }
 0x856   :  { %v4832_v25 = vadd.f32 %v727_v22, %v719_v21 }
 0x858   :  { %4030 = vtanh.f32 %v4832_v25 }
 0x85d   :  { %v687_v16 = vpop.permute.xlu2 %686 }
 0x85e   :  { %v4031_v32 = vpop.eup %4030  ;;  %v4836_v33 = vadd.f32 %v687_v16, %v679_v12 }
 0x85f   :  { %732 = vrot.lane.b32.xlu0 %v4031_v32, %s4517_s1 }
 0x860   :  { %4032 = vtanh.f32 %v4836_v33  ;;  %v823_v22 = vrot.slane %v4836_v33, 6 }
 0x866   :  { %v4033_v34 = vpop.eup %4032 }
 0x867   :  { %692 = vrot.lane.b32.xlu1 %v4033_v34, %s4517_s1 }
 0x8d1   :  { %v733_v29 = vpop.permute.xlu0 %732 }
 0x8d2   :  { %v4841_v36 = vmul.f32 %v733_v29, %v713_v56 }
 0x8d4   :  { %774 = vrot.lane.b32.xlu2 %v4841_v36, %s4518_s4 }
 0x8d9   :  { %v693_v17 = vpop.permute.xlu1 %692 }
 0x8da   :  { %v4845_v35 = vmul.f32 %v693_v17, %v673_v14  ;;  %v863_v14 = vrot.slane %v4832_v25, 2 }
 0x8dc   :  { %v748_v38 = vrot.slane %v4845_v35, 6 }
 0x8de   :  { %749 = vrot.lane.b32.xlu0 %v748_v38, %s4518_s4 }
 0x92e   :  { %v775_v39 = vpop.permute.xlu2 %774 }
 0x92f   :  { %3869 = vmatmul.msk.f32.vlgmr.msrb.gmra.mxu1 %vm169_vm8, %v775_v39 }
 0x950   :  { %v750_v24 = vpop.permute.xlu0 %749 }
 0x951   :  { %3868 = vmatmul.msk.f32.vlgmr.msrb.gmra.mxu0 %vm169_vm8, %v750_v24 }
 0x9ac   :  { %v795_v41 = vpop.f32.mrf.mxu1 }
 0x9ad   :  { %v799_v42 = vrot.slane %v795_v41, 2 }
 0x9af   :  { %v801_v43 = vadd.f32 %v799_v42, %v4721_v23 }
 0x9b1   :  { %4034 = vtanh.f32 %v801_v43  ;;  %v3871_v8 = vmul.f32 -1.442695, %v801_v43 }
 0x9b7   :  { %v4035_v4 = vpop.eup %4034 }
 0x9b8   :  { %867 = vrot.lane.b32.xlu1 %v4035_v4, %s4517_s1 }
 0x9ce   :  { %v770_v6 = vpop.f32.mrf.mxu0 }
 0x9cf   :  { %v773_v44 = vadd.f32 %v770_v6, %v4719_v18 }
 0x9d1   :  { %4036 = vtanh.f32 %v773_v44  ;;  %v3870_v9 = vmul.f32 -1.442695, %v773_v44 }
 0x9d2   :  { %4038 = vpow2.f32 %v3871_v8 }
 0x9d3   :  { %4040 = vpow2.f32 %v3870_v9 }
 0x9d7   :  { %v4037_v45 = vpop.eup %4036 }
 0x9d8   :  { %827 = vrot.lane.b32.xlu2 %v4037_v45, %s4517_s1  ;;  %v4039_v1 = vpop.eup %4038 }
 0x9d9   :  { %v845_v2 = vadd.f32 1.0, %v4039_v1  ;;  %v4041_v5 = vpop.eup %4040 }
 0x9da   :  { %v805_v7 = vadd.f32 1.0, %v4041_v5 }
 0x9db   :  { %4042 = vrcp.f32 %v845_v2  ;;  %v857_v52 = vand.u32 2147483648, %v845_v2  ;;  %vm851_vm5 = vweird.f32 %v845_v2  ;;  %v855_v53 = vand.u32 2147483647, %v845_v2 }
 0x9dc   :  { %4044 = vrcp.f32 %v805_v7  ;;  %v817_v61 = vand.u32 2147483648, %v805_v7  ;;  %vm811_vm11 = vweird.f32 %v805_v7  ;;  %v815_v62 = vand.u32 2147483647, %v805_v7 }
 0x9dd   :  { %v858_v56 = vor.u32 1.1754944e-38, %v857_v52  ;;  %vm856_vm7 = vcmp.eq.f32.partialorder %v855_v53, 8.507059e+37 }
 0x9de   :  { %v818_v0 = vor.u32 1.1754944e-38, %v817_v61  ;;  %vm816_vm13 = vcmp.eq.f32.partialorder %v815_v62, 8.507059e+37 }
 0x9e1   :  { %v4043_v46 = vpop.eup %4042 }
 0x9e2   :  { %v847_v26 = vmul.f32 %v4043_v46, %v845_v2  ;;  %v4045_v48 = vpop.eup %4044  ;;  %vm852_vm4 = vweird.f32 %v4043_v46 }
 0x9e3   :  { %v807_v31 = vmul.f32 %v4045_v48, %v805_v7  ;;  %vm853_vm6 = vmor %vm851_vm5, %vm852_vm4  ;;  %vm812_vm10 = vweird.f32 %v4045_v48 }
 0x9e4   :  { %v848_v47 = vsub.f32 1.0, %v847_v26  ;;  %vm813_vm12 = vmor %vm811_vm11, %vm812_vm10 }
 0x9e5   :  { %v808_v51 = vsub.f32 1.0, %v807_v31 }
 0x9e6   :  { %v849_v49 = vmul.f32 %v4043_v46, %v848_v47 }
 0x9e7   :  { %v809_v55 = vmul.f32 %v4045_v48, %v808_v51 }
 0x9e8   :  { %v850_v50 = vadd.f32 %v4043_v46, %v849_v49 }
 0x9e9   :  { %v810_v60 = vadd.f32 %v4045_v48, %v809_v55 }
 0x9ea   :  { %v854_v54 = vsel %vm853_vm6, %v4043_v46, %v850_v50 }
 0x9eb   :  { %v859_v57 = vsel %vm856_vm7, %v858_v56, %v854_v54  ;;  %v814_v63 = vsel %vm813_vm12, %v4045_v48, %v810_v60 }
 0x9ec   :  { %v819_v10 = vsel %vm816_vm13, %v818_v0, %v814_v63  ;;  %v865_v15 = vmul.f32 %v863_v14, %v859_v57 }
 0x9ed   :  { %v825_v27 = vmul.f32 %v823_v22, %v819_v10 }
 0xa2a   :  { %v868_v58 = vpop.permute.xlu1 %867 }
 0xa2b   :  { %v870_v59 = vmul.f32 %v868_v58, %v859_v57 }
 0xa2d   :  { %872 = vrot.lane.b32.xlu0 %v870_v59, %s4517_s1 }
 0xa32   :  { %v828_v3 = vpop.permute.xlu2 %827 }
 0xa33   :  { %v830_v13 = vmul.f32 %v828_v3, %v819_v10 }
 0xa35   :  { %832 = vrot.lane.b32.xlu1 %v830_v13, %s4517_s1 }
 0xa9f   :  { %v873_v19 = vpop.permute.xlu0 %872 }
 0xaa0   :  { %v4858_v21 = vadd.f32 %v873_v19, %v865_v15 }
 0xaa2   :  { %4046 = vtanh.f32 %v4858_v21  ;;  %v1008_v15 = vrot.slane %v4858_v21, 2 }
 0xaa7   :  { %v833_v12 = vpop.permute.xlu1 %832 }
 0xaa8   :  { %v4047_v16 = vpop.eup %4046  ;;  %v4862_v32 = vadd.f32 %v833_v12, %v825_v27 }
 0xaa9   :  { %878 = vrot.lane.b32.xlu2 %v4047_v16, %s4517_s1 }
 0xaaa   :  { %4048 = vtanh.f32 %v4862_v32  ;;  %v968_v16 = vrot.slane %v4862_v32, 6 }
 0xab0   :  { %v4049_v34 = vpop.eup %4048 }
 0xab1   :  { %838 = vrot.lane.b32.xlu0 %v4049_v34, %s4517_s1 }
 0xb03   :  { %v879_v25 = vpop.permute.xlu2 %878 }
 0xb04   :  { %v4867_v29 = vmul.f32 %v879_v25, %v859_v57 }
 0xb06   :  { %v918_v17 = vrot.slane %v4867_v29, 6 }
 0xb08   :  { %919 = vrot.lane.b32.xlu1 %v918_v17, %s4518_s4 }
 0xb23   :  { %v839_v33 = vpop.permute.xlu0 %838 }
 0xb24   :  { %v841_v38 = vmul.f32 %v839_v33, %v819_v10 }
 0xb26   :  { %883 = vrot.lane.b32.xlu2 %v841_v38, %s4518_s4 }
 0xb7a   :  { %v920_v39 = vpop.permute.xlu1 %919 }
 0xb7b   :  { %3873 = vmatmul.msk.f32.vlgmr.msra.gmra.mxu3 %vm169_vm8, %v920_v39 }
 0xb80   :  { %v4873_v24 = vpop.permute.xlu2 %883 }
 0xb81   :  { %3872 = vmatmul.msk.f32.vlgmr.msra.gmra.mxu2 %vm169_vm8, %v4873_v24 }
 0xbfe   :  { %v940_v41 = vpop.f32.mrf.mxu3 }
 0xbff   :  { %v944_v42 = vrot.slane %v940_v41, 4 }
 0xc01   :  { %v946_v43 = vadd.f32 %v944_v42, %v4721_v23 }
 0xc03   :  { %4050 = vtanh.f32 %v946_v43  ;;  %v3875_v9 = vmul.f32 -1.442695, %v946_v43 }
 0xc04   :  { %v911_v4 = vpop.f32.mrf.mxu2 }
 0xc05   :  { %v915_v6 = vrot.slane %v911_v4, 6 }
 0xc07   :  { %v917_v44 = vadd.f32 %v915_v6, %v4719_v18 }
 0xc09   :  { %v4051_v45 = vpop.eup %4050  ;;  %4052 = vtanh.f32 %v917_v44  ;;  %v3874_v1 = vmul.f32 -1.442695, %v917_v44 }
 0xc0a   :  { %1012 = vrot.lane.b32.xlu0 %v4051_v45, %s4517_s1  ;;  %4054 = vpow2.f32 %v3875_v9 }
 0xc0b   :  { %4056 = vpow2.f32 %v3874_v1 }
 0xc0f   :  { %v4053_v8 = vpop.eup %4052 }
 0xc10   :  { %972 = vrot.lane.b32.xlu1 %v4053_v8, %s4517_s1  ;;  %v4055_v2 = vpop.eup %4054 }
 0xc11   :  { %v990_v5 = vadd.f32 1.0, %v4055_v2  ;;  %v4057_v7 = vpop.eup %4056 }
 0xc12   :  { %v950_v46 = vadd.f32 1.0, %v4057_v7 }
 0xc13   :  { %4058 = vrcp.f32 %v990_v5  ;;  %v1002_v53 = vand.u32 2147483648, %v990_v5  ;;  %vm996_vm15 = vweird.f32 %v990_v5  ;;  %v1000_v54 = vand.u32 2147483647, %v990_v5 }
 0xc14   :  { %4060 = vrcp.f32 %v950_v46  ;;  %v962_v61 = vand.u32 2147483648, %v950_v46  ;;  %vm956_vm3 = vweird.f32 %v950_v46  ;;  %v960_v63 = vand.u32 2147483647, %v950_v46 }
 0xc15   :  { %v1003_v57 = vor.u32 1.1754944e-38, %v1002_v53  ;;  %vm1001_vm1 = vcmp.eq.f32.partialorder %v1000_v54, 8.507059e+37 }
 0xc16   :  { %v963_v3 = vor.u32 1.1754944e-38, %v962_v61  ;;  %vm961_vm5 = vcmp.eq.f32.partialorder %v960_v63, 8.507059e+37 }
 0xc19   :  { %v4059_v26 = vpop.eup %4058 }
 0xc1a   :  { %v992_v47 = vmul.f32 %v4059_v26, %v990_v5  ;;  %v4061_v48 = vpop.eup %4060  ;;  %vm997_vm14 = vweird.f32 %v4059_v26 }
 0xc1b   :  { %v952_v31 = vmul.f32 %v4061_v48, %v950_v46  ;;  %vm998_vm0 = vmor %vm996_vm15, %vm997_vm14  ;;  %vm957_vm2 = vweird.f32 %v4061_v48 }
 0xc1c   :  { %v993_v49 = vsub.f32 1.0, %v992_v47  ;;  %vm958_vm4 = vmor %vm956_vm3, %vm957_vm2 }
 0xc1d   :  { %v953_v51 = vsub.f32 1.0, %v952_v31 }
 0xc1e   :  { %v994_v50 = vmul.f32 %v4059_v26, %v993_v49 }
 0xc1f   :  { %v954_v55 = vmul.f32 %v4061_v48, %v953_v51 }
 0xc20   :  { %v995_v52 = vadd.f32 %v4059_v26, %v994_v50 }
 0xc21   :  { %v955_v58 = vadd.f32 %v4061_v48, %v954_v55 }
 0xc22   :  { %v999_v56 = vsel %vm998_vm0, %v4059_v26, %v995_v52 }
 0xc23   :  { %v1004_v60 = vsel %vm1001_vm1, %v1003_v57, %v999_v56  ;;  %v959_v0 = vsel %vm958_vm4, %v4061_v48, %v955_v58 }
 0xc24   :  { %v964_v10 = vsel %vm961_vm5, %v963_v3, %v959_v0  ;;  %v1010_v19 = vmul.f32 %v1008_v15, %v1004_v60 }
 0xc25   :  { %v970_v34 = vmul.f32 %v968_v16, %v964_v10 }
 0xc7c   :  { %v1013_v59 = vpop.permute.xlu0 %1012 }
 0xc7d   :  { %v1015_v62 = vmul.f32 %v1013_v59, %v1004_v60 }
 0xc7f   :  { %1017 = vrot.lane.b32.xlu2 %v1015_v62, %s4517_s1 }
 0xc82   :  { %v973_v13 = vpop.permute.xlu1 %972 }
 0xc83   :  { %v975_v14 = vmul.f32 %v973_v13, %v964_v10 }
 0xc85   :  { %977 = vrot.lane.b32.xlu0 %v975_v14, %s4517_s1 }
 0xcd9   :  { %v1018_v22 = vpop.permute.xlu2 %1017 }
 0xcda   :  { %v4884_v27 = vadd.f32 %v1018_v22, %v1010_v19 }
 0xcdc   :  { %4062 = vtanh.f32 %v4884_v27  ;;  %v1156_v16 = vrot.slane %v4884_v27, 2 }
 0xce2   :  { %v4063_v12 = vpop.eup %4062 }
 0xce3   :  { %1023 = vrot.lane.b32.xlu1 %v4063_v12, %s4517_s1 }
 0xcf7   :  { %v978_v25 = vpop.permute.xlu0 %977 }
 0xcf8   :  { %v4889_v17 = vadd.f32 %v978_v25, %v970_v34 }
 0xcfa   :  { %4064 = vtanh.f32 %v4889_v17 }
 0xd00   :  { %v4065_v33 = vpop.eup %4064 }
 0xd01   :  { %983 = vrot.lane.b32.xlu2 %v4065_v33, %s4517_s1 }
 0xd55   :  { %v1024_v21 = vpop.permute.xlu1 %1023 }
 0xd56   :  { %v4893_v38 = vmul.f32 %v1024_v21, %v1004_v60  ;;  %v1116_v21 = vrot.slane %v4889_v17, 6 }
 0xd58   :  { %v1066_v39 = vrot.slane %v4893_v38, 4 }
 0xd5a   :  { %1067 = vrot.lane.b32.xlu0 %v1066_v39, %s4518_s4 }
 0xd5b   :  { %v984_v41 = vpop.permute.xlu2 %983 }
 0xd5c   :  { %v4897_v42 = vmul.f32 %v984_v41, %v964_v10 }
 0xd5e   :  { %v1037_v32 = vrot.slane %v4897_v42, 2 }
 0xd60   :  { %1038 = vrot.lane.b32.xlu1 %v1037_v32, %s4518_s4 }
 0xdcc   :  { %v1068_v43 = vpop.permute.xlu0 %1067 }
 0xdcd   :  { %3877 = vmatmul.msk.f32.vlgmr.msra.gmra.mxu1 %vm169_vm8, %v1068_v43 }
 0xdd2   :  { %v1039_v4 = vpop.permute.xlu1 %1038 }
 0xdd3   :  { %3876 = vmatmul.msk.f32.vlgmr.msra.gmra.mxu0 %vm169_vm8, %v1039_v4 }
 0xe4a   :  { %v1088_v6 = vpop.f32.mrf.mxu1 }
 0xe4b   :  { %v1092_v44 = vrot.slane %v1088_v6, 6 }
 0xe4d   :  { %v1094_v45 = vadd.f32 %v1092_v44, %v4721_v23 }
 0xe4f   :  { %4066 = vtanh.f32 %v1094_v45  ;;  %v3879_v7 = vmul.f32 -1.442695, %v1094_v45 }
 0xe50   :  { %v1059_v8 = vpop.f32.mrf.mxu0 }
 0xe51   :  { %v1063_v9 = vrot.slane %v1059_v8, 4 }
 0xe53   :  { %v1065_v1 = vadd.f32 %v1063_v9, %v4719_v18 }
 0xe55   :  { %v4067_v2 = vpop.eup %4066  ;;  %4068 = vtanh.f32 %v1065_v1  ;;  %v3878_v49 = vmul.f32 -1.442695, %v1065_v1 }
 0xe56   :  { %1160 = vrot.lane.b32.xlu2 %v4067_v2, %s4517_s1  ;;  %4070 = vpow2.f32 %v3879_v7 }
 0xe5b   :  { %v4069_v5 = vpop.eup %4068 }
 0xe5c   :  { %1120 = vrot.lane.b32.xlu0 %v4069_v5, %s4517_s1  ;;  %v4071_v46 = vpop.eup %4070 }
 0xe5d   :  { %v1138_v26 = vadd.f32 1.0, %v4071_v46 }
 0xe5f   :  { %4072 = vrcp.f32 %v1138_v26  ;;  %v1150_v52 = vand.u32 2147483648, %v1138_v26  ;;  %vm1144_vm7 = vweird.f32 %v1138_v26  ;;  %v1148_v54 = vand.u32 2147483647, %v1138_v26 }
 0xe60   :  { %4074 = vpow2.f32 %v3878_v49 }
 0xe61   :  { %v1151_v57 = vor.u32 1.1754944e-38, %v1150_v52  ;;  %vm1149_vm11 = vcmp.eq.f32.partialorder %v1148_v54, 8.507059e+37 }
 0xe65   :  { %v4073_v47 = vpop.eup %4072 }
 0xe66   :  { %v1140_v48 = vmul.f32 %v4073_v47, %v1138_v26  ;;  %vm1145_vm6 = vweird.f32 %v4073_v47  ;;  %v4075_v53 = vpop.eup %4074 }
 0xe67   :  { %vm1146_vm10 = vmor %vm1144_vm7, %vm1145_vm6  ;;  %v1098_v56 = vadd.f32 1.0, %v4075_v53 }
 0xe68   :  { %v1141_v31 = vsub.f32 1.0, %v1140_v48 }
 0xe69   :  { %4076 = vrcp.f32 %v1098_v56  ;;  %v1110_v10 = vand.u32 2147483648, %v1098_v56  ;;  %vm1104_vm13 = vweird.f32 %v1098_v56  ;;  %v1108_v13 = vand.u32 2147483647, %v1098_v56 }
 0xe6a   :  { %v1142_v50 = vmul.f32 %v4073_v47, %v1141_v31 }
 0xe6b   :  { %v1111_v15 = vor.u32 1.1754944e-38, %v1110_v10  ;;  %vm1109_vm15 = vcmp.eq.f32.partialorder %v1108_v13, 8.507059e+37 }
 0xe6c   :  { %v1143_v51 = vadd.f32 %v4073_v47, %v1142_v50 }
 0xe6e   :  { %v1147_v55 = vsel %vm1146_vm10, %v4073_v47, %v1143_v51  ;;  %vm443_vm10 = vcmask 257026  }
 0xe6f   :  { %v1152_v59 = vsel %vm1149_vm11, %v1151_v57, %v1147_v55  ;;  %v4077_v61 = vpop.eup %4076  ;;  %vm599_vm11 = vcmask 519426  }
 0xe70   :  { %v1100_v62 = vmul.f32 %v4077_v61, %v1098_v56  ;;  %vm1105_vm12 = vweird.f32 %v4077_v61  ;;  %v1158_v34 = vmul.f32 %v1156_v16, %v1152_v59 }
 0xe71   :  { %vm1106_vm14 = vmor %vm1104_vm13, %vm1105_vm12  ;;  %vm593_vm12 = vcmask 259076   ;;  %vm449_vm13 = vcmask 521476  }
 0xe72   :  { %v1101_v63 = vsub.f32 1.0, %v1100_v62 }
 0xe74   :  { %v1102_v0 = vmul.f32 %v4077_v61, %v1101_v63 }
 0xe76   :  { %v1103_v3 = vadd.f32 %v4077_v61, %v1102_v0 }
 0xe78   :  { %v1107_v14 = vsel %vm1106_vm14, %v4077_v61, %v1103_v3  ;;  %vm302_vm14 = vcmask 523526  }
 0xe79   :  { %v1112_v22 = vsel %vm1109_vm15, %v1111_v15, %v1107_v14  ;;  %vm746_vm15 = vcmask 517376  }
 0xe7a   :  { %v1118_v39 = vmul.f32 %v1116_v21, %v1112_v22 }
 0xeb0   :  { %v1161_v58 = vpop.permute.xlu2 %1160 }
 0xeb1   :  { %v1163_v60 = vmul.f32 %v1161_v58, %v1152_v59 }
 0xeb3   :  { %1165 = vrot.lane.b32.xlu1 %v1163_v60, %s4517_s1 }
 0xece   :  { %v1121_v19 = vpop.permute.xlu0 %1120 }
 0xecf   :  { %v1123_v12 = vmul.f32 %v1121_v19, %v1112_v22 }
 0xed1   :  { %1125 = vrot.lane.b32.xlu2 %v1123_v12, %s4517_s1 }
 0xf25   :  { %v1166_v25 = vpop.permute.xlu1 %1165 }
 0xf26   :  { %v4910_v33 = vadd.f32 %v1166_v25, %v1158_v34 }
 0xf28   :  { %4078 = vtanh.f32 %v4910_v33  ;;  %v1301_v21 = vrot.slane %v4910_v33, 2 }
 0xf2b   :  { %v1126_v41 = vpop.permute.xlu2 %1125 }
 0xf2c   :  { %v4914_v32 = vadd.f32 %v1126_v41, %v1118_v39 }
 0xf2e   :  { %v4079_v43 = vpop.eup %4078  ;;  %4080 = vtanh.f32 %v4914_v32 }
 0xf2f   :  { %1171 = vrot.lane.b32.xlu0 %v4079_v43, %s4517_s1 }
 0xf34   :  { %v4081_v4 = vpop.eup %4080 }
 0xf35   :  { %1131 = vrot.lane.b32.xlu1 %v4081_v4, %s4517_s1  ;;  %v1261_v4 = vrot.slane %v4914_v32, 6 }
 0xfa1   :  { %v1172_v27 = vpop.permute.xlu0 %1171 }
 0xfa2   :  { %v4919_v6 = vmul.f32 %v1172_v27, %v1152_v59 }
 0xfa4   :  { %v1214_v44 = vrot.slane %v4919_v6, 2 }
 0xfa6   :  { %1215 = vrot.lane.b32.xlu2 %v1214_v44, %s4518_s4 }
 0xfa7   :  { %v1132_v17 = vpop.permute.xlu1 %1131 }
 0xfa8   :  { %v4923_v45 = vmul.f32 %v1132_v17, %v1112_v22 }
 0xfaa   :  { %v1185_v8 = vrot.slane %v4923_v45, 4 }
 0xfac   :  { %1186 = vrot.lane.b32.xlu0 %v1185_v8, %s4518_s4 }
0x1000   :  { %v1216_v9 = vpop.permute.xlu2 %1215 }
0x1001   :  { %3881 = vmatmul.msk.f32.vlgmr.msrb.gmra.mxu3 %vm169_vm8, %v1216_v9  ;;  %v1345_v9 = vld [vmem:[#allocation3 + $0x78] sm:$0xff] }
0x1002   :  { %1392 = vmatpush.msrb.mxu1 %v1345_v9 }
0x101e   :  { %v1187_v1 = vpop.permute.xlu0 %1186 }
0x101f   :  { %3880 = vmatmul.msk.f32.vlgmr.msrb.gmra.mxu2 %vm169_vm8, %v1187_v1  ;;  %v1342_v1 = vld [vmem:[#allocation3 + $0x60] sm:$0xff] }
0x1084   :  { %v1236_v2 = vpop.f32.mrf.mxu3 }
0x1085   :  { %v1239_v5 = vadd.f32 %v1236_v2, %v4721_v23  ;;  %v1340_v2 = vld [vmem:[#allocation3 + $0x50] sm:$0xff] }
0x1087   :  { %4082 = vtanh.f32 %v1239_v5  ;;  %v3883_v49 = vmul.f32 -1.442695, %v1239_v5  ;;  %v1341_v5 = vld [vmem:[#allocation3 + $0x58] sm:$0xff] }
0x108d   :  { %v4083_v7 = vpop.eup %4082 }
0x108e   :  { %1305 = vrot.lane.b32.xlu1 %v4083_v7, %s4517_s1  ;;  %v4976_v7 = vld [vmem:[%s5718_s6 + $0x18] sm:$0xff] }
0x108f   :  { %1427 = vmatpush.msra.mxu2 %v4976_v7 }
0x10a2   :  { %v1207_v46 = vpop.f32.mrf.mxu2 }
0x10a3   :  { %v1211_v26 = vrot.slane %v1207_v46, 2  ;;  %v4981_v46 = vld [vmem:[%s5718_s6 + $0x10] sm:$0xff] }
0x10a4   :  { %1428 = vmatpush.msra.mxu2 %v4981_v46 }
0x10a5   :  { %v1213_v47 = vadd.f32 %v1211_v26, %v4719_v18  ;;  %v1339_v26 = vld [vmem:[#allocation3 + $0x48] sm:$0xff] }
0x10a7   :  { %4084 = vtanh.f32 %v1213_v47  ;;  %v3882_v31 = vmul.f32 -1.442695, %v1213_v47 }
0x10a8   :  { %4086 = vpow2.f32 %v3883_v49 }
0x10a9   :  { %4088 = vpow2.f32 %v3882_v31 }
0x10ad   :  { %v4085_v48 = vpop.eup %4084 }
0x10ae   :  { %1265 = vrot.lane.b32.xlu2 %v4085_v48, %s4517_s1  ;;  %v4087_v50 = vpop.eup %4086 }
0x10af   :  { %v1283_v51 = vadd.f32 1.0, %v4087_v50  ;;  %v4089_v23 = vpop.eup %4088  ;;  %v1336_v50 = vld [vmem:[#allocation3 + $0x30] sm:$0xff] }
0x10b0   :  { %v1243_v52 = vadd.f32 1.0, %v4089_v23  ;;  %v4993_v23 = vld [vmem:[%s5718_s6 + $0x8] sm:$0xff] }
0x10b1   :  { %4090 = vrcp.f32 %v1283_v51  ;;  %v1295_v60 = vand.u32 2147483648, %v1283_v51  ;;  %vm1289_vm1 = vweird.f32 %v1283_v51  ;;  %v1293_v61 = vand.u32 2147483647, %v1283_v51  ;;  %1429 = vmatpush.msra.mxu2 %v4993_v23 }
0x10b2   :  { %4092 = vrcp.f32 %v1243_v52  ;;  %v1255_v15 = vand.u32 2147483648, %v1243_v52  ;;  %vm1249_vm5 = vweird.f32 %v1243_v52  ;;  %v1253_v19 = vand.u32 2147483647, %v1243_v52 }
0x10b3   :  { %v1296_v0 = vor.u32 1.1754944e-38, %v1295_v60  ;;  %vm1294_vm3 = vcmp.eq.f32.partialorder %v1293_v61, 8.507059e+37  ;;  %v1331_v60 = vld [vmem:[#allocation3 + $0x8] sm:$0xff]  ;;  %v5013_v61 = vld [vmem:[#allocation6] sm:$0xff] }
0x10b4   :  { %v1256_v12 = vor.u32 1.1754944e-38, %v1255_v15  ;;  %vm1254_vm7 = vcmp.eq.f32.partialorder %v1253_v19, 8.507059e+37 }
0x10b7   :  { %v4091_v53 = vpop.eup %4090 }
0x10b8   :  { %v1285_v54 = vmul.f32 %v4091_v53, %v1283_v51  ;;  %v4093_v56 = vpop.eup %4092  ;;  %vm1290_vm0 = vweird.f32 %v4091_v53  ;;  %v1337_v51 = vld [vmem:[#allocation3 + $0x38] sm:$0xff] }
0x10b9   :  { %v1245_v18 = vmul.f32 %v4093_v56, %v1243_v52  ;;  %vm1291_vm2 = vmor %vm1289_vm1, %vm1290_vm0  ;;  %vm1250_vm4 = vweird.f32 %v4093_v56  ;;  %vm740_vm0 = vcmask 261126   ;;  %v4996_v52 = vld [vmem:[#allocation6 + $0x18] sm:$0xff]  ;;  %vm1354_vm1 = vcmask 523264  }
0x10ba   :  { %v1286_v55 = vsub.f32 1.0, %v1285_v54  ;;  %vm1251_vm6 = vmor %vm1249_vm5, %vm1250_vm4  ;;  %v1335_v54 = vld [vmem:[#allocation3 + $0x28] sm:$0xff]  ;;  %1448 = vmatpush.msra.mxu3 %v4996_v52 }
0x10bb   :  { %v1246_v59 = vsub.f32 1.0, %v1245_v18  ;;  %v1333_v18 = vld [vmem:[#allocation3 + $0x18] sm:$0xff] }
0x10bc   :  { %v1287_v57 = vmul.f32 %v4091_v53, %v1286_v55  ;;  %v5002_v55 = vld [vmem:[%s5718_s6] sm:$0xff] }
0x10bd   :  { %v1247_v63 = vmul.f32 %v4093_v56, %v1246_v59  ;;  %1430 = vmatpush.msra.mxu2 %v5002_v55  ;;  %v1330_v59 = vld [vmem:[#allocation3] sm:$0xff] }
0x10be   :  { %v1288_v58 = vadd.f32 %v4091_v53, %v1287_v57  ;;  %v1332_v57 = vld [vmem:[#allocation3 + $0x10] sm:$0xff]  ;;  %1431 = vmatmul.f32.vlgmr.msra.gmra.mxu2 %v4516_v11 }
0x10bf   :  { %v1248_v14 = vadd.f32 %v4093_v56, %v1247_v63  ;;  %1558 = vmatpush.msrb.mxu2 %v4976_v7 }
0x10c0   :  { %v1292_v62 = vsel %vm1291_vm2, %v4091_v53, %v1288_v58  ;;  %v1334_v53 = vld [vmem:[#allocation3 + $0x20] sm:$0xff]  ;;  %v5009_v58 = vld [vmem:[#allocation6 + $0x8] sm:$0xff] }
0x10c1   :  { %v1297_v3 = vsel %vm1294_vm3, %v1296_v0, %v1292_v62  ;;  %v1252_v22 = vsel %vm1251_vm6, %v4093_v56, %v1248_v14  ;;  %v5005_v56 = vld [vmem:[#allocation6 + $0x10] sm:$0xff]  ;;  %1559 = vmatpush.msrb.mxu2 %v4981_v46 }
0x10c2   :  { %v1257_v34 = vsel %vm1254_vm7, %v1256_v12, %v1252_v22  ;;  %v1303_v39 = vmul.f32 %v1301_v21, %v1297_v3  ;;  %1449 = vmatpush.msra.mxu3 %v5005_v56 }
0x10c3   :  { %v1263_v27 = vmul.f32 %v1261_v4, %v1257_v34  ;;  %1560 = vmatpush.msrb.mxu2 %v4993_v23 }
0x10c4   :  { %1450 = vmatpush.msra.mxu3 %v5009_v58 }
0x10c5   :  { %1561 = vmatpush.msrb.mxu2 %v5002_v55 }
0x10c6   :  { %1451 = vmatpush.msra.mxu3 %v5013_v61 }
0x10c7   :  { %1452 = vmatmul.f32.vlgmr.msra.gmra.mxu3 %v4516_v11  ;;  %1706 = vmatpush.msra.mxu2 %v4976_v7 }
0x10c8   :  { %1587 = vmatpush.msrb.mxu3 %v4996_v52 }
0x10c9   :  { %1707 = vmatpush.msra.mxu2 %v4981_v46 }
0x10ca   :  { %1588 = vmatpush.msrb.mxu3 %v5005_v56 }
0x10cb   :  { %1708 = vmatpush.msra.mxu2 %v4993_v23 }
0x10cc   :  { %1589 = vmatpush.msrb.mxu3 %v5009_v58 }
0x10cd   :  { %1709 = vmatpush.msra.mxu2 %v5002_v55 }
0x10ce   :  { %1590 = vmatpush.msrb.mxu3 %v5013_v61 }
0x10d0   :  { %1735 = vmatpush.msra.mxu3 %v4996_v52 }
0x10d2   :  { %1736 = vmatpush.msra.mxu3 %v5005_v56 }
0x10d4   :  { %1737 = vmatpush.msra.mxu3 %v5009_v58 }
0x10d6   :  { %1738 = vmatpush.msra.mxu3 %v5013_v61 }
0x1100   :  { %v1306_v10 = vpop.permute.xlu1 %1305 }
0x1101   :  { %v1308_v13 = vmul.f32 %v1306_v10, %v1297_v3 }
0x1103   :  { %1310 = vrot.lane.b32.xlu0 %v1308_v13, %s4517_s1  ;;  %v5058_v13 = vld [vmem:[%s5720_s8] sm:$0x3] }
0x1104   :  { %v1351_v14 = vperm.slane %v5058_v13, 1 }
0x1108   :  { %v1266_v16 = vpop.permute.xlu2 %1265 }
0x1109   :  { %v1268_v25 = vmul.f32 %v1266_v16, %v1257_v34 }
0x110b   :  { %1270 = vrot.lane.b32.xlu1 %v1268_v25, %s4517_s1 }
0x1113   :  { %440 = vrot.lane.b32.xlu1 %v4777_v30, %s4518_s4 }
0x111b   :  { %888 = vrot.lane.b32.xlu1 %v4867_v29, %s4519_s11 }
0x1123   :  { %596 = vrot.lane.b32.xlu1 %v4807_v37, %s4519_s11 }
0x114a   :  { %v1453_v22 = vpop.f32.mrf.mxu3 }
0x114b   :  { %v1457_v12 = vrot.slane %v1453_v22, 2 }
0x1175   :  { %v1311_v41 = vpop.permute.xlu0 %1310 }
0x1176   :  { %v1313_v43 = vadd.f32 %v1311_v41, %v1303_v39 }
0x1178   :  { %4094 = vtanh.f32 %v1313_v43 }
0x117d   :  { %v1271_v44 = vpop.permute.xlu1 %1270 }
0x117e   :  { %v4095_v17 = vpop.eup %4094  ;;  %v1273_v8 = vadd.f32 %v1271_v44, %v1263_v27 }
0x117f   :  { %1316 = vrot.lane.b32.xlu2 %v4095_v17, %s4517_s1 }
0x1180   :  { %4096 = vtanh.f32 %v1273_v8  ;;  %v1350_v8 = vperm.slane %v5058_v13, 0 }
0x1185   :  { %v441_v30 = vpop.permute.xlu1 %440 }
0x1186   :  { %v4097_v29 = vpop.eup %4096  ;;  %444 = vst.msk [vmem:[#allocation2] sm:$0xc] %vm443_vm10, %v441_v30 }
0x1187   :  { %590 = vrot.lane.b32.xlu2 %v4811_v40, %s4518_s4  ;;  %1276 = vrot.lane.b32.xlu0 %v4097_v29, %s4517_s1 }
0x118d   :  { %v889_v37 = vpop.permute.xlu1 %888 }
0x118f   :  { %1033 = vrot.lane.b32.xlu2 %v4893_v38, %s4519_s11  ;;  %737 = vrot.lane.b32.xlu0 %v4845_v35, %s4518_s4 }
0x1195   :  { %v597_v33 = vpop.permute.xlu1 %596 }
0x1196   :  { %600 = vst.msk [vmem:[#allocation2 + $0x8] sm:$0xc] %vm599_vm11, %v597_v33 }
0x1197   :  { %299 = vrot.lane.b32.xlu2 %v4741_v20, %s4519_s11  ;;  %1181 = vrot.lane.b32.xlu0 %v4919_v6, %s4519_s11  ;;  %v1344_v6 = vld [vmem:[#allocation3 + $0x70] sm:$0xff] }
0x1198   :  { %1369 = vmatpush.msrb.mxu0 %v1344_v6 }
0x119a   :  { %1370 = vmatpush.msrb.mxu0 %v1342_v1 }
0x119c   :  { %1371 = vmatpush.msrb.mxu0 %v1340_v2 }
0x119f   :  { %743 = vrot.lane.b32.xlu2 %v4841_v36, %s4519_s11  ;;  %446 = vrot.lane.b32.xlu0 %v4773_v28, %s4519_s11 }
0x11a7   :  { %1028 = vrot.lane.b32.xlu0 %v4897_v42, %s4518_s4 }
0x11d9   :  { %v1317_v40 = vpop.permute.xlu2 %1316 }
0x11da   :  { %v1319_v35 = vmul.f32 %v1317_v40, %v1297_v3 }
0x11dc   :  { %1326 = vrot.lane.b32.xlu1 %v1319_v35, %s4519_s11  ;;  %v1432_v35 = vpop.f32.mrf.mxu2 }
0x11e1   :  { %v591_v38 = vpop.permute.xlu2 %590 }
0x11e2   :  { %594 = vst.msk [vmem:[#allocation2] sm:$0x30] %vm593_vm12, %v591_v38 }
0x11e4   :  { %1176 = vrot.lane.b32.xlu1 %v4923_v45, %s4518_s4  ;;  %v1343_v45 = vld [vmem:[#allocation3 + $0x68] sm:$0xff] }
0x11e5   :  { %1393 = vmatpush.msrb.mxu1 %v1343_v45 }
0x11e7   :  { %1394 = vmatpush.msrb.mxu1 %v1341_v5 }
0x11e9   :  { %v1034_v20 = vpop.permute.xlu2 %1033  ;;  %1395 = vmatpush.msrb.mxu1 %v1339_v26 }
0x11ea   :  { %1036 = vst.msk [vmem:[#allocation2] sm:$0x30] %vm449_vm13, %v1034_v20 }
0x11eb   :  { %1396 = vmatpush.msrb.mxu1 %v1337_v51 }
0x11ed   :  { %1397 = vmatpush.msrb.mxu1 %v1335_v54 }
0x11ef   :  { %1398 = vmatpush.msrb.mxu1 %v1333_v18 }
0x11f1   :  { %v300_v28 = vpop.permute.xlu2 %299  ;;  %1399 = vmatpush.msrb.mxu1 %v1331_v60 }
0x11f2   :  { %303 = vst.msk [vmem:[#allocation2 + $0x8] sm:$0xc0] %vm302_vm14, %v300_v28 }
0x11f3   :  { %1883 = vmatpush.msra.mxu1 %v4996_v52 }
0x11f5   :  { %1884 = vmatpush.msra.mxu1 %v5005_v56 }
0x11f7   :  { %1885 = vmatpush.msra.mxu1 %v5009_v58 }
0x11f9   :  { %v744_v36 = vpop.permute.xlu2 %743  ;;  %v1277_v42 = vpop.permute.xlu0 %1276  ;;  %1886 = vmatpush.msra.mxu1 %v5013_v61 }
0x11fa   :  { %747 = vst.msk [vmem:[#allocation2 + $0x8] sm:$0x3] %vm746_vm15, %v744_v36  ;;  %v1279_v32 = vmul.f32 %v1277_v42, %v1257_v34 }
0x11fb   :  { %886 = vst.msk [vmem:[#allocation2 + $0x8] sm:$0x3] %vm296_vm9, %v4873_v24  ;;  %v1338_v24 = vld [vmem:[#allocation3 + $0x40] sm:$0xff] }
0x11fc   :  { %1321 = vrot.lane.b32.xlu2 %v1279_v32, %s4518_s4  ;;  %1372 = vmatpush.msrb.mxu0 %v1338_v24 }
0x11fe   :  { %1373 = vmatpush.msrb.mxu0 %v1336_v50 }
0x1200   :  { %1374 = vmatpush.msrb.mxu0 %v1334_v53 }
0x1201   :  { %v738_v47 = vpop.permute.xlu0 %737 }
0x1202   :  { %741 = vst.msk [vmem:[#allocation2] sm:$0xc0] %vm740_vm0, %v738_v47  ;;  %1375 = vmatpush.msrb.mxu0 %v1332_v57 }
0x1203   :  { %891 = vst.msk [vmem:[#allocation2] sm:$0xc0] %vm302_vm14, %v889_v37 }
0x1204   :  { %1376 = vmatpush.msrb.mxu0 %v1330_v59 }
0x1206   :  { %1854 = vmatpush.msra.mxu0 %v4976_v7 }
0x1208   :  { %1855 = vmatpush.msra.mxu0 %v4981_v46 }
0x1209   :  { %v1182_v48 = vpop.permute.xlu0 %1181 }
0x120a   :  { %1184 = vst.msk [vmem:[#allocation2] sm:$0xc] %vm599_vm11, %v1182_v48  ;;  %1856 = vmatpush.msra.mxu0 %v4993_v23 }
0x120c   :  { %1857 = vmatpush.msra.mxu0 %v5002_v55 }
0x1211   :  { %v447_v49 = vpop.permute.xlu0 %446 }
0x1212   :  { %450 = vst.msk [vmem:[#allocation2 + $0x8] sm:$0x30] %vm449_vm13, %v447_v49 }
0x1219   :  { %v1029_v31 = vpop.permute.xlu0 %1028 }
0x121a   :  { %1031 = vst.msk [vmem:[#allocation2 + $0x8] sm:$0xc] %vm443_vm10, %v1029_v31 }
0x124e   :  { %v1327_v62 = vpop.permute.xlu1 %1326 }
0x124f   :  { %1329 = vst.msk [vmem:[#allocation2] sm:$0x3] %vm746_vm15, %v1327_v62 }
0x1256   :  { %v1347_v63 = vld [vmem:[#allocation2] sm:$0xff]  ;;  %v1322_v0 = vpop.permute.xlu2 %1321  ;;  %v1177_v3 = vpop.permute.xlu1 %1176 }
0x1257   :  { %1324 = vst.msk [vmem:[#allocation2 + $0x8] sm:$0xc0] %vm740_vm0, %v1322_v0  ;;  %3884 = vmatmul.msk.f32.vlgmr.msrb.gmra.mxu0 %vm1354_vm1, %v1347_v63  ;;  %3886 = vmatmul.msk.f32.vlgmr.msrb.gmra.mxu1 %vm1354_vm1, %v1347_v63 }
0x1258   :  { %1179 = vst.msk [vmem:[#allocation2 + $0x8] sm:$0x30] %vm593_vm12, %v1177_v3  ;;  %2169 = vmatpush.msrb.mxu1 %v4996_v52  ;;  %2140 = vmatpush.msrb.mxu0 %v4976_v7 }
0x125a   :  { %2170 = vmatpush.msrb.mxu1 %v5005_v56  ;;  %2141 = vmatpush.msrb.mxu0 %v4981_v46 }
0x125c   :  { %2171 = vmatpush.msrb.mxu1 %v5009_v58  ;;  %2142 = vmatpush.msrb.mxu0 %v4993_v23 }
0x125e   :  { %2172 = vmatpush.msrb.mxu1 %v5013_v61  ;;  %2143 = vmatpush.msrb.mxu0 %v5002_v55 }
0x125f   :  { %v1348_v10 = vld [vmem:[#allocation2 + $0x8] sm:$0xff] }
0x1260   :  { %3885 = vmatmul.msk.f32.gmra.mxu0 %vm1354_vm1, %v1348_v10  ;;  %3887 = vmatmul.msk.f32.gmra.mxu1 %vm1354_vm1, %v1348_v10 }
0x12d4   :  { %v1401_v15 = vpop.f32.mrf.mxu1  ;;  %v1378_v30 = vpop.f32.mrf.mxu0 }
0x12d5   :  { %v5061_v19 = vadd.f32 %v1401_v15, %v1351_v14  ;;  %v5070_v40 = vadd.f32 %v1378_v30, %v1350_v8 }
0x12d7   :  { %v1435_v28 = vadd.f32 %v1432_v35, %v5070_v40 }
0x12d9   :  { %v3888_v9 = vmul.f32 -1.442695, %v1435_v28 }
0x12dd   :  { %v1404_v16 = vpop.f32.mrf.mxu1 }
0x12de   :  { %v5063_v34 = vadd.f32 %v1404_v16, %v1351_v14 }
0x12e0   :  { %v1459_v25 = vadd.f32 %v1457_v12, %v5063_v34 }
0x12e2   :  { %4098 = vtanh.f32 %v1459_v25  ;;  %v3889_v39 = vmul.f32 -1.442695, %v1459_v25 }
0x12e4   :  { %4100 = vpow2.f32 %v3889_v39 }
0x12e8   :  { %v4099_v21 = vpop.eup %4098 }
0x12e9   :  { %1519 = vrot.lane.b32.xlu0 %v4099_v21, %s4517_s1 }
0x12ea   :  { %v4101_v41 = vpop.eup %4100 }
0x12eb   :  { %v1500_v43 = vadd.f32 1.0, %v4101_v41 }
0x12ed   :  { %4102 = vrcp.f32 %v1500_v43  ;;  %v1512_v37 = vand.u32 2147483648, %v1500_v43  ;;  %vm1506_vm3 = vweird.f32 %v1500_v43  ;;  %v1510_v33 = vand.u32 2147483647, %v1500_v43 }
0x12ee   :  { %4104 = vtanh.f32 %v1435_v28 }
0x12ef   :  { %v1513_v20 = vor.u32 1.1754944e-38, %v1512_v37  ;;  %vm1511_vm5 = vcmp.eq.f32.partialorder %v1510_v33, 8.507059e+37  ;;  %4106 = vpow2.f32 %v3888_v9 }
0x12f3   :  { %v4103_v4 = vpop.eup %4102 }
0x12f4   :  { %v1502_v27 = vmul.f32 %v4103_v4, %v1500_v43  ;;  %vm1507_vm2 = vweird.f32 %v4103_v4  ;;  %v4105_v6 = vpop.eup %4104 }
0x12f5   :  { %vm1508_vm4 = vmor %vm1506_vm3, %vm1507_vm2  ;;  %v4107_v1 = vpop.eup %4106 }
0x12f6   :  { %v1503_v44 = vsub.f32 1.0, %v1502_v27  ;;  %v1463_v45 = vadd.f32 1.0, %v4107_v1 }
0x12f8   :  { %v1504_v17 = vmul.f32 %v4103_v4, %v1503_v44  ;;  %4108 = vrcp.f32 %v1463_v45  ;;  %v1475_v51 = vand.u32 2147483648, %v1463_v45  ;;  %vm1469_vm7 = vweird.f32 %v1463_v45 }
0x12f9   :  { %v1473_v53 = vand.u32 2147483647, %v1463_v45 }
0x12fa   :  { %v1505_v29 = vadd.f32 %v4103_v4, %v1504_v17  ;;  %v1476_v57 = vor.u32 1.1754944e-38, %v1475_v51 }
0x12fb   :  { %vm1474_vm3 = vcmp.eq.f32.partialorder %v1473_v53, 8.507059e+37 }
0x12fc   :  { %v1509_v38 = vsel %vm1508_vm4, %v4103_v4, %v1505_v29 }
0x12fd   :  { %v1514_v42 = vsel %vm1511_vm5, %v1513_v20, %v1509_v38 }
0x12fe   :  { %v4109_v2 = vpop.eup %4108  ;;  %v1517_v24 = vmul.f32 0.0, %v1514_v42 }
0x12ff   :  { %v1465_v5 = vmul.f32 %v4109_v2, %v1463_v45  ;;  %vm1470_vm6 = vweird.f32 %v4109_v2 }
0x1300   :  { %vm1471_vm2 = vmor %vm1469_vm7, %vm1470_vm6 }
0x1301   :  { %v1466_v47 = vsub.f32 1.0, %v1465_v5 }
0x1303   :  { %v1467_v49 = vmul.f32 %v4109_v2, %v1466_v47 }
0x1305   :  { %v1468_v31 = vadd.f32 %v4109_v2, %v1467_v49 }
0x1307   :  { %v1472_v54 = vsel %vm1471_vm2, %v4109_v2, %v1468_v31 }
0x1308   :  { %v1477_v59 = vsel %vm1474_vm3, %v1476_v57, %v1472_v54 }
0x1309   :  { %v1480_v3 = vmul.f32 0.0, %v1477_v59 }
0x135b   :  { %v1520_v36 = vpop.permute.xlu0 %1519 }
0x135c   :  { %v1522_v32 = vmul.f32 %v1520_v36, %v1514_v42 }
0x135e   :  { %1524 = vrot.lane.b32.xlu1 %v1522_v32, %s4517_s1 }
0x1366   :  { %1482 = vrot.lane.b32.xlu1 %v4105_v6, %s4517_s1 }
0x13d0   :  { %v1525_v26 = vpop.permute.xlu1 %1524 }
0x13d1   :  { %v5075_v48 = vadd.f32 %v1525_v26, %v1517_v24 }
0x13d3   :  { %4110 = vtanh.f32 %v5075_v48  ;;  %v1660_v5 = vrot.slane %v5075_v48, 2 }
0x13d8   :  { %v1483_v18 = vpop.permute.xlu1 %1482 }
0x13d9   :  { %v4111_v50 = vpop.eup %4110  ;;  %v1485_v60 = vmul.f32 %v1483_v18, %v1477_v59 }
0x13da   :  { %1530 = vrot.lane.b32.xlu2 %v4111_v50, %s4517_s1 }
0x13e2   :  { %1487 = vrot.lane.b32.xlu2 %v1485_v60, %s4517_s1 }
0x1434   :  { %v1531_v62 = vpop.permute.xlu2 %1530 }
0x1435   :  { %v5080_v63 = vmul.f32 %v1531_v62, %v1514_v42 }
0x1437   :  { %v1570_v0 = vrot.slane %v5080_v63, 6 }
0x1439   :  { %1571 = vrot.lane.b32.xlu0 %v1570_v0, %s4518_s4 }
0x143c   :  { %v1488_v10 = vpop.permute.xlu2 %1487 }
0x143d   :  { %v5084_v14 = vadd.f32 %v1488_v10, %v1480_v3 }
0x143f   :  { %4112 = vtanh.f32 %v5084_v14 }
0x1445   :  { %v4113_v15 = vpop.eup %4112 }
0x1446   :  { %1493 = vrot.lane.b32.xlu0 %v4113_v15, %s4517_s1 }
0x14ab   :  { %v1572_v22 = vpop.permute.xlu0 %1571 }
0x14ac   :  { %3891 = vmatmul.msk.f32.vlgmr.msrb.gmra.mxu3 %vm169_vm8, %v1572_v22 }
0x14ad   :  { %2024 = vmatpush.msrb.mxu3 %v4996_v52 }
0x14af   :  { %2025 = vmatpush.msrb.mxu3 %v5005_v56 }
0x14b1   :  { %2026 = vmatpush.msrb.mxu3 %v5009_v58 }
0x14b3   :  { %2027 = vmatpush.msrb.mxu3 %v5013_v61 }
0x14b8   :  { %v1494_v12 = vpop.permute.xlu0 %1493 }
0x14b9   :  { %v1496_v16 = vmul.f32 %v1494_v12, %v1477_v59 }
0x14bb   :  { %1535 = vrot.lane.b32.xlu1 %v1496_v16, %s4518_s4  ;;  %v1620_v16 = vrot.slane %v5084_v14, 6 }
0x152d   :  { %v1536_v25 = vpop.permute.xlu1 %1535 }
0x152e   :  { %1538 = vst.msk [vmem:[#allocation2] sm:$0x3] %vm296_vm9, %v1536_v25  ;;  %3890 = vmatmul.msk.f32.vlgmr.msrb.gmra.mxu2 %vm169_vm8, %v1536_v25 }
0x152f   :  { %v1592_v21 = vpop.f32.mrf.mxu3  ;;  %1999 = vmatpush.msrb.mxu2 %v4976_v7 }
0x1530   :  { %v1596_v39 = vrot.slane %v1592_v21, 4 }
0x1531   :  { %2000 = vmatpush.msrb.mxu2 %v4981_v46 }
0x1532   :  { %v1598_v41 = vadd.f32 %v1596_v39, %v5063_v34 }
0x1533   :  { %2001 = vmatpush.msrb.mxu2 %v4993_v23 }
0x1534   :  { %4114 = vtanh.f32 %v1598_v41  ;;  %v3893_v4 = vmul.f32 -1.442695, %v1598_v41 }
0x1535   :  { %2002 = vmatpush.msrb.mxu2 %v5002_v55 }
0x1536   :  { %4116 = vpow2.f32 %v3893_v4 }
0x153a   :  { %v4115_v43 = vpop.eup %4114 }
0x153b   :  { %1664 = vrot.lane.b32.xlu2 %v4115_v43, %s4517_s1 }
0x153c   :  { %v4117_v27 = vpop.eup %4116 }
0x153d   :  { %v1642_v44 = vadd.f32 1.0, %v4117_v27 }
0x153f   :  { %4118 = vrcp.f32 %v1642_v44  ;;  %v1654_v35 = vand.u32 2147483648, %v1642_v44  ;;  %vm1648_vm5 = vweird.f32 %v1642_v44  ;;  %v1652_v38 = vand.u32 2147483647, %v1642_v44 }
0x1541   :  { %v1655_v28 = vor.u32 1.1754944e-38, %v1654_v35  ;;  %vm1653_vm7 = vcmp.eq.f32.partialorder %v1652_v38, 8.507059e+37 }
0x1545   :  { %v4119_v17 = vpop.eup %4118 }
0x1546   :  { %v1644_v30 = vmul.f32 %v4119_v17, %v1642_v44  ;;  %vm1649_vm4 = vweird.f32 %v4119_v17 }
0x1547   :  { %vm1650_vm6 = vmor %vm1648_vm5, %vm1649_vm4 }
0x1548   :  { %v1645_v29 = vsub.f32 1.0, %v1644_v30 }
0x154a   :  { %v1646_v37 = vmul.f32 %v4119_v17, %v1645_v29 }
0x154c   :  { %v1647_v33 = vadd.f32 %v4119_v17, %v1646_v37 }
0x154e   :  { %v1651_v20 = vsel %vm1650_vm6, %v4119_v17, %v1647_v33 }
0x154f   :  { %v1656_v36 = vsel %vm1653_vm7, %v1655_v28, %v1651_v20 }
0x1550   :  { %v1662_v24 = vmul.f32 %v1660_v5, %v1656_v36 }
0x1595   :  { %v1665_v42 = vpop.permute.xlu2 %1664 }
0x1596   :  { %v1667_v32 = vmul.f32 %v1665_v42, %v1656_v36 }
0x1598   :  { %1669 = vrot.lane.b32.xlu0 %v1667_v32, %s4517_s1 }
0x15b1   :  { %v1563_v6 = vpop.f32.mrf.mxu2 }
0x15b2   :  { %v1567_v9 = vrot.slane %v1563_v6, 6 }
0x15b4   :  { %v1569_v1 = vadd.f32 %v1567_v9, %v5070_v40 }
0x15b6   :  { %4120 = vtanh.f32 %v1569_v1  ;;  %v3892_v2 = vmul.f32 -1.442695, %v1569_v1 }
0x15b8   :  { %4122 = vpow2.f32 %v3892_v2 }
0x15bc   :  { %v4121_v45 = vpop.eup %4120 }
0x15bd   :  { %1624 = vrot.lane.b32.xlu0 %v4121_v45, %s4517_s1 }
0x15be   :  { %v4123_v49 = vpop.eup %4122 }
0x15bf   :  { %v1602_v31 = vadd.f32 1.0, %v4123_v49 }
0x15c1   :  { %v1614_v59 = vand.u32 2147483648, %v1602_v31  ;;  %vm1608_vm3 = vweird.f32 %v1602_v31  ;;  %v1612_v48 = vand.u32 2147483647, %v1602_v31 }
0x15c3   :  { %v1615_v62 = vor.u32 1.1754944e-38, %v1614_v59  ;;  %vm1613_vm5 = vcmp.eq.f32.partialorder %v1612_v48, 8.507059e+37 }
0x160a   :  { %v1670_v26 = vpop.permute.xlu0 %1669 }
0x160b   :  { %v5106_v47 = vadd.f32 %v1670_v26, %v1662_v24 }
0x160d   :  { %4124 = vtanh.f32 %v5106_v47 }
0x160e   :  { %4126 = vrcp.f32 %v1602_v31 }
0x1613   :  { %v4125_v50 = vpop.eup %4124 }
0x1614   :  { %1675 = vrot.lane.b32.xlu1 %v4125_v50, %s4517_s1  ;;  %v4127_v51 = vpop.eup %4126 }
0x1615   :  { %v1604_v53 = vmul.f32 %v4127_v51, %v1602_v31  ;;  %vm1609_vm2 = vweird.f32 %v4127_v51 }
0x1616   :  { %vm1610_vm4 = vmor %vm1608_vm3, %vm1609_vm2 }
0x1617   :  { %v1605_v54 = vsub.f32 1.0, %v1604_v53  ;;  %v1808_v53 = vrot.slane %v5106_v47, 2 }
0x1619   :  { %v1606_v57 = vmul.f32 %v4127_v51, %v1605_v54 }
0x161b   :  { %v1607_v18 = vadd.f32 %v4127_v51, %v1606_v57 }
0x161d   :  { %v1611_v60 = vsel %vm1610_vm4, %v4127_v51, %v1607_v18 }
0x161e   :  { %v1616_v0 = vsel %vm1613_vm5, %v1615_v62, %v1611_v60 }
0x161f   :  { %v1622_v25 = vmul.f32 %v1620_v16, %v1616_v0 }
0x162f   :  { %v1625_v3 = vpop.permute.xlu0 %1624 }
0x1630   :  { %v1627_v10 = vmul.f32 %v1625_v3, %v1616_v0 }
0x1632   :  { %1629 = vrot.lane.b32.xlu1 %v1627_v10, %s4517_s1 }
0x1686   :  { %v1676_v15 = vpop.permute.xlu1 %1675 }
0x1687   :  { %v5111_v22 = vmul.f32 %v1676_v15, %v1656_v36 }
0x1689   :  { %v1718_v12 = vrot.slane %v5111_v22, 4 }
0x168b   :  { %1719 = vrot.lane.b32.xlu2 %v1718_v12, %s4518_s4 }
0x16a4   :  { %v1630_v21 = vpop.permute.xlu1 %1629 }
0x16a5   :  { %v5116_v39 = vadd.f32 %v1630_v21, %v1622_v25 }
0x16a7   :  { %4128 = vtanh.f32 %v5116_v39 }
0x16ad   :  { %v4129_v41 = vpop.eup %4128 }
0x16ae   :  { %1635 = vrot.lane.b32.xlu2 %v4129_v41, %s4517_s1 }
0x16e5   :  { %v1720_v43 = vpop.permute.xlu2 %1719 }
0x16e6   :  { %3895 = vmatmul.msk.f32.vlgmr.msra.gmra.mxu3 %vm169_vm8, %v1720_v43 }
0x16e7   :  { %2317 = vmatpush.msra.mxu3 %v4996_v52 }
0x16e9   :  { %2318 = vmatpush.msra.mxu3 %v5005_v56 }
0x16eb   :  { %2319 = vmatpush.msra.mxu3 %v5009_v58 }
0x16ed   :  { %2320 = vmatpush.msra.mxu3 %v5013_v61 }
0x1708   :  { %v1636_v14 = vpop.permute.xlu2 %1635 }
0x1709   :  { %v5125_v4 = vmul.f32 %v1636_v14, %v1616_v0 }
0x170b   :  { %v1689_v27 = vrot.slane %v5125_v4, 2 }
0x170d   :  { %1690 = vrot.lane.b32.xlu0 %v1689_v27, %s4518_s4 }
0x1769   :  { %v1740_v44 = vpop.f32.mrf.mxu3 }
0x176a   :  { %v1744_v17 = vrot.slane %v1740_v44, 6 }
0x176c   :  { %v1746_v30 = vadd.f32 %v1744_v17, %v5063_v34  ;;  %v1768_v17 = vrot.slane %v5116_v39, 6 }
0x176e   :  { %4130 = vtanh.f32 %v1746_v30  ;;  %v3897_v33 = vmul.f32 -1.442695, %v1746_v30 }
0x1770   :  { %4132 = vpow2.f32 %v3897_v33 }
0x1774   :  { %v4131_v29 = vpop.eup %4130 }
0x1775   :  { %1812 = vrot.lane.b32.xlu1 %v4131_v29, %s4517_s1 }
0x1776   :  { %v4133_v35 = vpop.eup %4132 }
0x1777   :  { %v1790_v38 = vadd.f32 1.0, %v4133_v35 }
0x1779   :  { %4134 = vrcp.f32 %v1790_v38  ;;  %v1802_v6 = vand.u32 2147483648, %v1790_v38  ;;  %vm1796_vm7 = vweird.f32 %v1790_v38  ;;  %v1800_v9 = vand.u32 2147483647, %v1790_v38 }
0x177b   :  { %v1803_v45 = vor.u32 1.1754944e-38, %v1802_v6  ;;  %vm1801_vm3 = vcmp.eq.f32.partialorder %v1800_v9, 8.507059e+37 }
0x177f   :  { %v1691_v37 = vpop.permute.xlu0 %1690  ;;  %v4135_v20 = vpop.eup %4134 }
0x1780   :  { %3894 = vmatmul.msk.f32.vlgmr.msra.gmra.mxu2 %vm169_vm8, %v1691_v37  ;;  %v1792_v28 = vmul.f32 %v4135_v20, %v1790_v38  ;;  %vm1797_vm6 = vweird.f32 %v4135_v20 }
0x1781   :  { %2288 = vmatpush.msra.mxu2 %v4976_v7  ;;  %vm1798_vm2 = vmor %vm1796_vm7, %vm1797_vm6 }
0x1782   :  { %v1793_v36 = vsub.f32 1.0, %v1792_v28 }
0x1783   :  { %2289 = vmatpush.msra.mxu2 %v4981_v46 }
0x1784   :  { %v1794_v42 = vmul.f32 %v4135_v20, %v1793_v36 }
0x1785   :  { %2290 = vmatpush.msra.mxu2 %v4993_v23 }
0x1786   :  { %v1795_v32 = vadd.f32 %v4135_v20, %v1794_v42 }
0x1787   :  { %2291 = vmatpush.msra.mxu2 %v5002_v55 }
0x1788   :  { %v1799_v1 = vsel %vm1798_vm2, %v4135_v20, %v1795_v32 }
0x1789   :  { %v1804_v2 = vsel %vm1801_vm3, %v1803_v45, %v1799_v1 }
0x178a   :  { %v1810_v54 = vmul.f32 %v1808_v53, %v1804_v2 }
0x17e7   :  { %v1813_v5 = vpop.permute.xlu1 %1812 }
0x17e8   :  { %v1815_v24 = vmul.f32 %v1813_v5, %v1804_v2 }
0x17ea   :  { %1817 = vrot.lane.b32.xlu2 %v1815_v24, %s4517_s1 }
0x1803   :  { %v1711_v26 = vpop.f32.mrf.mxu2 }
0x1804   :  { %v1715_v49 = vrot.slane %v1711_v26, 4 }
0x1806   :  { %v1717_v31 = vadd.f32 %v1715_v49, %v5070_v40 }
0x1808   :  { %4136 = vtanh.f32 %v1717_v31  ;;  %v3896_v51 = vmul.f32 -1.442695, %v1717_v31 }
0x180a   :  { %4138 = vpow2.f32 %v3896_v51 }
0x180e   :  { %v4137_v50 = vpop.eup %4136 }
0x180f   :  { %1772 = vrot.lane.b32.xlu2 %v4137_v50, %s4517_s1 }
0x1810   :  { %v4139_v59 = vpop.eup %4138 }
0x1811   :  { %v1750_v48 = vadd.f32 1.0, %v4139_v59 }
0x1813   :  { %v1762_v12 = vand.u32 2147483648, %v1750_v48  ;;  %vm1756_vm5 = vweird.f32 %v1750_v48  ;;  %v1760_v47 = vand.u32 2147483647, %v1750_v48 }
0x1815   :  { %v1763_v25 = vor.u32 1.1754944e-38, %v1762_v12  ;;  %vm1761_vm7 = vcmp.eq.f32.partialorder %v1760_v47, 8.507059e+37 }
0x1844   :  { %v1818_v57 = vpop.permute.xlu2 %1817 }
0x1845   :  { %v5140_v18 = vadd.f32 %v1818_v57, %v1810_v54 }
0x1847   :  { %4140 = vtanh.f32 %v5140_v18 }
0x1848   :  { %4142 = vrcp.f32 %v1750_v48 }
0x184d   :  { %v4141_v60 = vpop.eup %4140 }
0x184e   :  { %1823 = vrot.lane.b32.xlu0 %v4141_v60, %s4517_s1  ;;  %v4143_v62 = vpop.eup %4142 }
0x184f   :  { %v1752_v0 = vmul.f32 %v4143_v62, %v1750_v48  ;;  %vm1757_vm4 = vweird.f32 %v4143_v62  ;;  %v1953_v48 = vrot.slane %v5140_v18, 2 }
0x1850   :  { %vm1758_vm6 = vmor %vm1756_vm5, %vm1757_vm4 }
0x1851   :  { %v1753_v3 = vsub.f32 1.0, %v1752_v0 }
0x1853   :  { %v1754_v10 = vmul.f32 %v4143_v62, %v1753_v3 }
0x1855   :  { %v1755_v15 = vadd.f32 %v4143_v62, %v1754_v10 }
0x1857   :  { %v1759_v16 = vsel %vm1758_vm6, %v4143_v62, %v1755_v15 }
0x1858   :  { %v1764_v21 = vsel %vm1761_vm7, %v1763_v25, %v1759_v16 }
0x1859   :  { %v1770_v30 = vmul.f32 %v1768_v17, %v1764_v21 }
0x1869   :  { %v1773_v41 = vpop.permute.xlu2 %1772 }
0x186a   :  { %v1775_v43 = vmul.f32 %v1773_v41, %v1764_v21 }
0x186c   :  { %1777 = vrot.lane.b32.xlu0 %v1775_v43, %s4517_s1 }
0x18c0   :  { %v1824_v14 = vpop.permute.xlu0 %1823 }
0x18c1   :  { %v5145_v27 = vmul.f32 %v1824_v14, %v1804_v2  ;;  %v5170_v2 = vpop.f32.mrf.mxu0 }
0x18c3   :  { %v1866_v44 = vrot.slane %v5145_v27, 2 }
0x18c5   :  { %1867 = vrot.lane.b32.xlu1 %v1866_v44, %s4518_s4 }
0x18de   :  { %v1778_v29 = vpop.permute.xlu0 %1777 }
0x18df   :  { %v5150_v37 = vadd.f32 %v1778_v29, %v1770_v30 }
0x18e1   :  { %4144 = vtanh.f32 %v5150_v37  ;;  %v1913_v44 = vrot.slane %v5150_v37, 6 }
0x18e7   :  { %v4145_v33 = vpop.eup %4144 }
0x18e8   :  { %1783 = vrot.lane.b32.xlu1 %v4145_v33, %s4517_s1 }
0x1937   :  { %v1868_v35 = vpop.permute.xlu1 %1867 }
0x1938   :  { %3899 = vmatmul.msk.f32.vlgmr.msra.gmra.mxu1 %vm169_vm8, %v1868_v35 }
0x1939   :  { %2465 = vmatpush.msra.mxu1 %v4996_v52 }
0x193b   :  { %2466 = vmatpush.msra.mxu1 %v5005_v56 }
0x193d   :  { %2467 = vmatpush.msra.mxu1 %v5009_v58 }
0x193f   :  { %2468 = vmatpush.msra.mxu1 %v5013_v61 }
0x195a   :  { %v1784_v39 = vpop.permute.xlu1 %1783 }
0x195b   :  { %v5159_v38 = vmul.f32 %v1784_v39, %v1764_v21 }
0x195d   :  { %v1837_v20 = vrot.slane %v5159_v38, 4 }
0x195f   :  { %1838 = vrot.lane.b32.xlu2 %v1837_v20, %s4518_s4 }
0x19b5   :  { %v1888_v28 = vpop.f32.mrf.mxu1 }
0x19b6   :  { %v1891_v36 = vadd.f32 %v1888_v28, %v5063_v34 }
0x19b8   :  { %4146 = vtanh.f32 %v1891_v36  ;;  %v3901_v56 = vmul.f32 -1.442695, %v1891_v36 }
0x19b9   :  { %v1839_v42 = vpop.permute.xlu2 %1838 }
0x19ba   :  { %3898 = vmatmul.msk.f32.vlgmr.msra.gmra.mxu0 %vm169_vm8, %v1839_v42  ;;  %4148 = vpow2.f32 %v3901_v56 }
0x19bb   :  { %2436 = vmatpush.msra.mxu0 %v4976_v7 }
0x19bd   :  { %2437 = vmatpush.msra.mxu0 %v4981_v46 }
0x19be   :  { %v4147_v52 = vpop.eup %4146 }
0x19bf   :  { %1957 = vrot.lane.b32.xlu0 %v4147_v52, %s4517_s1  ;;  %2438 = vmatpush.msra.mxu0 %v4993_v23 }
0x19c0   :  { %v4149_v58 = vpop.eup %4148 }
0x19c1   :  { %2439 = vmatpush.msra.mxu0 %v5002_v55  ;;  %v1935_v61 = vadd.f32 1.0, %v4149_v58 }
0x19c3   :  { %4150 = vrcp.f32 %v1935_v61  ;;  %v1947_v7 = vand.u32 2147483648, %v1935_v61  ;;  %vm1941_vm3 = vweird.f32 %v1935_v61  ;;  %v1945_v46 = vand.u32 2147483647, %v1935_v61 }
0x19c5   :  { %v1948_v23 = vor.u32 1.1754944e-38, %v1947_v7  ;;  %vm1946_vm5 = vcmp.eq.f32.partialorder %v1945_v46, 8.507059e+37 }
0x19c9   :  { %v4151_v34 = vpop.eup %4150 }
0x19ca   :  { %v1937_v32 = vmul.f32 %v4151_v34, %v1935_v61  ;;  %vm1942_vm2 = vweird.f32 %v4151_v34 }
0x19cb   :  { %vm1943_vm4 = vmor %vm1941_vm3, %vm1942_vm2 }
0x19cc   :  { %v1938_v6 = vsub.f32 1.0, %v1937_v32 }
0x19ce   :  { %v1939_v9 = vmul.f32 %v4151_v34, %v1938_v6 }
0x19d0   :  { %v1940_v1 = vadd.f32 %v4151_v34, %v1939_v9 }
0x19d2   :  { %v1944_v45 = vsel %vm1943_vm4, %v4151_v34, %v1940_v1 }
0x19d3   :  { %v1949_v55 = vsel %vm1946_vm5, %v1948_v23, %v1944_v45 }
0x19d4   :  { %v1955_v60 = vmul.f32 %v1953_v48, %v1949_v55 }
0x1a31   :  { %v1958_v5 = vpop.permute.xlu0 %1957 }
0x1a32   :  { %v1960_v24 = vmul.f32 %v1958_v5, %v1949_v55 }
0x1a34   :  { %1962 = vrot.lane.b32.xlu1 %v1960_v24, %s4517_s1 }
0x1a37   :  { %v1859_v26 = vpop.f32.mrf.mxu0 }
0x1a38   :  { %v1863_v49 = vrot.slane %v1859_v26, 2 }
0x1a3a   :  { %v1865_v31 = vadd.f32 %v1863_v49, %v5070_v40  ;;  %v5202_v49 = vadd.f32 %v5170_v2, %v1350_v8 }
0x1a3c   :  { %4152 = vtanh.f32 %v1865_v31  ;;  %v3900_v51 = vmul.f32 -1.442695, %v1865_v31 }
0x1a3e   :  { %4154 = vpow2.f32 %v3900_v51 }
0x1a42   :  { %v4153_v50 = vpop.eup %4152 }
0x1a43   :  { %1917 = vrot.lane.b32.xlu1 %v4153_v50, %s4517_s1 }
0x1a44   :  { %v4155_v53 = vpop.eup %4154 }
0x1a45   :  { %v1895_v54 = vadd.f32 1.0, %v4155_v53 }
0x1a47   :  { %4156 = vrcp.f32 %v1895_v54  ;;  %v1907_v12 = vand.u32 2147483648, %v1895_v54  ;;  %vm1901_vm7 = vweird.f32 %v1895_v54  ;;  %v1905_v47 = vand.u32 2147483647, %v1895_v54 }
0x1a49   :  { %v1908_v25 = vor.u32 1.1754944e-38, %v1907_v12  ;;  %vm1906_vm3 = vcmp.eq.f32.partialorder %v1905_v47, 8.507059e+37 }
0x1a4d   :  { %v4157_v57 = vpop.eup %4156 }
0x1a4e   :  { %v1897_v59 = vmul.f32 %v4157_v57, %v1895_v54  ;;  %vm1902_vm6 = vweird.f32 %v4157_v57 }
0x1a4f   :  { %vm1903_vm2 = vmor %vm1901_vm7, %vm1902_vm6 }
0x1a50   :  { %v1898_v0 = vsub.f32 1.0, %v1897_v59 }
0x1a52   :  { %v1899_v40 = vmul.f32 %v4157_v57, %v1898_v0 }
0x1a54   :  { %v1900_v10 = vadd.f32 %v4157_v57, %v1899_v40 }
0x1a56   :  { %v1904_v16 = vsel %vm1903_vm2, %v4157_v57, %v1900_v10 }
0x1a57   :  { %v1909_v21 = vsel %vm1906_vm3, %v1908_v25, %v1904_v16 }
0x1a58   :  { %v1915_v17 = vmul.f32 %v1913_v44, %v1909_v21 }
0x1aa6   :  { %v1963_v62 = vpop.permute.xlu1 %1962 }
0x1aa7   :  { %v5176_v3 = vadd.f32 %v1963_v62, %v1955_v60 }
0x1aa9   :  { %4158 = vtanh.f32 %v5176_v3  ;;  %v2097_v54 = vrot.slane %v5176_v3, 2 }
0x1aaf   :  { %v4159_v15 = vpop.eup %4158 }
0x1ab0   :  { %1968 = vrot.lane.b32.xlu2 %v4159_v15, %s4517_s1 }
0x1ab5   :  { %v1918_v18 = vpop.permute.xlu1 %1917 }
0x1ab6   :  { %v1920_v41 = vmul.f32 %v1918_v18, %v1909_v21 }
0x1ab8   :  { %1922 = vrot.lane.b32.xlu2 %v1920_v41, %s4517_s1 }
0x1b0a   :  { %v1969_v43 = vpop.permute.xlu2 %1968 }
0x1b0b   :  { %v5181_v14 = vmul.f32 %v1969_v43, %v1949_v55 }
0x1b0d   :  { %2008 = vrot.lane.b32.xlu0 %v5181_v14, %s4518_s4 }
0x1b12   :  { %v1923_v30 = vpop.permute.xlu2 %1922 }
0x1b13   :  { %v5186_v29 = vadd.f32 %v1923_v30, %v1915_v17 }
0x1b15   :  { %4160 = vtanh.f32 %v5186_v29  ;;  %v2057_v44 = vrot.slane %v5186_v29, 6 }
0x1b1b   :  { %v4161_v33 = vpop.eup %4160 }
0x1b1c   :  { %1928 = vrot.lane.b32.xlu0 %v4161_v33, %s4517_s1 }
0x1b7f   :  { %v2009_v35 = vpop.permute.xlu0 %2008 }
0x1b80   :  { %3903 = vmatmul.msk.f32.vlgmr.msrb.gmra.mxu3 %vm169_vm8, %v2009_v35 }
0x1b8e   :  { %v1929_v39 = vpop.permute.xlu0 %1928 }
0x1b8f   :  { %v5191_v20 = vmul.f32 %v1929_v39, %v1909_v21 }
0x1b91   :  { %v1982_v28 = vrot.slane %v5191_v20, 6 }
0x1b93   :  { %1983 = vrot.lane.b32.xlu1 %v1982_v28, %s4518_s4 }
0x1c03   :  { %v2029_v37 = vpop.f32.mrf.mxu3 }
0x1c04   :  { %v2033_v36 = vrot.slane %v2029_v37, 2 }
0x1c05   :  { %v1984_v42 = vpop.permute.xlu1 %1983 }
0x1c06   :  { %v2035_v52 = vadd.f32 %v2033_v36, %v5061_v19  ;;  %3902 = vmatmul.msk.f32.vlgmr.msrb.gmra.mxu2 %vm169_vm8, %v1984_v42 }
0x1c08   :  { %4162 = vtanh.f32 %v2035_v52  ;;  %v3905_v58 = vmul.f32 -1.442695, %v2035_v52 }
0x1c0a   :  { %4164 = vpow2.f32 %v3905_v58 }
0x1c0e   :  { %v4163_v56 = vpop.eup %4162 }
0x1c0f   :  { %2101 = vrot.lane.b32.xlu2 %v4163_v56, %s4517_s1 }
0x1c10   :  { %v4165_v61 = vpop.eup %4164 }
0x1c11   :  { %v2079_v34 = vadd.f32 1.0, %v4165_v61 }
0x1c13   :  { %4166 = vrcp.f32 %v2079_v34  ;;  %v2091_v46 = vand.u32 2147483648, %v2079_v34  ;;  %vm2085_vm5 = vweird.f32 %v2079_v34  ;;  %v2089_v45 = vand.u32 2147483647, %v2079_v34 }
0x1c15   :  { %v2092_v55 = vor.u32 1.1754944e-38, %v2091_v46  ;;  %vm2090_vm7 = vcmp.eq.f32.partialorder %v2089_v45, 8.507059e+37 }
0x1c19   :  { %v4167_v32 = vpop.eup %4166 }
0x1c1a   :  { %v2081_v6 = vmul.f32 %v4167_v32, %v2079_v34  ;;  %vm2086_vm4 = vweird.f32 %v4167_v32 }
0x1c1b   :  { %vm2087_vm6 = vmor %vm2085_vm5, %vm2086_vm4 }
0x1c1c   :  { %v2082_v9 = vsub.f32 1.0, %v2081_v6 }
0x1c1e   :  { %v2083_v1 = vmul.f32 %v4167_v32, %v2082_v9 }
0x1c20   :  { %v2084_v7 = vadd.f32 %v4167_v32, %v2083_v1 }
0x1c22   :  { %v2088_v23 = vsel %vm2087_vm6, %v4167_v32, %v2084_v7 }
0x1c23   :  { %v2093_v5 = vsel %vm2090_vm7, %v2092_v55, %v2088_v23 }
0x1c24   :  { %v2099_v57 = vmul.f32 %v2097_v54, %v2093_v5 }
0x1c69   :  { %v2102_v24 = vpop.permute.xlu2 %2101 }
0x1c6a   :  { %v2104_v26 = vmul.f32 %v2102_v24, %v2093_v5 }
0x1c6c   :  { %2106 = vrot.lane.b32.xlu0 %v2104_v26, %s4517_s1 }
0x1c89   :  { %v2004_v31 = vpop.f32.mrf.mxu2 }
0x1c8a   :  { %v2007_v50 = vadd.f32 %v2004_v31, %v5202_v49 }
0x1c8c   :  { %4168 = vtanh.f32 %v2007_v50  ;;  %v3904_v53 = vmul.f32 -1.442695, %v2007_v50 }
0x1c8e   :  { %4170 = vpow2.f32 %v3904_v53 }
0x1c92   :  { %v4169_v51 = vpop.eup %4168 }
0x1c93   :  { %2061 = vrot.lane.b32.xlu0 %v4169_v51, %s4517_s1 }
0x1c94   :  { %v4171_v13 = vpop.eup %4170 }
0x1c95   :  { %v2039_v8 = vadd.f32 1.0, %v4171_v13 }
0x1c97   :  { %v2051_v3 = vand.u32 2147483648, %v2039_v8  ;;  %vm2045_vm3 = vweird.f32 %v2039_v8  ;;  %v2049_v15 = vand.u32 2147483647, %v2039_v8 }
0x1c99   :  { %v2052_v47 = vor.u32 1.1754944e-38, %v2051_v3  ;;  %vm2050_vm5 = vcmp.eq.f32.partialorder %v2049_v15, 8.507059e+37 }
0x1cde   :  { %v2107_v59 = vpop.permute.xlu0 %2106 }
0x1cdf   :  { %v5207_v48 = vadd.f32 %v2107_v59, %v2099_v57 }
0x1ce1   :  { %4172 = vtanh.f32 %v5207_v48  ;;  %v2242_v57 = vrot.slane %v5207_v48, 2 }
0x1ce2   :  { %4174 = vrcp.f32 %v2039_v8 }
0x1ce7   :  { %v4173_v2 = vpop.eup %4172 }
0x1ce8   :  { %2112 = vrot.lane.b32.xlu1 %v4173_v2, %s4517_s1  ;;  %v4175_v60 = vpop.eup %4174 }
0x1ce9   :  { %v2041_v62 = vmul.f32 %v4175_v60, %v2039_v8  ;;  %vm2046_vm2 = vweird.f32 %v4175_v60 }
0x1cea   :  { %vm2047_vm4 = vmor %vm2045_vm3, %vm2046_vm2 }
0x1ceb   :  { %v2042_v0 = vsub.f32 1.0, %v2041_v62 }
0x1ced   :  { %v2043_v40 = vmul.f32 %v4175_v60, %v2042_v0 }
0x1cef   :  { %v2044_v10 = vadd.f32 %v4175_v60, %v2043_v40 }
0x1cf1   :  { %v2048_v12 = vsel %vm2047_vm4, %v4175_v60, %v2044_v10 }
0x1cf2   :  { %v2053_v25 = vsel %vm2050_vm5, %v2052_v47, %v2048_v12 }
0x1cf3   :  { %v2059_v17 = vmul.f32 %v2057_v44, %v2053_v25 }
0x1d05   :  { %v2062_v16 = vpop.permute.xlu0 %2061 }
0x1d06   :  { %v2064_v18 = vmul.f32 %v2062_v16, %v2053_v25 }
0x1d08   :  { %2066 = vrot.lane.b32.xlu1 %v2064_v18, %s4517_s1 }
0x1d5a   :  { %v2113_v21 = vpop.permute.xlu1 %2112 }
0x1d5b   :  { %v5212_v41 = vmul.f32 %v2113_v21, %v2093_v5 }
0x1d5d   :  { %v2152_v43 = vrot.slane %v5212_v41, 6 }
0x1d5f   :  { %2153 = vrot.lane.b32.xlu2 %v2152_v43, %s4518_s4 }
0x1d7a   :  { %v2067_v30 = vpop.permute.xlu1 %2066 }
0x1d7b   :  { %v5217_v33 = vadd.f32 %v2067_v30, %v2059_v17 }
0x1d7d   :  { %4176 = vtanh.f32 %v5217_v33  ;;  %v2202_v30 = vrot.slane %v5217_v33, 6 }
0x1d83   :  { %v4177_v35 = vpop.eup %4176 }
0x1d84   :  { %2072 = vrot.lane.b32.xlu2 %v4177_v35, %s4517_s1 }
0x1db9   :  { %v2154_v39 = vpop.permute.xlu2 %2153 }
0x1dba   :  { %3907 = vmatmul.msk.f32.vlgmr.msrb.gmra.mxu1 %vm169_vm8, %v2154_v39 }
0x1dde   :  { %v2073_v28 = vpop.permute.xlu2 %2072 }
0x1ddf   :  { %v2075_v37 = vmul.f32 %v2073_v28, %v2053_v25 }
0x1de1   :  { %2117 = vrot.lane.b32.xlu0 %v2075_v37, %s4518_s4 }
0x1e37   :  { %v2174_v36 = vpop.f32.mrf.mxu1 }
0x1e38   :  { %v2178_v42 = vrot.slane %v2174_v36, 4 }
0x1e3a   :  { %v2180_v29 = vadd.f32 %v2178_v42, %v5061_v19 }
0x1e3c   :  { %4178 = vtanh.f32 %v2180_v29  ;;  %v3909_v58 = vmul.f32 -1.442695, %v2180_v29 }
0x1e3e   :  { %4180 = vpow2.f32 %v3909_v58 }
0x1e42   :  { %v4179_v52 = vpop.eup %4178 }
0x1e43   :  { %2246 = vrot.lane.b32.xlu1 %v4179_v52, %s4517_s1 }
0x1e44   :  { %v4181_v61 = vpop.eup %4180 }
0x1e45   :  { %v2224_v34 = vadd.f32 1.0, %v4181_v61 }
0x1e47   :  { %4182 = vrcp.f32 %v2224_v34  ;;  %v2236_v46 = vand.u32 2147483648, %v2224_v34  ;;  %vm2230_vm7 = vweird.f32 %v2224_v34  ;;  %v2234_v45 = vand.u32 2147483647, %v2224_v34 }
0x1e49   :  { %v2237_v55 = vor.u32 1.1754944e-38, %v2236_v46  ;;  %vm2235_vm3 = vcmp.eq.f32.partialorder %v2234_v45, 8.507059e+37 }
0x1e4d   :  { %v4183_v32 = vpop.eup %4182 }
0x1e4e   :  { %v2226_v6 = vmul.f32 %v4183_v32, %v2224_v34  ;;  %vm2231_vm6 = vweird.f32 %v4183_v32 }
0x1e4f   :  { %vm2232_vm2 = vmor %vm2230_vm7, %vm2231_vm6 }
0x1e50   :  { %v2227_v9 = vsub.f32 1.0, %v2226_v6 }
0x1e52   :  { %v2228_v1 = vmul.f32 %v4183_v32, %v2227_v9 }
0x1e53   :  { %v5225_v56 = vpop.permute.xlu0 %2117 }
0x1e54   :  { %3906 = vmatmul.msk.f32.vlgmr.msrb.gmra.mxu0 %vm169_vm8, %v5225_v56  ;;  %v2229_v7 = vadd.f32 %v4183_v32, %v2228_v1 }
0x1e56   :  { %v2233_v23 = vsel %vm2232_vm2, %v4183_v32, %v2229_v7 }
0x1e57   :  { %v2238_v5 = vsel %vm2235_vm3, %v2237_v55, %v2233_v23 }
0x1e58   :  { %v2244_v59 = vmul.f32 %v2242_v57, %v2238_v5 }
0x1eb5   :  { %v2247_v24 = vpop.permute.xlu1 %2246 }
0x1eb6   :  { %v2249_v26 = vmul.f32 %v2247_v24, %v2238_v5 }
0x1eb8   :  { %2251 = vrot.lane.b32.xlu2 %v2249_v26, %s4517_s1 }
0x1ed1   :  { %v2145_v31 = vpop.f32.mrf.mxu0 }
0x1ed2   :  { %v2149_v50 = vrot.slane %v2145_v31, 6 }
0x1ed4   :  { %v2151_v51 = vadd.f32 %v2149_v50, %v5202_v49 }
0x1ed6   :  { %4184 = vtanh.f32 %v2151_v51  ;;  %v3908_v54 = vmul.f32 -1.442695, %v2151_v51 }
0x1ed8   :  { %4186 = vpow2.f32 %v3908_v54 }
0x1edc   :  { %v4185_v53 = vpop.eup %4184 }
0x1edd   :  { %2206 = vrot.lane.b32.xlu2 %v4185_v53, %s4517_s1 }
0x1ede   :  { %v4187_v2 = vpop.eup %4186 }
0x1edf   :  { %v2184_v60 = vadd.f32 1.0, %v4187_v2 }
0x1ee1   :  { %v2196_v12 = vand.u32 2147483648, %v2184_v60  ;;  %vm2190_vm5 = vweird.f32 %v2184_v60  ;;  %v2194_v48 = vand.u32 2147483647, %v2184_v60 }
0x1ee3   :  { %v2197_v16 = vor.u32 1.1754944e-38, %v2196_v12  ;;  %vm2195_vm7 = vcmp.eq.f32.partialorder %v2194_v48, 8.507059e+37 }
0x1f12   :  { %v2252_v13 = vpop.permute.xlu2 %2251 }
0x1f13   :  { %v5233_v8 = vadd.f32 %v2252_v13, %v2244_v59 }
0x1f15   :  { %4188 = vtanh.f32 %v5233_v8 }
0x1f16   :  { %4190 = vrcp.f32 %v2184_v60 }
0x1f1b   :  { %v4189_v62 = vpop.eup %4188 }
0x1f1c   :  { %2257 = vrot.lane.b32.xlu0 %v4189_v62, %s4517_s1  ;;  %v4191_v0 = vpop.eup %4190 }
0x1f1d   :  { %v2186_v40 = vmul.f32 %v4191_v0, %v2184_v60  ;;  %vm2191_vm4 = vweird.f32 %v4191_v0 }
0x1f1e   :  { %vm2192_vm6 = vmor %vm2190_vm5, %vm2191_vm4 }
0x1f1f   :  { %v2187_v10 = vsub.f32 1.0, %v2186_v40 }
0x1f21   :  { %v2188_v3 = vmul.f32 %v4191_v0, %v2187_v10  ;;  %v2390_v10 = vrot.slane %v5233_v8, 2 }
0x1f23   :  { %v2189_v15 = vadd.f32 %v4191_v0, %v2188_v3 }
0x1f25   :  { %v2193_v47 = vsel %vm2192_vm6, %v4191_v0, %v2189_v15 }
0x1f26   :  { %v2198_v25 = vsel %vm2195_vm7, %v2197_v16, %v2193_v47 }
0x1f27   :  { %v2204_v35 = vmul.f32 %v2202_v30, %v2198_v25 }
0x1f37   :  { %v2207_v18 = vpop.permute.xlu2 %2206 }
0x1f38   :  { %v2209_v21 = vmul.f32 %v2207_v18, %v2198_v25 }
0x1f3a   :  { %2211 = vrot.lane.b32.xlu0 %v2209_v21, %s4517_s1 }
0x1f8e   :  { %v2258_v43 = vpop.permute.xlu0 %2257 }
0x1f8f   :  { %v5238_v44 = vmul.f32 %v2258_v43, %v2238_v5 }
0x1f91   :  { %v2300_v17 = vrot.slane %v5238_v44, 4 }
0x1f93   :  { %2301 = vrot.lane.b32.xlu1 %v2300_v17, %s4518_s4 }
0x1fac   :  { %v2212_v39 = vpop.permute.xlu0 %2211 }
0x1fad   :  { %v5243_v28 = vadd.f32 %v2212_v39, %v2204_v35 }
0x1faf   :  { %4192 = vtanh.f32 %v5243_v28 }
0x1fb5   :  { %v4193_v37 = vpop.eup %4192 }
0x1fb6   :  { %2217 = vrot.lane.b32.xlu1 %v4193_v37, %s4517_s1 }
0x2005   :  { %v2302_v36 = vpop.permute.xlu1 %2301 }
0x2006   :  { %3911 = vmatmul.msk.f32.vlgmr.msra.gmra.mxu3 %vm169_vm8, %v2302_v36 }
0x2028   :  { %v2218_v42 = vpop.permute.xlu1 %2217 }
0x2029   :  { %v5248_v29 = vmul.f32 %v2218_v42, %v2198_v25  ;;  %v2350_v42 = vrot.slane %v5243_v28, 6 }
0x202b   :  { %v2271_v52 = vrot.slane %v5248_v29, 2 }
0x202d   :  { %2272 = vrot.lane.b32.xlu2 %v2271_v52, %s4518_s4 }
0x2087   :  { %v2273_v33 = vpop.permute.xlu2 %2272 }
0x2088   :  { %3910 = vmatmul.msk.f32.vlgmr.msra.gmra.mxu2 %vm169_vm8, %v2273_v33 }
0x2089   :  { %v2322_v58 = vpop.f32.mrf.mxu3 }
0x208a   :  { %v2326_v61 = vrot.slane %v2322_v58, 6 }
0x208c   :  { %v2328_v34 = vadd.f32 %v2326_v61, %v5061_v19 }
0x208e   :  { %4194 = vtanh.f32 %v2328_v34  ;;  %v3913_v6 = vmul.f32 -1.442695, %v2328_v34 }
0x2090   :  { %4196 = vpow2.f32 %v3913_v6 }
0x2094   :  { %v4195_v32 = vpop.eup %4194 }
0x2095   :  { %2394 = vrot.lane.b32.xlu0 %v4195_v32, %s4517_s1 }
0x2096   :  { %v4197_v9 = vpop.eup %4196 }
0x2097   :  { %v2372_v1 = vadd.f32 1.0, %v4197_v9 }
0x2099   :  { %4198 = vrcp.f32 %v2372_v1  ;;  %v2384_v5 = vand.u32 2147483648, %v2372_v1  ;;  %vm2378_vm3 = vweird.f32 %v2372_v1  ;;  %v2382_v24 = vand.u32 2147483647, %v2372_v1 }
0x209b   :  { %v2385_v31 = vor.u32 1.1754944e-38, %v2384_v5  ;;  %vm2383_vm5 = vcmp.eq.f32.partialorder %v2382_v24, 8.507059e+37 }
0x209f   :  { %v4199_v7 = vpop.eup %4198 }
0x20a0   :  { %v2374_v46 = vmul.f32 %v4199_v7, %v2372_v1  ;;  %vm2379_vm2 = vweird.f32 %v4199_v7 }
0x20a1   :  { %vm2380_vm4 = vmor %vm2378_vm3, %vm2379_vm2 }
0x20a2   :  { %v2375_v45 = vsub.f32 1.0, %v2374_v46 }
0x20a4   :  { %v2376_v23 = vmul.f32 %v4199_v7, %v2375_v45 }
0x20a6   :  { %v2377_v55 = vadd.f32 %v4199_v7, %v2376_v23 }
0x20a8   :  { %v2381_v26 = vsel %vm2380_vm4, %v4199_v7, %v2377_v55 }
0x20a9   :  { %v2386_v50 = vsel %vm2383_vm5, %v2385_v31, %v2381_v26 }
0x20aa   :  { %v2392_v3 = vmul.f32 %v2390_v10, %v2386_v50 }
0x2107   :  { %v2395_v51 = vpop.permute.xlu0 %2394 }
0x2108   :  { %v2397_v53 = vmul.f32 %v2395_v51, %v2386_v50 }
0x210a   :  { %2399 = vrot.lane.b32.xlu1 %v2397_v53, %s4517_s1 }
0x210b   :  { %v2293_v54 = vpop.f32.mrf.mxu2 }
0x210c   :  { %v2297_v57 = vrot.slane %v2293_v54, 4 }
0x210e   :  { %v2299_v59 = vadd.f32 %v2297_v57, %v5202_v49 }
0x2110   :  { %4200 = vtanh.f32 %v2299_v59  ;;  %v3912_v2 = vmul.f32 -1.442695, %v2299_v59 }
0x2112   :  { %4202 = vpow2.f32 %v3912_v2 }
0x2116   :  { %v4201_v13 = vpop.eup %4200 }
0x2117   :  { %2354 = vrot.lane.b32.xlu1 %v4201_v13, %s4517_s1 }
0x2118   :  { %v4203_v60 = vpop.eup %4202 }
0x2119   :  { %v2332_v62 = vadd.f32 1.0, %v4203_v60 }
0x211b   :  { %4204 = vrcp.f32 %v2332_v62  ;;  %v2344_v18 = vand.u32 2147483648, %v2332_v62  ;;  %vm2338_vm7 = vweird.f32 %v2332_v62  ;;  %v2342_v21 = vand.u32 2147483647, %v2332_v62 }
0x211d   :  { %v2345_v17 = vor.u32 1.1754944e-38, %v2344_v18  ;;  %vm2343_vm3 = vcmp.eq.f32.partialorder %v2342_v21, 8.507059e+37 }
0x2121   :  { %v4205_v0 = vpop.eup %4204 }
0x2122   :  { %v2334_v40 = vmul.f32 %v4205_v0, %v2332_v62  ;;  %vm2339_vm6 = vweird.f32 %v4205_v0 }
0x2123   :  { %vm2340_vm2 = vmor %vm2338_vm7, %vm2339_vm6 }
0x2124   :  { %v2335_v12 = vsub.f32 1.0, %v2334_v40 }
0x2126   :  { %v2336_v47 = vmul.f32 %v4205_v0, %v2335_v12 }
0x2128   :  { %v2337_v16 = vadd.f32 %v4205_v0, %v2336_v47 }
0x212a   :  { %v2341_v43 = vsel %vm2340_vm2, %v4205_v0, %v2337_v16 }
0x212b   :  { %v2346_v30 = vsel %vm2343_vm3, %v2345_v17, %v2341_v43 }
0x212c   :  { %v2352_v52 = vmul.f32 %v2350_v42, %v2346_v30 }
0x217c   :  { %v2400_v15 = vpop.permute.xlu1 %2399 }
0x217d   :  { %v5259_v48 = vadd.f32 %v2400_v15, %v2392_v3 }
0x217f   :  { %4206 = vtanh.f32 %v5259_v48 }
0x2185   :  { %v4207_v25 = vpop.eup %4206 }
0x2186   :  { %2405 = vrot.lane.b32.xlu2 %v4207_v25, %s4517_s1 }
0x2189   :  { %v2355_v8 = vpop.permute.xlu1 %2354 }
0x218a   :  { %v2357_v35 = vmul.f32 %v2355_v8, %v2346_v30 }
0x218e   :  { %2359 = vrot.lane.b32.xlu2 %v2357_v35, %s4517_s1 }
0x21e0   :  { %v2406_v39 = vpop.permute.xlu2 %2405 }
0x21e1   :  { %v5264_v37 = vmul.f32 %v2406_v39, %v2386_v50 }
0x21e3   :  { %v2448_v36 = vrot.slane %v5264_v37, 2 }
0x21e5   :  { %2449 = vrot.lane.b32.xlu0 %v2448_v36, %s4518_s4 }
0x21e8   :  { %v2360_v33 = vpop.permute.xlu2 %2359 }
0x21e9   :  { %v5269_v58 = vadd.f32 %v2360_v33, %v2352_v52  ;;  %v2578_v33 = vld [vmem:[#allocation8 + $0x70] sm:$0xff] }
0x21ea   :  { %2602 = vmatpush.msrb.mxu2 %v2578_v33 }
0x21eb   :  { %4208 = vtanh.f32 %v5269_v58 }
0x21f1   :  { %v4209_v61 = vpop.eup %4208 }
0x21f2   :  { %2365 = vrot.lane.b32.xlu0 %v4209_v61, %s4517_s1  ;;  %v2579_v61 = vld [vmem:[#allocation8 + $0x78] sm:$0xff] }
0x21f3   :  { %2625 = vmatpush.msrb.mxu3 %v2579_v61 }
0x2257   :  { %v2450_v34 = vpop.permute.xlu0 %2449 }
0x2258   :  { %3915 = vmatmul.msk.f32.vlgmr.msra.gmra.mxu1 %vm169_vm8, %v2450_v34  ;;  %v2576_v34 = vld [vmem:[#allocation8 + $0x60] sm:$0xff] }
0x2259   :  { %2603 = vmatpush.msrb.mxu2 %v2576_v34 }
0x2264   :  { %v2366_v32 = vpop.permute.xlu0 %2365 }
0x2265   :  { %v5274_v6 = vmul.f32 %v2366_v32, %v2346_v30  ;;  %v2575_v32 = vld [vmem:[#allocation8 + $0x58] sm:$0xff] }
0x2267   :  { %v2419_v9 = vrot.slane %v5274_v6, 4 }
0x2269   :  { %2420 = vrot.lane.b32.xlu1 %v2419_v9, %s4518_s4  ;;  %v2495_v9 = vrot.slane %v5269_v58, 6  ;;  %v2570_v58 = vld [vmem:[#allocation8 + $0x30] sm:$0xff] }
0x22d5   :  { %v2470_v28 = vpop.f32.mrf.mxu1 }
0x22d6   :  { %v2473_v1 = vadd.f32 %v2470_v28, %v5061_v19  ;;  %v2572_v28 = vld [vmem:[#allocation8 + $0x40] sm:$0xff] }
0x22d8   :  { %4210 = vtanh.f32 %v2473_v1  ;;  %v3917_v45 = vmul.f32 -1.442695, %v2473_v1  ;;  %v2573_v1 = vld [vmem:[#allocation8 + $0x48] sm:$0xff] }
0x22da   :  { %4212 = vpow2.f32 %v3917_v45 }
0x22db   :  { %v2421_v7 = vpop.permute.xlu1 %2420 }
0x22dc   :  { %3914 = vmatmul.msk.f32.vlgmr.msra.gmra.mxu0 %vm169_vm8, %v2421_v7 }
0x22de   :  { %v4211_v46 = vpop.eup %4210 }
0x22df   :  { %2539 = vrot.lane.b32.xlu2 %v4211_v46, %s4517_s1 }
0x22e0   :  { %v4213_v23 = vpop.eup %4212 }
0x22e1   :  { %v2517_v55 = vadd.f32 1.0, %v4213_v23 }
0x22e3   :  { %4214 = vrcp.f32 %v2517_v55  ;;  %v2529_v50 = vand.u32 2147483648, %v2517_v55  ;;  %vm2523_vm5 = vweird.f32 %v2517_v55  ;;  %v2527_v51 = vand.u32 2147483647, %v2517_v55 }
0x22e5   :  { %vm2528_vm7 = vcmp.eq.f32.partialorder %v2527_v51, 8.507059e+37  ;;  %v2565_v51 = vld [vmem:[#allocation8 + $0x8] sm:$0xff] }
0x22e7   :  { %1680 = vrot.lane.b32.xlu2 %v5125_v4, %s4518_s4  ;;  %v2530_v4 = vor.u32 1.1754944e-38, %v2529_v50  ;;  %v2564_v50 = vld [vmem:[#allocation8] sm:$0xff] }
0x22e9   :  { %v4215_v5 = vpop.eup %4214 }
0x22ea   :  { %v2519_v19 = vmul.f32 %v4215_v5, %v2517_v55  ;;  %vm2524_vm4 = vweird.f32 %v4215_v5 }
0x22eb   :  { %vm2525_vm6 = vmor %vm2523_vm5, %vm2524_vm4 }
0x22ec   :  { %v2520_v24 = vsub.f32 1.0, %v2519_v19  ;;  %v2568_v19 = vld [vmem:[#allocation8 + $0x20] sm:$0xff] }
0x22ee   :  { %v2521_v26 = vmul.f32 %v4215_v5, %v2520_v24  ;;  %v2569_v24 = vld [vmem:[#allocation8 + $0x28] sm:$0xff] }
0x22ef   :  { %2122 = vrot.lane.b32.xlu2 %v5212_v41, %s4519_s11 }
0x22f0   :  { %v2522_v31 = vadd.f32 %v4215_v5, %v2521_v26  ;;  %v2566_v26 = vld [vmem:[#allocation8 + $0x10] sm:$0xff] }
0x22f2   :  { %v2526_v53 = vsel %vm2525_vm6, %v4215_v5, %v2522_v31  ;;  %v2571_v5 = vld [vmem:[#allocation8 + $0x38] sm:$0xff] }
0x22f3   :  { %v2531_v54 = vsel %vm2528_vm7, %v2530_v4, %v2526_v53  ;;  %v2567_v31 = vld [vmem:[#allocation8 + $0x18] sm:$0xff]  ;;  %v5331_v53 = vld [vmem:[#allocation9 + $0x10] sm:$0xff]  ;;  %v5339_v4 = vld [vmem:[#allocation9] sm:$0xff] }
0x2339   :  { %v2540_v41 = vpop.permute.xlu2 %2539 }
0x233a   :  { %v2542_v57 = vmul.f32 %v2540_v41, %v2531_v54 }
0x233c   :  { %2544 = vrot.lane.b32.xlu0 %v2542_v57, %s4517_s1 }
0x2341   :  { %v1681_v59 = vpop.permute.xlu2 %1680 }
0x2342   :  { %1683 = vst.msk [vmem:[#allocation2] sm:$0xc] %vm443_vm10, %v1681_v59 }
0x2344   :  { %1828 = vrot.lane.b32.xlu0 %v5159_v38, %s4518_s4  ;;  %v2535_v38 = vrot.slane %v5259_v48, 2 }
0x2346   :  { %v2537_v40 = vmul.f32 %v2535_v38, %v2531_v54  ;;  %v5375_v38 = vld [vmem:[#allocation11 + $0x10] sm:$0xff] }
0x2349   :  { %v2123_v52 = vpop.permute.xlu2 %2122 }
0x234c   :  { %2267 = vrot.lane.b32.xlu0 %v5238_v44, %s4519_s11 }
0x2359   :  { %v2441_v13 = vpop.f32.mrf.mxu0 }
0x235a   :  { %v2445_v2 = vrot.slane %v2441_v13, 2 }
0x235c   :  { %v2447_v60 = vadd.f32 %v2445_v2, %v5202_v49 }
0x235e   :  { %4216 = vtanh.f32 %v2447_v60  ;;  %v3916_v0 = vmul.f32 -1.442695, %v2447_v60 }
0x2360   :  { %4218 = vpow2.f32 %v3916_v0  ;;  %v5373_v0 = vld [vmem:[%s5724_s12] sm:$0x3] }
0x2364   :  { %v4217_v62 = vpop.eup %4216 }
0x2365   :  { %2499 = vrot.lane.b32.xlu0 %v4217_v62, %s4517_s1  ;;  %v5366_v62 = vld [vmem:[#allocation11 + $0x18] sm:$0xff] }
0x2366   :  { %v4219_v3 = vpop.eup %4218  ;;  %2681 = vmatpush.msrb.mxu1 %v5366_v62 }
0x2367   :  { %v2477_v12 = vadd.f32 1.0, %v4219_v3 }
0x2368   :  { %2682 = vmatpush.msrb.mxu1 %v5375_v38 }
0x2369   :  { %v2489_v18 = vand.u32 2147483648, %v2477_v12  ;;  %vm2483_vm3 = vweird.f32 %v2477_v12  ;;  %v2487_v21 = vand.u32 2147483647, %v2477_v12 }
0x236b   :  { %v2490_v17 = vor.u32 1.1754944e-38, %v2489_v18  ;;  %vm2488_vm5 = vcmp.eq.f32.partialorder %v2487_v21, 8.507059e+37 }
0x236d   :  { %1540 = vrot.lane.b32.xlu0 %v5080_v63, %s4519_s11 }
0x2375   :  { %1978 = vrot.lane.b32.xlu0 %v5181_v14, %s4519_s11 }
0x23ae   :  { %v2545_v44 = vpop.permute.xlu0 %2544 }
0x23af   :  { %v2547_v10 = vadd.f32 %v2545_v44, %v2537_v40  ;;  %v5377_v40 = vld [vmem:[#allocation11 + $0x8] sm:$0xff]  ;;  %v2584_v44 = vperm.slane %v5373_v0, 0 }
0x23b0   :  { %2683 = vmatpush.msrb.mxu1 %v5377_v40 }
0x23b1   :  { %4220 = vtanh.f32 %v2547_v10  ;;  %v5382_v10 = vld [vmem:[#allocation11] sm:$0xff] }
0x23b2   :  { %4222 = vrcp.f32 %v2477_v12  ;;  %2684 = vmatpush.msrb.mxu1 %v5382_v10 }
0x23b3   :  { %2685 = vmatmul.f32.vlgmr.msrb.gmra.mxu1 %v4516_v11 }
0x23b4   :  { %2820 = vmatpush.msra.mxu1 %v5366_v62 }
0x23b6   :  { %v1829_v49 = vpop.permute.xlu0 %1828  ;;  %2821 = vmatpush.msra.mxu1 %v5375_v38 }
0x23b7   :  { %v4221_v15 = vpop.eup %4220  ;;  %1831 = vst.msk [vmem:[#allocation2] sm:$0x30] %vm593_vm12, %v1829_v49 }
0x23b8   :  { %2550 = vrot.lane.b32.xlu1 %v4221_v15, %s4517_s1  ;;  %v4223_v14 = vpop.eup %4222  ;;  %2822 = vmatpush.msra.mxu1 %v5377_v40 }
0x23b9   :  { %v2479_v48 = vmul.f32 %v4223_v14, %v2477_v12  ;;  %vm2484_vm2 = vweird.f32 %v4223_v14 }
0x23ba   :  { %vm2485_vm4 = vmor %vm2483_vm3, %vm2484_vm2  ;;  %2823 = vmatpush.msra.mxu1 %v5382_v10 }
0x23bb   :  { %v2480_v47 = vsub.f32 1.0, %v2479_v48 }
0x23bc   :  { %2968 = vmatpush.msrb.mxu1 %v5366_v62 }
0x23bd   :  { %v2481_v16 = vmul.f32 %v4223_v14, %v2480_v47 }
0x23be   :  { %v2268_v63 = vpop.permute.xlu0 %2267  ;;  %2969 = vmatpush.msrb.mxu1 %v5375_v38 }
0x23bf   :  { %2270 = vst.msk [vmem:[#allocation2] sm:$0x30] %vm449_vm13, %v2268_v63  ;;  %v2482_v25 = vadd.f32 %v4223_v14, %v2481_v16 }
0x23c0   :  { %1973 = vrot.lane.b32.xlu1 %v5191_v20, %s4518_s4  ;;  %2970 = vmatpush.msrb.mxu1 %v5377_v40 }
0x23c1   :  { %v2486_v43 = vsel %vm2485_vm4, %v4223_v14, %v2482_v25 }
0x23c2   :  { %v5305_v8 = vsel %vm2488_vm5, %v2490_v17, %v2486_v43  ;;  %2971 = vmatpush.msrb.mxu1 %v5382_v10 }
0x23c3   :  { %v2497_v7 = vmul.f32 %v2495_v9, %v5305_v8 }
0x23c8   :  { %2415 = vrot.lane.b32.xlu1 %v5264_v37, %s4519_s11 }
0x23d7   :  { %v2500_v30 = vpop.permute.xlu0 %2499 }
0x23d8   :  { %v2502_v20 = vmul.f32 %v2500_v30, %v5305_v8 }
0x23da   :  { %2504 = vrot.lane.b32.xlu1 %v2502_v20, %s4517_s1 }
0x23df   :  { %v1541_v35 = vpop.permute.xlu0 %1540 }
0x23e0   :  { %1543 = vst.msk [vmem:[#allocation2 + $0x8] sm:$0xc0] %vm302_vm14, %v1541_v35 }
0x23e2   :  { %1685 = vrot.lane.b32.xlu1 %v5111_v22, %s4519_s11 }
0x23e7   :  { %v1979_v39 = vpop.permute.xlu0 %1978 }
0x23e8   :  { %1981 = vst.msk [vmem:[#allocation2 + $0x8] sm:$0x3] %vm746_vm15, %v1979_v39 }
0x23e9   :  { %2120 = vst.msk [vmem:[#allocation2 + $0x8] sm:$0x3] %vm296_vm9, %v5225_v56  ;;  %v2577_v56 = vld [vmem:[#allocation8 + $0x68] sm:$0xff] }
0x23ea   :  { %2262 = vrot.lane.b32.xlu1 %v5248_v29, %s4518_s4  ;;  %v2574_v29 = vld [vmem:[#allocation8 + $0x50] sm:$0xff]  ;;  %2626 = vmatpush.msrb.mxu3 %v2577_v56 }
0x23eb   :  { %2604 = vmatpush.msrb.mxu2 %v2574_v29 }
0x23ec   :  { %2627 = vmatpush.msrb.mxu3 %v2575_v32 }
0x23ed   :  { %2605 = vmatpush.msrb.mxu2 %v2572_v28 }
0x23ee   :  { %2628 = vmatpush.msrb.mxu3 %v2573_v1 }
0x23ef   :  { %2606 = vmatpush.msrb.mxu2 %v2570_v58 }
0x23f0   :  { %2629 = vmatpush.msrb.mxu3 %v2571_v5 }
0x23f1   :  { %2607 = vmatpush.msrb.mxu2 %v2568_v19 }
0x23f2   :  { %2630 = vmatpush.msrb.mxu3 %v2569_v24 }
0x23f3   :  { %2608 = vmatpush.msrb.mxu2 %v2566_v26 }
0x23f4   :  { %2631 = vmatpush.msrb.mxu3 %v2567_v31 }
0x23f5   :  { %2609 = vmatpush.msrb.mxu2 %v2564_v50 }
0x23f6   :  { %2632 = vmatpush.msrb.mxu3 %v2565_v51 }
0x23f8   :  { %3116 = vmatpush.msra.mxu3 %v5366_v62 }
0x23fa   :  { %3117 = vmatpush.msra.mxu3 %v5375_v38 }
0x23fc   :  { %3118 = vmatpush.msra.mxu3 %v5377_v40 }
0x23fe   :  { %3119 = vmatpush.msra.mxu3 %v5382_v10 }
0x242a   :  { %v2551_v37 = vpop.permute.xlu1 %2550 }
0x242b   :  { %v2553_v36 = vmul.f32 %v2551_v37, %v2531_v54 }
0x242d   :  { %2560 = vrot.lane.b32.xlu2 %v2553_v36, %s4519_s11 }
0x2432   :  { %v1974_v42 = vpop.permute.xlu1 %1973 }
0x2433   :  { %1976 = vst.msk [vmem:[#allocation2] sm:$0xc0] %vm740_vm0, %v1974_v42 }
0x2434   :  { %2125 = vst.msk [vmem:[#allocation2] sm:$0xc0] %vm302_vm14, %v2123_v52  ;;  %v2686_v52 = vpop.f32.mrf.mxu1 }
0x2435   :  { %v2690_v33 = vrot.slane %v2686_v52, 2 }
0x243a   :  { %v2416_v22 = vpop.permute.xlu1 %2415 }
0x243b   :  { %2418 = vst.msk [vmem:[#allocation2] sm:$0xc] %vm599_vm11, %v2416_v22  ;;  %v2585_v22 = vperm.slane %v5373_v0, 1 }
0x244c   :  { %v2505_v46 = vpop.permute.xlu1 %2504 }
0x244d   :  { %v2507_v45 = vadd.f32 %v2505_v46, %v2497_v7 }
0x244f   :  { %4224 = vtanh.f32 %v2507_v45 }
0x2454   :  { %v1686_v23 = vpop.permute.xlu1 %1685 }
0x2455   :  { %v4225_v55 = vpop.eup %4224  ;;  %1688 = vst.msk [vmem:[#allocation2 + $0x8] sm:$0x30] %vm449_vm13, %v1686_v23 }
0x2456   :  { %2510 = vrot.lane.b32.xlu2 %v4225_v55, %s4517_s1 }
0x245c   :  { %v2263_v2 = vpop.permute.xlu1 %2262 }
0x245e   :  { %1833 = vrot.lane.b32.xlu2 %v5145_v27, %s4519_s11  ;;  %v5329_v27 = vld [vmem:[#allocation9 + $0x18] sm:$0xff] }
0x245f   :  { %2660 = vmatpush.msrb.mxu0 %v5329_v27  ;;  %3087 = vmatpush.msra.mxu2 %v5329_v27 }
0x2461   :  { %2661 = vmatpush.msrb.mxu0 %v5331_v53  ;;  %3088 = vmatpush.msra.mxu2 %v5331_v53 }
0x2466   :  { %2410 = vrot.lane.b32.xlu2 %v5274_v6, %s4518_s4  ;;  %v5335_v6 = vld [vmem:[#allocation9 + $0x8] sm:$0xff] }
0x2467   :  { %2662 = vmatpush.msrb.mxu0 %v5335_v6  ;;  %3089 = vmatpush.msra.mxu2 %v5335_v6 }
0x2469   :  { %2663 = vmatpush.msrb.mxu0 %v5339_v4  ;;  %3090 = vmatpush.msra.mxu2 %v5339_v4 }
0x246a   :  { %2664 = vmatmul.f32.vlgmr.msrb.gmra.mxu0 %v4516_v11 }
0x246b   :  { %2791 = vmatpush.msra.mxu0 %v5329_v27 }
0x246d   :  { %2792 = vmatpush.msra.mxu0 %v5331_v53 }
0x246f   :  { %2793 = vmatpush.msra.mxu0 %v5335_v6 }
0x2471   :  { %2794 = vmatpush.msra.mxu0 %v5339_v4 }
0x2473   :  { %2939 = vmatpush.msrb.mxu0 %v5329_v27 }
0x2475   :  { %2940 = vmatpush.msrb.mxu0 %v5331_v53 }
0x2477   :  { %2941 = vmatpush.msrb.mxu0 %v5335_v6 }
0x2479   :  { %2942 = vmatpush.msrb.mxu0 %v5339_v4 }
0x2487   :  { %v2561_v54 = vpop.permute.xlu2 %2560 }
0x2488   :  { %2563 = vst.msk [vmem:[#allocation2] sm:$0x3] %vm746_vm15, %v2561_v54 }
0x248f   :  { %v2581_v41 = vld [vmem:[#allocation2] sm:$0xff] }
0x2490   :  { %3918 = vmatmul.msk.f32.vlgmr.msrb.gmra.mxu2 %vm1354_vm1, %v2581_v41  ;;  %3920 = vmatmul.msk.f32.vlgmr.msrb.gmra.mxu3 %vm1354_vm1, %v2581_v41 }
0x2491   :  { %3373 = vmatpush.msrb.mxu2 %v5329_v27  ;;  %3402 = vmatpush.msrb.mxu3 %v5366_v62 }
0x2493   :  { %3374 = vmatpush.msrb.mxu2 %v5331_v53  ;;  %3403 = vmatpush.msrb.mxu3 %v5375_v38 }
0x2495   :  { %3375 = vmatpush.msrb.mxu2 %v5335_v6  ;;  %3404 = vmatpush.msrb.mxu3 %v5377_v40 }
0x2497   :  { %3376 = vmatpush.msrb.mxu2 %v5339_v4  ;;  %3405 = vmatpush.msrb.mxu3 %v5382_v10 }
0x24b0   :  { %v2511_v57 = vpop.permute.xlu2 %2510 }
0x24b1   :  { %v2513_v59 = vmul.f32 %v2511_v57, %v5305_v8 }
0x24b3   :  { %2555 = vrot.lane.b32.xlu0 %v2513_v59, %s4518_s4 }
0x24b8   :  { %v1834_v13 = vpop.permute.xlu2 %1833 }
0x24b9   :  { %1836 = vst.msk [vmem:[#allocation2 + $0x8] sm:$0xc] %vm599_vm11, %v1834_v13 }
0x24ba   :  { %2265 = vst.msk [vmem:[#allocation2 + $0x8] sm:$0xc] %vm443_vm10, %v2263_v2 }
0x24c0   :  { %v2411_v60 = vpop.permute.xlu2 %2410 }
0x24c1   :  { %2413 = vst.msk [vmem:[#allocation2 + $0x8] sm:$0x30] %vm593_vm12, %v2411_v60 }
0x24e7   :  { %v2665_v49 = vpop.f32.mrf.mxu0 }
0x2513   :  { %v2611_v3 = vpop.f32.mrf.mxu2  ;;  %v5411_v42 = vpop.f32.mrf.mxu3 }
0x2514   :  { %v5390_v15 = vadd.f32 %v2611_v3, %v2584_v44 }
0x2516   :  { %v2668_v12 = vadd.f32 %v2665_v49, %v5390_v15 }
0x2518   :  { %4226 = vtanh.f32 %v2668_v12  ;;  %v3922_v48 = vmul.f32 -1.442695, %v2668_v12 }
0x251a   :  { %4228 = vpow2.f32 %v3922_v48 }
0x251e   :  { %v4227_v11 = vpop.eup %4226 }
0x251f   :  { %2715 = vrot.lane.b32.xlu1 %v4227_v11, %s4517_s1 }
0x2520   :  { %v4229_v47 = vpop.eup %4228 }
0x2521   :  { %v2696_v16 = vadd.f32 1.0, %v4229_v47 }
0x2523   :  { %4230 = vrcp.f32 %v2696_v16  ;;  %v2708_v8 = vand.u32 2147483648, %v2696_v16  ;;  %vm2702_vm7 = vweird.f32 %v2696_v16  ;;  %v2706_v30 = vand.u32 2147483647, %v2696_v16 }
0x2525   :  { %v2556_v63 = vpop.permute.xlu0 %2555  ;;  %v2709_v35 = vor.u32 1.1754944e-38, %v2708_v8  ;;  %vm2707_vm3 = vcmp.eq.f32.partialorder %v2706_v30, 8.507059e+37 }
0x2526   :  { %2558 = vst.msk [vmem:[#allocation2 + $0x8] sm:$0xc0] %vm740_vm0, %v2556_v63 }
0x2529   :  { %v4231_v25 = vpop.eup %4230 }
0x252a   :  { %v2698_v18 = vmul.f32 %v4231_v25, %v2696_v16  ;;  %vm2703_vm6 = vweird.f32 %v4231_v25 }
0x252b   :  { %vm2704_vm2 = vmor %vm2702_vm7, %vm2703_vm6 }
0x252c   :  { %v2699_v21 = vsub.f32 1.0, %v2698_v18 }
0x252d   :  { %v2582_v14 = vld [vmem:[#allocation2 + $0x8] sm:$0xff] }
0x252e   :  { %3919 = vmatmul.msk.f32.gmra.mxu2 %vm1354_vm1, %v2582_v14  ;;  %3921 = vmatmul.msk.f32.gmra.mxu3 %vm1354_vm1, %v2582_v14  ;;  %v2700_v43 = vmul.f32 %v4231_v25, %v2699_v21 }
0x2530   :  { %v2701_v17 = vadd.f32 %v4231_v25, %v2700_v43 }
0x2532   :  { %v2705_v20 = vsel %vm2704_vm2, %v4231_v25, %v2701_v17 }
0x2533   :  { %v2710_v37 = vsel %vm2707_vm3, %v2709_v35, %v2705_v20 }
0x2534   :  { %v2713_v9 = vmul.f32 0.0, %v2710_v37 }
0x2591   :  { %v2716_v39 = vpop.permute.xlu1 %2715 }
0x2592   :  { %v2718_v36 = vmul.f32 %v2716_v39, %v2710_v37 }
0x2594   :  { %2720 = vrot.lane.b32.xlu2 %v2718_v36, %s4517_s1 }
0x25b1   :  { %v2637_v61 = vpop.f32.mrf.mxu3 }
0x25b2   :  { %v5416_v34 = vadd.f32 %v2637_v61, %v2585_v22 }
0x25b4   :  { %v2692_v56 = vadd.f32 %v2690_v33, %v5416_v34 }
0x25b6   :  { %4232 = vtanh.f32 %v2692_v56  ;;  %v3923_v32 = vmul.f32 -1.442695, %v2692_v56 }
0x25b8   :  { %4234 = vpow2.f32 %v3923_v32 }
0x25bc   :  { %v4233_v29 = vpop.eup %4232 }
0x25bd   :  { %2752 = vrot.lane.b32.xlu2 %v4233_v29, %s4517_s1 }
0x25be   :  { %v4235_v7 = vpop.eup %4234 }
0x25bf   :  { %v2733_v45 = vadd.f32 1.0, %v4235_v7 }
0x25c1   :  { %v2745_v24 = vand.u32 2147483648, %v2733_v45  ;;  %vm2739_vm5 = vweird.f32 %v2733_v45  ;;  %v2743_v26 = vand.u32 2147483647, %v2733_v45 }
0x25c3   :  { %v2746_v50 = vor.u32 1.1754944e-38, %v2745_v24  ;;  %vm2744_vm7 = vcmp.eq.f32.partialorder %v2743_v26, 8.507059e+37 }
0x25ee   :  { %v2721_v28 = vpop.permute.xlu2 %2720 }
0x25ef   :  { %v5420_v1 = vadd.f32 %v2721_v28, %v2713_v9 }
0x25f1   :  { %4236 = vtanh.f32 %v5420_v1 }
0x25f2   :  { %4238 = vrcp.f32 %v2733_v45 }
0x25f7   :  { %v4237_v46 = vpop.eup %4236 }
0x25f8   :  { %2726 = vrot.lane.b32.xlu0 %v4237_v46, %s4517_s1  ;;  %v4239_v23 = vpop.eup %4238 }
0x25f9   :  { %v2735_v55 = vmul.f32 %v4239_v23, %v2733_v45  ;;  %vm2740_vm4 = vweird.f32 %v4239_v23 }
0x25fa   :  { %vm2741_vm6 = vmor %vm2739_vm5, %vm2740_vm4 }
0x25fb   :  { %v2736_v58 = vsub.f32 1.0, %v2735_v55  ;;  %v2853_v55 = vrot.slane %v5420_v1, 6 }
0x25fd   :  { %v2737_v5 = vmul.f32 %v4239_v23, %v2736_v58 }
0x25ff   :  { %v2738_v19 = vadd.f32 %v4239_v23, %v2737_v5 }
0x2601   :  { %v2742_v31 = vsel %vm2741_vm6, %v4239_v23, %v2738_v19 }
0x2602   :  { %v2747_v51 = vsel %vm2744_vm7, %v2746_v50, %v2742_v31 }
0x2603   :  { %v2750_v13 = vmul.f32 0.0, %v2747_v51 }
0x2617   :  { %v2753_v54 = vpop.permute.xlu2 %2752 }
0x2618   :  { %v2755_v41 = vmul.f32 %v2753_v54, %v2747_v51 }
0x261a   :  { %2757 = vrot.lane.b32.xlu0 %v2755_v41, %s4517_s1 }
0x266a   :  { %v2727_v57 = vpop.permute.xlu0 %2726 }
0x266b   :  { %v2729_v59 = vmul.f32 %v2727_v57, %v2710_v37 }
0x266d   :  { %2768 = vrot.lane.b32.xlu1 %v2729_v59, %s4518_s4 }
0x268c   :  { %v2758_v2 = vpop.permute.xlu0 %2757 }
0x268d   :  { %v5426_v60 = vadd.f32 %v2758_v2, %v2750_v13 }
0x268f   :  { %4240 = vtanh.f32 %v5426_v60 }
0x2695   :  { %v4241_v3 = vpop.eup %4240 }
0x2696   :  { %2763 = vrot.lane.b32.xlu1 %v4241_v3, %s4517_s1 }
0x26df   :  { %v2769_v49 = vpop.permute.xlu1 %2768 }
0x26e0   :  { %2771 = vst.msk [vmem:[#allocation2] sm:$0x3] %vm296_vm9, %v2769_v49  ;;  %3924 = vmatmul.msk.f32.vlgmr.msra.gmra.mxu0 %vm169_vm8, %v2769_v49 }
0x26e1   :  { %3232 = vmatpush.msra.mxu0 %v5329_v27 }
0x26e3   :  { %3233 = vmatpush.msra.mxu0 %v5331_v53 }
0x26e5   :  { %3234 = vmatpush.msra.mxu0 %v5335_v6 }
0x26e7   :  { %3235 = vmatpush.msra.mxu0 %v5339_v4 }
0x2708   :  { %v2764_v12 = vpop.permute.xlu1 %2763 }
0x2709   :  { %v5436_v11 = vmul.f32 %v2764_v12, %v2747_v51 }
0x270b   :  { %v2803_v63 = vrot.slane %v5436_v11, 6 }
0x270d   :  { %2804 = vrot.lane.b32.xlu2 %v2803_v63, %s4518_s4  ;;  %v2893_v63 = vrot.slane %v5426_v60, 2 }
0x275d   :  { %v2796_v14 = vpop.f32.mrf.mxu0 }
0x275e   :  { %v2800_v48 = vrot.slane %v2796_v14, 6 }
0x2760   :  { %v2802_v47 = vadd.f32 %v2800_v48, %v5390_v15 }
0x2762   :  { %4242 = vtanh.f32 %v2802_v47  ;;  %v3926_v18 = vmul.f32 -1.442695, %v2802_v47 }
0x2764   :  { %4244 = vpow2.f32 %v3926_v18 }
0x2767   :  { %v2805_v16 = vpop.permute.xlu2 %2804 }
0x2768   :  { %v4243_v25 = vpop.eup %4242  ;;  %3925 = vmatmul.msk.f32.vlgmr.msra.gmra.mxu1 %vm169_vm8, %v2805_v16 }
0x2769   :  { %2857 = vrot.lane.b32.xlu0 %v4243_v25, %s4517_s1  ;;  %3257 = vmatpush.msra.mxu1 %v5366_v62 }
0x276a   :  { %v4245_v21 = vpop.eup %4244 }
0x276b   :  { %3258 = vmatpush.msra.mxu1 %v5375_v38  ;;  %v2835_v43 = vadd.f32 1.0, %v4245_v21 }
0x276d   :  { %3259 = vmatpush.msra.mxu1 %v5377_v40  ;;  %4246 = vrcp.f32 %v2835_v43  ;;  %v2847_v39 = vand.u32 2147483648, %v2835_v43  ;;  %vm2841_vm3 = vweird.f32 %v2835_v43  ;;  %v2845_v37 = vand.u32 2147483647, %v2835_v43 }
0x276f   :  { %3260 = vmatpush.msra.mxu1 %v5382_v10  ;;  %v2848_v52 = vor.u32 1.1754944e-38, %v2847_v39  ;;  %vm2846_vm5 = vcmp.eq.f32.partialorder %v2845_v37, 8.507059e+37 }
0x2773   :  { %v4247_v17 = vpop.eup %4246 }
0x2774   :  { %v2837_v8 = vmul.f32 %v4247_v17, %v2835_v43  ;;  %vm2842_vm2 = vweird.f32 %v4247_v17 }
0x2775   :  { %vm2843_vm4 = vmor %vm2841_vm3, %vm2842_vm2 }
0x2776   :  { %v2838_v30 = vsub.f32 1.0, %v2837_v8 }
0x2778   :  { %v2839_v20 = vmul.f32 %v4247_v17, %v2838_v30 }
0x277a   :  { %v2840_v35 = vadd.f32 %v4247_v17, %v2839_v20 }
0x277c   :  { %v2844_v36 = vsel %vm2843_vm4, %v4247_v17, %v2840_v35 }
0x277d   :  { %v2849_v33 = vsel %vm2846_vm5, %v2848_v52, %v2844_v36 }
0x277e   :  { %v2855_v58 = vmul.f32 %v2853_v55, %v2849_v33 }
0x27db   :  { %v2858_v61 = vpop.permute.xlu0 %2857 }
0x27dc   :  { %v2860_v56 = vmul.f32 %v2858_v61, %v2849_v33 }
0x27de   :  { %2862 = vrot.lane.b32.xlu1 %v2860_v56, %s4517_s1 }
0x27e5   :  { %v2825_v29 = vpop.f32.mrf.mxu1 }
0x27e6   :  { %v2829_v32 = vrot.slane %v2825_v29, 4 }
0x27e8   :  { %v2831_v9 = vadd.f32 %v2829_v32, %v5416_v34 }
0x27ea   :  { %4248 = vtanh.f32 %v2831_v9  ;;  %v3927_v7 = vmul.f32 -1.442695, %v2831_v9 }
0x27ec   :  { %4250 = vpow2.f32 %v3927_v7 }
0x27f0   :  { %v4249_v28 = vpop.eup %4248 }
0x27f1   :  { %2897 = vrot.lane.b32.xlu1 %v4249_v28, %s4517_s1 }
0x27f2   :  { %v4251_v46 = vpop.eup %4250 }
0x27f3   :  { %v2875_v45 = vadd.f32 1.0, %v4251_v46 }
0x27f5   :  { %4252 = vrcp.f32 %v2875_v45  ;;  %v2887_v54 = vand.u32 2147483648, %v2875_v45  ;;  %vm2881_vm7 = vweird.f32 %v2875_v45  ;;  %v2885_v41 = vand.u32 2147483647, %v2875_v45 }
0x27f7   :  { %v2888_v1 = vor.u32 1.1754944e-38, %v2887_v54  ;;  %vm2886_vm3 = vcmp.eq.f32.partialorder %v2885_v41, 8.507059e+37 }
0x27fb   :  { %v4253_v23 = vpop.eup %4252 }
0x27fc   :  { %v2877_v19 = vmul.f32 %v4253_v23, %v2875_v45  ;;  %vm2882_vm6 = vweird.f32 %v4253_v23 }
0x27fd   :  { %vm2883_vm2 = vmor %vm2881_vm7, %vm2882_vm6 }
0x27fe   :  { %v2878_v26 = vsub.f32 1.0, %v2877_v19 }
0x2800   :  { %v2879_v31 = vmul.f32 %v4253_v23, %v2878_v26 }
0x2802   :  { %v2880_v51 = vadd.f32 %v4253_v23, %v2879_v31 }
0x2804   :  { %v2884_v57 = vsel %vm2883_vm2, %v4253_v23, %v2880_v51 }
0x2805   :  { %v2889_v59 = vsel %vm2886_vm3, %v2888_v1, %v2884_v57 }
0x2806   :  { %v2895_v14 = vmul.f32 %v2893_v63, %v2889_v59 }
0x2850   :  { %v2863_v5 = vpop.permute.xlu1 %2862 }
0x2851   :  { %v5451_v24 = vadd.f32 %v2863_v5, %v2855_v58 }
0x2853   :  { %4254 = vtanh.f32 %v5451_v24  ;;  %v3001_v19 = vrot.slane %v5451_v24, 6 }
0x2859   :  { %v4255_v50 = vpop.eup %4254 }
0x285a   :  { %2868 = vrot.lane.b32.xlu2 %v4255_v50, %s4517_s1 }
0x2863   :  { %v2898_v13 = vpop.permute.xlu1 %2897 }
0x2864   :  { %v2900_v2 = vmul.f32 %v2898_v13, %v2889_v59 }
0x2866   :  { %2902 = vrot.lane.b32.xlu2 %v2900_v2, %s4517_s1 }
0x28b4   :  { %v2869_v3 = vpop.permute.xlu2 %2868 }
0x28b5   :  { %v5456_v49 = vmul.f32 %v2869_v3, %v2849_v33 }
0x28b7   :  { %v2922_v12 = vrot.slane %v5456_v49, 2 }
0x28b9   :  { %2923 = vrot.lane.b32.xlu0 %v2922_v12, %s4518_s4 }
0x28c0   :  { %v2903_v48 = vpop.permute.xlu2 %2902 }
0x28c1   :  { %v5461_v47 = vadd.f32 %v2903_v48, %v2895_v14 }
0x28c3   :  { %4256 = vtanh.f32 %v5461_v47 }
0x28c9   :  { %v4257_v16 = vpop.eup %4256 }
0x28ca   :  { %2908 = vrot.lane.b32.xlu0 %v4257_v16, %s4517_s1 }
0x292b   :  { %v2924_v25 = vpop.permute.xlu0 %2923 }
0x292c   :  { %3928 = vmatmul.msk.f32.vlgmr.msrb.gmra.mxu0 %vm169_vm8, %v2924_v25 }
0x292d   :  { %3521 = vmatpush.msrb.mxu0 %v5329_v27 }
0x292f   :  { %3522 = vmatpush.msrb.mxu0 %v5331_v53 }
0x2931   :  { %3523 = vmatpush.msrb.mxu0 %v5335_v6 }
0x2933   :  { %3524 = vmatpush.msrb.mxu0 %v5339_v4 }
0x293c   :  { %v2909_v60 = vpop.permute.xlu0 %2908 }
0x293d   :  { %v5470_v18 = vmul.f32 %v2909_v60, %v2889_v59 }
0x293f   :  { %v2951_v21 = vrot.slane %v5470_v18, 4 }
0x2941   :  { %2952 = vrot.lane.b32.xlu1 %v2951_v21, %s4518_s4 }
0x29a9   :  { %v2944_v43 = vpop.f32.mrf.mxu0 }
0x29aa   :  { %v2948_v17 = vrot.slane %v2944_v43, 4 }
0x29ac   :  { %v2950_v8 = vadd.f32 %v2948_v17, %v5390_v15  ;;  %v3041_v17 = vrot.slane %v5461_v47, 2 }
0x29ae   :  { %4258 = vtanh.f32 %v2950_v8  ;;  %v3930_v35 = vmul.f32 -1.442695, %v2950_v8 }
0x29b0   :  { %4260 = vpow2.f32 %v3930_v35 }
0x29b3   :  { %v2953_v30 = vpop.permute.xlu1 %2952 }
0x29b4   :  { %v4259_v20 = vpop.eup %4258  ;;  %3929 = vmatmul.msk.f32.vlgmr.msrb.gmra.mxu1 %vm169_vm8, %v2953_v30 }
0x29b5   :  { %3005 = vrot.lane.b32.xlu2 %v4259_v20, %s4517_s1  ;;  %3550 = vmatpush.msrb.mxu1 %v5366_v62 }
0x29b6   :  { %v4261_v39 = vpop.eup %4260 }
0x29b7   :  { %3551 = vmatpush.msrb.mxu1 %v5375_v38  ;;  %v2983_v37 = vadd.f32 1.0, %v4261_v39 }
0x29b9   :  { %3552 = vmatpush.msrb.mxu1 %v5377_v40  ;;  %4262 = vrcp.f32 %v2983_v37  ;;  %v2995_v29 = vand.u32 2147483648, %v2983_v37  ;;  %vm2989_vm5 = vweird.f32 %v2983_v37  ;;  %v2993_v32 = vand.u32 2147483647, %v2983_v37 }
0x29bb   :  { %3553 = vmatpush.msrb.mxu1 %v5382_v10  ;;  %v2996_v28 = vor.u32 1.1754944e-38, %v2995_v29  ;;  %vm2994_vm7 = vcmp.eq.f32.partialorder %v2993_v32, 8.507059e+37 }
0x29bf   :  { %v4263_v36 = vpop.eup %4262 }
0x29c0   :  { %v2985_v52 = vmul.f32 %v4263_v36, %v2983_v37  ;;  %vm2990_vm4 = vweird.f32 %v4263_v36 }
0x29c1   :  { %vm2991_vm6 = vmor %vm2989_vm5, %vm2990_vm4 }
0x29c2   :  { %v2986_v33 = vsub.f32 1.0, %v2985_v52  ;;  %v5508_v52 = vpop.f32.mrf.mxu2 }
0x29c4   :  { %v2987_v61 = vmul.f32 %v4263_v36, %v2986_v33 }
0x29c6   :  { %v2988_v56 = vadd.f32 %v4263_v36, %v2987_v61 }
0x29c8   :  { %v2992_v9 = vsel %vm2991_vm6, %v4263_v36, %v2988_v56 }
0x29c9   :  { %v2997_v7 = vsel %vm2994_vm7, %v2996_v28, %v2992_v9 }
0x29ca   :  { %v3003_v31 = vmul.f32 %v3001_v19, %v2997_v7 }
0x2a0f   :  { %v3006_v46 = vpop.permute.xlu2 %3005 }
0x2a10   :  { %v3008_v45 = vmul.f32 %v3006_v46, %v2997_v7 }
0x2a12   :  { %3010 = vrot.lane.b32.xlu0 %v3008_v45, %s4517_s1 }
0x2a31   :  { %v2973_v23 = vpop.f32.mrf.mxu1 }
0x2a32   :  { %v2977_v55 = vrot.slane %v2973_v23, 6 }
0x2a34   :  { %v2979_v58 = vadd.f32 %v2977_v55, %v5416_v34 }
0x2a36   :  { %4264 = vtanh.f32 %v2979_v58  ;;  %v3931_v26 = vmul.f32 -1.442695, %v2979_v58 }
0x2a38   :  { %4266 = vpow2.f32 %v3931_v26 }
0x2a3c   :  { %v4265_v5 = vpop.eup %4264 }
0x2a3d   :  { %3045 = vrot.lane.b32.xlu0 %v4265_v5, %s4517_s1 }
0x2a3e   :  { %v4267_v54 = vpop.eup %4266 }
0x2a3f   :  { %v3023_v57 = vadd.f32 1.0, %v4267_v54 }
0x2a41   :  { %v3035_v24 = vand.u32 2147483648, %v3023_v57  ;;  %vm3029_vm3 = vweird.f32 %v3023_v57  ;;  %v3033_v12 = vand.u32 2147483647, %v3023_v57 }
0x2a43   :  { %v3036_v14 = vor.u32 1.1754944e-38, %v3035_v24  ;;  %vm3034_vm5 = vcmp.eq.f32.partialorder %v3033_v12, 8.507059e+37 }
0x2a84   :  { %v3011_v50 = vpop.permute.xlu0 %3010 }
0x2a85   :  { %v5485_v51 = vadd.f32 %v3011_v50, %v3003_v31 }
0x2a87   :  { %4268 = vtanh.f32 %v5485_v51  ;;  %v3146_v26 = vrot.slane %v5485_v51, 6 }
0x2a88   :  { %4270 = vrcp.f32 %v3023_v57 }
0x2a8d   :  { %v4269_v41 = vpop.eup %4268 }
0x2a8e   :  { %3016 = vrot.lane.b32.xlu1 %v4269_v41, %s4517_s1  ;;  %v4271_v1 = vpop.eup %4270 }
0x2a8f   :  { %v3025_v59 = vmul.f32 %v4271_v1, %v3023_v57  ;;  %vm3030_vm2 = vweird.f32 %v4271_v1 }
0x2a90   :  { %vm3031_vm4 = vmor %vm3029_vm3, %vm3030_vm2 }
0x2a91   :  { %v3026_v13 = vsub.f32 1.0, %v3025_v59 }
0x2a93   :  { %v3027_v2 = vmul.f32 %v4271_v1, %v3026_v13 }
0x2a95   :  { %v3028_v3 = vadd.f32 %v4271_v1, %v3027_v2 }
0x2a97   :  { %v3032_v63 = vsel %vm3031_vm4, %v4271_v1, %v3028_v3 }
0x2a98   :  { %v3037_v48 = vsel %vm3034_vm5, %v3036_v14, %v3032_v63 }
0x2a99   :  { %v3043_v8 = vmul.f32 %v3041_v17, %v3037_v48 }
0x2aaf   :  { %v3046_v16 = vpop.permute.xlu0 %3045 }
0x2ab0   :  { %v3048_v25 = vmul.f32 %v3046_v16, %v3037_v48 }
0x2ab2   :  { %3050 = vrot.lane.b32.xlu1 %v3048_v25, %s4517_s1 }
0x2b00   :  { %v3017_v60 = vpop.permute.xlu1 %3016 }
0x2b01   :  { %v5490_v21 = vmul.f32 %v3017_v60, %v2997_v7 }
0x2b03   :  { %v3070_v43 = vrot.slane %v5490_v21, 4 }
0x2b05   :  { %3071 = vrot.lane.b32.xlu2 %v3070_v43, %s4518_s4 }
0x2b24   :  { %v3051_v30 = vpop.permute.xlu1 %3050 }
0x2b25   :  { %v5495_v20 = vadd.f32 %v3051_v30, %v3043_v8 }
0x2b27   :  { %4272 = vtanh.f32 %v5495_v20  ;;  %v3186_v17 = vrot.slane %v5495_v20, 2  ;;  %v5543_v20 = vadd.f32 %v5508_v52, %v2584_v44 }
0x2b2d   :  { %v4273_v35 = vpop.eup %4272 }
0x2b2e   :  { %3056 = vrot.lane.b32.xlu2 %v4273_v35, %s4517_s1 }
0x2b5f   :  { %v3072_v39 = vpop.permute.xlu2 %3071 }
0x2b60   :  { %3932 = vmatmul.msk.f32.vlgmr.msra.gmra.mxu2 %vm169_vm8, %v3072_v39 }
0x2b61   :  { %3669 = vmatpush.msra.mxu2 %v5329_v27 }
0x2b63   :  { %3670 = vmatpush.msra.mxu2 %v5331_v53 }
0x2b65   :  { %3671 = vmatpush.msra.mxu2 %v5335_v6 }
0x2b67   :  { %3672 = vmatpush.msra.mxu2 %v5339_v4 }
0x2b88   :  { %v3057_v47 = vpop.permute.xlu2 %3056 }
0x2b89   :  { %v5504_v37 = vmul.f32 %v3057_v47, %v3037_v48 }
0x2b8b   :  { %v3099_v36 = vrot.slane %v5504_v37, 2 }
0x2b8d   :  { %3100 = vrot.lane.b32.xlu0 %v3099_v36, %s4518_s4 }
0x2be3   :  { %v3092_v33 = vpop.f32.mrf.mxu2 }
0x2be4   :  { %v3096_v61 = vrot.slane %v3092_v33, 2 }
0x2be6   :  { %v3098_v56 = vadd.f32 %v3096_v61, %v5390_v15 }
0x2be8   :  { %4274 = vtanh.f32 %v3098_v56  ;;  %v3934_v6 = vmul.f32 -1.442695, %v3098_v56 }
0x2bea   :  { %4276 = vpow2.f32 %v3934_v6 }
0x2bee   :  { %v4275_v27 = vpop.eup %4274 }
0x2bef   :  { %3150 = vrot.lane.b32.xlu1 %v4275_v27, %s4517_s1 }
0x2bf0   :  { %v4277_v4 = vpop.eup %4276 }
0x2bf1   :  { %v3128_v29 = vadd.f32 1.0, %v4277_v4 }
0x2bf3   :  { %4278 = vrcp.f32 %v3128_v29  ;;  %v3140_v46 = vand.u32 2147483648, %v3128_v29  ;;  %vm3134_vm7 = vweird.f32 %v3128_v29 }
0x2bf5   :  { %v3141_v45 = vor.u32 1.1754944e-38, %v3140_v46 }
0x2bf9   :  { %v4279_v15 = vpop.eup %4278 }
0x2bfa   :  { %v3130_v32 = vmul.f32 %v4279_v15, %v3128_v29  ;;  %vm3135_vm6 = vweird.f32 %v4279_v15 }
0x2bfb   :  { %vm3136_vm2 = vmor %vm3134_vm7, %vm3135_vm6 }
0x2bfc   :  { %v3131_v9 = vsub.f32 1.0, %v3130_v32 }
0x2bfe   :  { %v3132_v28 = vmul.f32 %v4279_v15, %v3131_v9 }
0x2bff   :  { %v3101_v53 = vpop.permute.xlu0 %3100 }
0x2c00   :  { %3933 = vmatmul.msk.f32.vlgmr.msra.gmra.mxu3 %vm169_vm8, %v3101_v53  ;;  %v3133_v7 = vadd.f32 %v4279_v15, %v3132_v28 }
0x2c01   :  { %3698 = vmatpush.msra.mxu3 %v5366_v62  ;;  %v3138_v62 = vand.u32 2147483647, %v3128_v29 }
0x2c03   :  { %3699 = vmatpush.msra.mxu3 %v5375_v38  ;;  %v3137_v38 = vsel %vm3136_vm2, %v4279_v15, %v3133_v7  ;;  %vm3139_vm3 = vcmp.eq.f32.partialorder %v3138_v62, 8.507059e+37 }
0x2c05   :  { %3700 = vmatpush.msra.mxu3 %v5377_v40  ;;  %v3142_v40 = vsel %vm3139_vm3, %v3141_v45, %v3137_v38 }
0x2c06   :  { %v3148_v31 = vmul.f32 %v3146_v26, %v3142_v40 }
0x2c07   :  { %3701 = vmatpush.msra.mxu3 %v5382_v10 }
0x2c61   :  { %v3151_v10 = vpop.permute.xlu1 %3150 }
0x2c62   :  { %v3153_v23 = vmul.f32 %v3151_v10, %v3142_v40 }
0x2c64   :  { %3155 = vrot.lane.b32.xlu2 %v3153_v23, %s4517_s1  ;;  %v5552_v23 = vadd.f32 %v5411_v42, %v2585_v22 }
0x2c83   :  { %v3121_v55 = vpop.f32.mrf.mxu3 }
0x2c84   :  { %v3124_v58 = vadd.f32 %v3121_v55, %v5416_v34 }
0x2c86   :  { %4280 = vtanh.f32 %v3124_v58  ;;  %v3935_v19 = vmul.f32 -1.442695, %v3124_v58 }
0x2c88   :  { %4282 = vpow2.f32 %v3935_v19 }
0x2c8c   :  { %v4281_v5 = vpop.eup %4280 }
0x2c8d   :  { %3190 = vrot.lane.b32.xlu2 %v4281_v5, %s4517_s1 }
0x2c8e   :  { %v4283_v41 = vpop.eup %4282 }
0x2c8f   :  { %v3168_v1 = vadd.f32 1.0, %v4283_v41 }
0x2c91   :  { %v3180_v51 = vand.u32 2147483648, %v3168_v1  ;;  %vm3174_vm5 = vweird.f32 %v3168_v1  ;;  %v3178_v24 = vand.u32 2147483647, %v3168_v1 }
0x2c93   :  { %v3181_v63 = vor.u32 1.1754944e-38, %v3180_v51  ;;  %vm3179_vm7 = vcmp.eq.f32.partialorder %v3178_v24, 8.507059e+37 }
0x2cbe   :  { %v3156_v50 = vpop.permute.xlu2 %3155 }
0x2cbf   :  { %v5521_v54 = vadd.f32 %v3156_v50, %v3148_v31 }
0x2cc1   :  { %4284 = vtanh.f32 %v5521_v54  ;;  %v3290_v41 = vrot.slane %v5521_v54, 6 }
0x2cc2   :  { %4286 = vrcp.f32 %v3168_v1 }
0x2cc7   :  { %v4285_v57 = vpop.eup %4284 }
0x2cc8   :  { %3161 = vrot.lane.b32.xlu0 %v4285_v57, %s4517_s1  ;;  %v4287_v34 = vpop.eup %4286 }
0x2cc9   :  { %v3170_v59 = vmul.f32 %v4287_v34, %v3168_v1  ;;  %vm3175_vm4 = vweird.f32 %v4287_v34 }
0x2cca   :  { %vm3176_vm6 = vmor %vm3174_vm5, %vm3175_vm4 }
0x2ccb   :  { %v3171_v13 = vsub.f32 1.0, %v3170_v59 }
0x2ccd   :  { %v3172_v2 = vmul.f32 %v4287_v34, %v3171_v13 }
0x2ccf   :  { %v3173_v3 = vadd.f32 %v4287_v34, %v3172_v2 }
0x2cd1   :  { %v3177_v12 = vsel %vm3176_vm6, %v4287_v34, %v3173_v3 }
0x2cd2   :  { %v3182_v14 = vsel %vm3179_vm7, %v3181_v63, %v3177_v12 }
0x2cd3   :  { %v3188_v8 = vmul.f32 %v3186_v17, %v3182_v14 }
0x2ce7   :  { %v3191_v48 = vpop.permute.xlu2 %3190 }
0x2ce8   :  { %v3193_v16 = vmul.f32 %v3191_v48, %v3182_v14 }
0x2cea   :  { %3195 = vrot.lane.b32.xlu0 %v3193_v16, %s4517_s1 }
0x2d3a   :  { %v3162_v25 = vpop.permute.xlu0 %3161 }
0x2d3b   :  { %v5526_v60 = vmul.f32 %v3162_v25, %v3142_v40 }
0x2d3d   :  { %v3215_v43 = vrot.slane %v5526_v60, 6 }
0x2d3f   :  { %3216 = vrot.lane.b32.xlu1 %v3215_v43, %s4518_s4 }
0x2d5c   :  { %v3196_v30 = vpop.permute.xlu0 %3195 }
0x2d5d   :  { %v5531_v35 = vadd.f32 %v3196_v30, %v3188_v8 }
0x2d5f   :  { %4288 = vtanh.f32 %v5531_v35  ;;  %v3330_v16 = vrot.slane %v5531_v35, 2 }
0x2d65   :  { %v4289_v39 = vpop.eup %4288 }
0x2d66   :  { %3201 = vrot.lane.b32.xlu1 %v4289_v39, %s4517_s1 }
0x2db1   :  { %v3217_v47 = vpop.permute.xlu1 %3216 }
0x2db2   :  { %3936 = vmatmul.msk.f32.vlgmr.msra.gmra.mxu0 %vm169_vm8, %v3217_v47 }
0x2dd8   :  { %v3202_v36 = vpop.permute.xlu1 %3201 }
0x2dd9   :  { %v5536_v33 = vmul.f32 %v3202_v36, %v3182_v14 }
0x2ddb   :  { %3241 = vrot.lane.b32.xlu2 %v5536_v33, %s4518_s4 }
0x2e2f   :  { %v3237_v61 = vpop.f32.mrf.mxu0 }
0x2e30   :  { %v3240_v56 = vadd.f32 %v3237_v61, %v5543_v20 }
0x2e32   :  { %4290 = vtanh.f32 %v3240_v56  ;;  %v3938_v6 = vmul.f32 -1.442695, %v3240_v56 }
0x2e34   :  { %4292 = vpow2.f32 %v3938_v6 }
0x2e35   :  { %v3242_v27 = vpop.permute.xlu2 %3241 }
0x2e36   :  { %3937 = vmatmul.msk.f32.vlgmr.msra.gmra.mxu1 %vm169_vm8, %v3242_v27 }
0x2e38   :  { %v4291_v53 = vpop.eup %4290 }
0x2e39   :  { %3294 = vrot.lane.b32.xlu0 %v4291_v53, %s4517_s1 }
0x2e3a   :  { %v4293_v4 = vpop.eup %4292 }
0x2e3b   :  { %v3272_v29 = vadd.f32 1.0, %v4293_v4 }
0x2e3d   :  { %4294 = vrcp.f32 %v3272_v29  ;;  %v3284_v28 = vand.u32 2147483648, %v3272_v29  ;;  %vm3278_vm3 = vweird.f32 %v3272_v29  ;;  %v3282_v7 = vand.u32 2147483647, %v3272_v29 }
0x2e3f   :  { %v3285_v62 = vor.u32 1.1754944e-38, %v3284_v28  ;;  %vm3283_vm5 = vcmp.eq.f32.partialorder %v3282_v7, 8.507059e+37 }
0x2e43   :  { %v4295_v15 = vpop.eup %4294 }
0x2e44   :  { %v3274_v32 = vmul.f32 %v4295_v15, %v3272_v29  ;;  %vm3279_vm2 = vweird.f32 %v4295_v15 }
0x2e45   :  { %vm3280_vm4 = vmor %vm3278_vm3, %vm3279_vm2 }
0x2e46   :  { %v3275_v9 = vsub.f32 1.0, %v3274_v32 }
0x2e48   :  { %v3276_v44 = vmul.f32 %v4295_v15, %v3275_v9 }
0x2e4a   :  { %v3277_v52 = vadd.f32 %v4295_v15, %v3276_v44 }
0x2e4c   :  { %v3281_v46 = vsel %vm3280_vm4, %v4295_v15, %v3277_v52 }
0x2e4d   :  { %v3286_v38 = vsel %vm3283_vm5, %v3285_v62, %v3281_v46 }
0x2e4e   :  { %v3292_v0 = vmul.f32 %v3290_v41, %v3286_v38 }
0x2eab   :  { %v3295_v45 = vpop.permute.xlu0 %3294 }
0x2eac   :  { %v3297_v40 = vmul.f32 %v3295_v45, %v3286_v38 }
0x2eae   :  { %3299 = vrot.lane.b32.xlu1 %v3297_v40, %s4517_s1 }
0x2eb3   :  { %v3262_v10 = vpop.f32.mrf.mxu1 }
0x2eb4   :  { %v3266_v55 = vrot.slane %v3262_v10, 2 }
0x2eb6   :  { %v3268_v58 = vadd.f32 %v3266_v55, %v5552_v23 }
0x2eb8   :  { %4296 = vtanh.f32 %v3268_v58  ;;  %v3939_v19 = vmul.f32 -1.442695, %v3268_v58 }
0x2eba   :  { %4298 = vpow2.f32 %v3939_v19 }
0x2ebe   :  { %v4297_v5 = vpop.eup %4296 }
0x2ebf   :  { %3334 = vrot.lane.b32.xlu1 %v4297_v5, %s4517_s1 }
0x2ec0   :  { %v4299_v26 = vpop.eup %4298 }
0x2ec1   :  { %v3312_v31 = vadd.f32 1.0, %v4299_v26 }
0x2ec3   :  { %4300 = vrcp.f32 %v3312_v31  ;;  %v3324_v2 = vand.u32 2147483648, %v3312_v31  ;;  %vm3318_vm7 = vweird.f32 %v3312_v31  ;;  %v3322_v3 = vand.u32 2147483647, %v3312_v31 }
0x2ec5   :  { %v3325_v54 = vor.u32 1.1754944e-38, %v3324_v2  ;;  %vm3323_vm3 = vcmp.eq.f32.partialorder %v3322_v3, 8.507059e+37 }
0x2ec9   :  { %v4301_v50 = vpop.eup %4300 }
0x2eca   :  { %v3314_v57 = vmul.f32 %v4301_v50, %v3312_v31  ;;  %vm3319_vm6 = vweird.f32 %v4301_v50 }
0x2ecb   :  { %vm3320_vm2 = vmor %vm3318_vm7, %vm3319_vm6 }
0x2ecc   :  { %v3315_v22 = vsub.f32 1.0, %v3314_v57 }
0x2ece   :  { %v3316_v34 = vmul.f32 %v4301_v50, %v3315_v22 }
0x2ed0   :  { %v3317_v13 = vadd.f32 %v4301_v50, %v3316_v34 }
0x2ed2   :  { %v3321_v51 = vsel %vm3320_vm2, %v4301_v50, %v3317_v13 }
0x2ed3   :  { %v3326_v24 = vsel %vm3323_vm3, %v3325_v54, %v3321_v51 }
0x2ed4   :  { %v3332_v25 = vmul.f32 %v3330_v16, %v3326_v24 }
0x2f20   :  { %v3300_v1 = vpop.permute.xlu1 %3299 }
0x2f21   :  { %v5557_v42 = vadd.f32 %v3300_v1, %v3292_v0 }
0x2f23   :  { %4302 = vtanh.f32 %v5557_v42  ;;  %v3435_v19 = vrot.slane %v5557_v42, 6 }
0x2f29   :  { %v4303_v59 = vpop.eup %4302 }
0x2f2a   :  { %3305 = vrot.lane.b32.xlu2 %v4303_v59, %s4517_s1 }
0x2f31   :  { %v3335_v12 = vpop.permute.xlu1 %3334 }
0x2f32   :  { %v3337_v63 = vmul.f32 %v3335_v12, %v3326_v24 }
0x2f34   :  { %3339 = vrot.lane.b32.xlu2 %v3337_v63, %s4517_s1 }
0x2f84   :  { %v3306_v14 = vpop.permute.xlu2 %3305 }
0x2f85   :  { %v3308_v48 = vmul.f32 %v3306_v14, %v3286_v38 }
0x2f87   :  { %3350 = vrot.lane.b32.xlu0 %v3308_v48, %s4518_s4 }
0x2f8e   :  { %v3340_v43 = vpop.permute.xlu2 %3339 }
0x2f8f   :  { %v5564_v17 = vadd.f32 %v3340_v43, %v3332_v25 }
0x2f91   :  { %4304 = vtanh.f32 %v5564_v17  ;;  %v3475_v25 = vrot.slane %v5564_v17, 2 }
0x2f97   :  { %v4305_v8 = vpop.eup %4304 }
0x2f98   :  { %3345 = vrot.lane.b32.xlu0 %v4305_v8, %s4517_s1 }
0x2ff9   :  { %v5568_v30 = vpop.permute.xlu0 %3350 }
0x2ffa   :  { %3940 = vmatmul.msk.f32.vlgmr.msrb.gmra.mxu2 %vm169_vm8, %v5568_v30 }
0x300a   :  { %v3346_v39 = vpop.permute.xlu0 %3345 }
0x300b   :  { %v5572_v47 = vmul.f32 %v3346_v39, %v3326_v24 }
0x300d   :  { %v3385_v36 = vrot.slane %v5572_v47, 6 }
0x300f   :  { %3386 = vrot.lane.b32.xlu1 %v3385_v36, %s4518_s4 }
0x307d   :  { %v3378_v35 = vpop.f32.mrf.mxu2 }
0x307e   :  { %v3382_v61 = vrot.slane %v3378_v35, 6 }
0x3080   :  { %v3384_v56 = vadd.f32 %v3382_v61, %v5543_v20 }
0x3081   :  { %v3387_v27 = vpop.permute.xlu1 %3386 }
0x3082   :  { %4306 = vtanh.f32 %v3384_v56  ;;  %3941 = vmatmul.msk.f32.vlgmr.msrb.gmra.mxu3 %vm169_vm8, %v3387_v27  ;;  %v3942_v6 = vmul.f32 -1.442695, %v3384_v56 }
0x3084   :  { %4308 = vpow2.f32 %v3942_v6 }
0x3088   :  { %v4307_v53 = vpop.eup %4306 }
0x3089   :  { %3439 = vrot.lane.b32.xlu2 %v4307_v53, %s4517_s1 }
0x308a   :  { %v4309_v4 = vpop.eup %4308 }
0x308b   :  { %v3417_v29 = vadd.f32 1.0, %v4309_v4 }
0x308d   :  { %4310 = vrcp.f32 %v3417_v29  ;;  %v3429_v28 = vand.u32 2147483648, %v3417_v29  ;;  %vm3423_vm5 = vweird.f32 %v3417_v29  ;;  %v3427_v7 = vand.u32 2147483647, %v3417_v29 }
0x308f   :  { %v3430_v62 = vor.u32 1.1754944e-38, %v3429_v28  ;;  %vm3428_vm7 = vcmp.eq.f32.partialorder %v3427_v7, 8.507059e+37 }
0x3093   :  { %v4311_v15 = vpop.eup %4310 }
0x3094   :  { %v3419_v32 = vmul.f32 %v4311_v15, %v3417_v29  ;;  %vm3424_vm4 = vweird.f32 %v4311_v15 }
0x3095   :  { %vm3425_vm6 = vmor %vm3423_vm5, %vm3424_vm4 }
0x3096   :  { %v3420_v9 = vsub.f32 1.0, %v3419_v32 }
0x3098   :  { %v3421_v44 = vmul.f32 %v4311_v15, %v3420_v9 }
0x309a   :  { %v3422_v52 = vadd.f32 %v4311_v15, %v3421_v44 }
0x309c   :  { %v3426_v46 = vsel %vm3425_vm6, %v4311_v15, %v3422_v52 }
0x309d   :  { %v3431_v38 = vsel %vm3428_vm7, %v3430_v62, %v3426_v46 }
0x309e   :  { %v3437_v31 = vmul.f32 %v3435_v19, %v3431_v38 }
0x30e3   :  { %v3440_v45 = vpop.permute.xlu2 %3439 }
0x30e4   :  { %v3442_v40 = vmul.f32 %v3440_v45, %v3431_v38 }
0x30e6   :  { %3444 = vrot.lane.b32.xlu0 %v3442_v40, %s4517_s1 }
0x3105   :  { %v3407_v10 = vpop.f32.mrf.mxu3 }
0x3106   :  { %v3411_v55 = vrot.slane %v3407_v10, 4 }
0x3108   :  { %v3413_v58 = vadd.f32 %v3411_v55, %v5552_v23 }
0x310a   :  { %4312 = vtanh.f32 %v3413_v58  ;;  %v3943_v26 = vmul.f32 -1.442695, %v3413_v58 }
0x310c   :  { %4314 = vpow2.f32 %v3943_v26 }
0x3110   :  { %v4313_v5 = vpop.eup %4312 }
0x3111   :  { %3479 = vrot.lane.b32.xlu0 %v4313_v5, %s4517_s1 }
0x3112   :  { %v4315_v57 = vpop.eup %4314 }
0x3113   :  { %v3457_v1 = vadd.f32 1.0, %v4315_v57 }
0x3115   :  { %v3469_v42 = vand.u32 2147483648, %v3457_v1  ;;  %vm3463_vm3 = vweird.f32 %v3457_v1  ;;  %v3467_v3 = vand.u32 2147483647, %v3457_v1 }
0x3117   :  { %v3470_v54 = vor.u32 1.1754944e-38, %v3469_v42  ;;  %vm3468_vm5 = vcmp.eq.f32.partialorder %v3467_v3, 8.507059e+37 }
0x3158   :  { %v3445_v50 = vpop.permute.xlu0 %3444 }
0x3159   :  { %v5583_v41 = vadd.f32 %v3445_v50, %v3437_v31 }
0x315b   :  { %4316 = vtanh.f32 %v5583_v41  ;;  %v3583_v50 = vrot.slane %v5583_v41, 6 }
0x315c   :  { %4318 = vrcp.f32 %v3457_v1 }
0x3161   :  { %v4317_v0 = vpop.eup %4316 }
0x3162   :  { %3450 = vrot.lane.b32.xlu1 %v4317_v0, %s4517_s1  ;;  %v4319_v22 = vpop.eup %4318 }
0x3163   :  { %v3459_v34 = vmul.f32 %v4319_v22, %v3457_v1  ;;  %vm3464_vm2 = vweird.f32 %v4319_v22 }
0x3164   :  { %vm3465_vm4 = vmor %vm3463_vm3, %vm3464_vm2 }
0x3165   :  { %v3460_v59 = vsub.f32 1.0, %v3459_v34 }
0x3167   :  { %v3461_v13 = vmul.f32 %v4319_v22, %v3460_v59 }
0x3169   :  { %v3462_v2 = vadd.f32 %v4319_v22, %v3461_v13 }
0x316b   :  { %v3466_v51 = vsel %vm3465_vm4, %v4319_v22, %v3462_v2 }
0x316c   :  { %v3471_v24 = vsel %vm3468_vm5, %v3470_v54, %v3466_v51 }
0x316d   :  { %v3477_v43 = vmul.f32 %v3475_v25, %v3471_v24 }
0x3183   :  { %v3480_v12 = vpop.permute.xlu0 %3479 }
0x3184   :  { %v3482_v63 = vmul.f32 %v3480_v12, %v3471_v24 }
0x3186   :  { %3484 = vrot.lane.b32.xlu1 %v3482_v63, %s4517_s1 }
0x31d4   :  { %v3451_v14 = vpop.permute.xlu1 %3450 }
0x31d5   :  { %v5588_v48 = vmul.f32 %v3451_v14, %v3431_v38 }
0x31d7   :  { %v3504_v16 = vrot.slane %v5588_v48, 2 }
0x31d9   :  { %3505 = vrot.lane.b32.xlu2 %v3504_v16, %s4518_s4 }
0x31f8   :  { %v3485_v8 = vpop.permute.xlu1 %3484 }
0x31f9   :  { %v5593_v39 = vadd.f32 %v3485_v8, %v3477_v43 }
0x31fb   :  { %4320 = vtanh.f32 %v5593_v39 }
0x3201   :  { %v4321_v36 = vpop.eup %4320 }
0x3202   :  { %3490 = vrot.lane.b32.xlu2 %v4321_v36, %s4517_s1 }
0x3233   :  { %v3506_v35 = vpop.permute.xlu2 %3505 }
0x3234   :  { %3944 = vmatmul.msk.f32.vlgmr.msrb.gmra.mxu0 %vm169_vm8, %v3506_v35  ;;  %v3623_v35 = vrot.slane %v5593_v39, 2 }
0x325c   :  { %v3491_v61 = vpop.permute.xlu2 %3490 }
0x325d   :  { %v5598_v56 = vmul.f32 %v3491_v61, %v3471_v24 }
0x325f   :  { %v3533_v27 = vrot.slane %v5598_v56, 4 }
0x3261   :  { %3534 = vrot.lane.b32.xlu0 %v3533_v27, %s4518_s4 }
0x32b1   :  { %v3526_v17 = vpop.f32.mrf.mxu0 }
0x32b2   :  { %v3530_v53 = vrot.slane %v3526_v17, 4 }
0x32b4   :  { %v3532_v6 = vadd.f32 %v3530_v53, %v5543_v20 }
0x32b6   :  { %4322 = vtanh.f32 %v3532_v6  ;;  %v3946_v15 = vmul.f32 -1.442695, %v3532_v6 }
0x32b8   :  { %4324 = vpow2.f32 %v3946_v15 }
0x32bc   :  { %v4323_v4 = vpop.eup %4322 }
0x32bd   :  { %3587 = vrot.lane.b32.xlu1 %v4323_v4, %s4517_s1 }
0x32be   :  { %v4325_v32 = vpop.eup %4324 }
0x32bf   :  { %v3565_v9 = vadd.f32 1.0, %v4325_v32 }
0x32c1   :  { %4326 = vrcp.f32 %v3565_v9  ;;  %v3577_v62 = vand.u32 2147483648, %v3565_v9  ;;  %vm3571_vm7 = vweird.f32 %v3565_v9  ;;  %v3575_v38 = vand.u32 2147483647, %v3565_v9 }
0x32c3   :  { %v3578_v40 = vor.u32 1.1754944e-38, %v3577_v62  ;;  %vm3576_vm3 = vcmp.eq.f32.partialorder %v3575_v38, 8.507059e+37 }
0x32c7   :  { %v4327_v44 = vpop.eup %4326 }
0x32c8   :  { %v3567_v52 = vmul.f32 %v4327_v44, %v3565_v9  ;;  %vm3572_vm6 = vweird.f32 %v4327_v44 }
0x32c9   :  { %vm3573_vm2 = vmor %vm3571_vm7, %vm3572_vm6 }
0x32ca   :  { %v3568_v28 = vsub.f32 1.0, %v3567_v52 }
0x32cc   :  { %v3569_v7 = vmul.f32 %v4327_v44, %v3568_v28 }
0x32ce   :  { %v3570_v46 = vadd.f32 %v4327_v44, %v3569_v7 }
0x32d0   :  { %v3574_v45 = vsel %vm3573_vm2, %v4327_v44, %v3570_v46 }
0x32d1   :  { %v3579_v10 = vsel %vm3576_vm3, %v3578_v40, %v3574_v45 }
0x32d2   :  { %v3585_v0 = vmul.f32 %v3583_v50, %v3579_v10 }
0x32d3   :  { %v3535_v29 = vpop.permute.xlu0 %3534 }
0x32d4   :  { %3945 = vmatmul.msk.f32.vlgmr.msrb.gmra.mxu1 %vm169_vm8, %v3535_v29 }
0x332f   :  { %v3588_v55 = vpop.permute.xlu1 %3587 }
0x3330   :  { %v3590_v58 = vmul.f32 %v3588_v55, %v3579_v10 }
0x3332   :  { %3592 = vrot.lane.b32.xlu2 %v3590_v58, %s4517_s1 }
0x3351   :  { %v3555_v5 = vpop.f32.mrf.mxu1 }
0x3352   :  { %v3559_v19 = vrot.slane %v3555_v5, 6 }
0x3354   :  { %v3561_v26 = vadd.f32 %v3559_v19, %v5552_v23 }
0x3356   :  { %4328 = vtanh.f32 %v3561_v26  ;;  %v3947_v57 = vmul.f32 -1.442695, %v3561_v26 }
0x3358   :  { %4330 = vpow2.f32 %v3947_v57 }
0x335c   :  { %v4329_v31 = vpop.eup %4328 }
0x335d   :  { %3627 = vrot.lane.b32.xlu2 %v4329_v31, %s4517_s1 }
0x335e   :  { %v4331_v34 = vpop.eup %4330 }
0x335f   :  { %v3605_v13 = vadd.f32 1.0, %v4331_v34 }
0x3361   :  { %v3617_v41 = vand.u32 2147483648, %v3605_v13  ;;  %vm3611_vm5 = vweird.f32 %v3605_v13  ;;  %v3615_v24 = vand.u32 2147483647, %v3605_v13 }
0x3363   :  { %v3618_v63 = vor.u32 1.1754944e-38, %v3617_v41  ;;  %vm3616_vm7 = vcmp.eq.f32.partialorder %v3615_v24, 8.507059e+37 }
0x338c   :  { %v3593_v1 = vpop.permute.xlu2 %3592 }
0x338d   :  { %v5609_v22 = vadd.f32 %v3593_v1, %v3585_v0 }
0x338f   :  { %4332 = vtanh.f32 %v5609_v22  ;;  %v3728_v50 = vrot.slane %v5609_v22, 6 }
0x3390   :  { %4334 = vrcp.f32 %v3605_v13 }
0x3395   :  { %v4333_v59 = vpop.eup %4332 }
0x3396   :  { %3598 = vrot.lane.b32.xlu0 %v4333_v59, %s4517_s1  ;;  %v4335_v2 = vpop.eup %4334 }
0x3397   :  { %v3607_v42 = vmul.f32 %v4335_v2, %v3605_v13  ;;  %vm3612_vm4 = vweird.f32 %v4335_v2 }
0x3398   :  { %vm3613_vm6 = vmor %vm3611_vm5, %vm3612_vm4 }
0x3399   :  { %v3608_v3 = vsub.f32 1.0, %v3607_v42 }
0x339b   :  { %v3609_v51 = vmul.f32 %v4335_v2, %v3608_v3 }
0x339d   :  { %v3610_v54 = vadd.f32 %v4335_v2, %v3609_v51 }
0x339f   :  { %v3614_v12 = vsel %vm3613_vm6, %v4335_v2, %v3610_v54 }
0x33a0   :  { %v3619_v14 = vsel %vm3616_vm7, %v3618_v63, %v3614_v12 }
0x33a1   :  { %v3625_v61 = vmul.f32 %v3623_v35, %v3619_v14  ;;  %v3803_v35 = vld [vmem:[%s5725_s13 + $0x28] sm:$0xff] }
0x33b7   :  { %v3628_v16 = vpop.permute.xlu2 %3627 }
0x33b8   :  { %v3630_v25 = vmul.f32 %v3628_v16, %v3619_v14 }
0x33ba   :  { %3632 = vrot.lane.b32.xlu0 %v3630_v25, %s4517_s1 }
0x3408   :  { %v3599_v43 = vpop.permute.xlu0 %3598 }
0x3409   :  { %v5614_v8 = vmul.f32 %v3599_v43, %v3579_v10 }
0x340b   :  { %v3652_v36 = vrot.slane %v5614_v8, 4 }
0x340d   :  { %3653 = vrot.lane.b32.xlu1 %v3652_v36, %s4518_s4  ;;  %v3804_v36 = vld [vmem:[%s5725_s13 + $0x30] sm:$0xff] }
0x342c   :  { %v3633_v27 = vpop.permute.xlu0 %3632 }
0x342d   :  { %v5619_v17 = vadd.f32 %v3633_v27, %v3625_v61  ;;  %v3802_v61 = vld [vmem:[%s5725_s13 + $0x20] sm:$0xff] }
0x342f   :  { %4336 = vtanh.f32 %v5619_v17 }
0x3435   :  { %v4337_v53 = vpop.eup %4336 }
0x3436   :  { %3638 = vrot.lane.b32.xlu1 %v4337_v53, %s4517_s1 }
0x347f   :  { %v3654_v6 = vpop.permute.xlu1 %3653 }
0x3480   :  { %3948 = vmatmul.msk.f32.vlgmr.msra.gmra.mxu2 %vm169_vm8, %v3654_v6  ;;  %v3801_v6 = vld [vmem:[%s5725_s13 + $0x18] sm:$0xff] }
0x34a8   :  { %v3639_v4 = vpop.permute.xlu1 %3638 }
0x34a9   :  { %v5624_v29 = vmul.f32 %v3639_v4, %v3619_v14  ;;  %v3799_v4 = vld [vmem:[%s5725_s13 + $0x8] sm:$0xff] }
0x34ab   :  { %v3681_v15 = vrot.slane %v5624_v29, 2 }
0x34ad   :  { %3682 = vrot.lane.b32.xlu2 %v3681_v15, %s4518_s4 }
0x3503   :  { %v3674_v39 = vpop.f32.mrf.mxu2 }
0x3504   :  { %v3678_v32 = vrot.slane %v3674_v39, 2 }
0x3506   :  { %v3680_v9 = vadd.f32 %v3678_v32, %v5543_v20 }
0x3507   :  { %v3683_v44 = vpop.permute.xlu2 %3682 }
0x3508   :  { %4338 = vtanh.f32 %v3680_v9  ;;  %3949 = vmatmul.msk.f32.vlgmr.msra.gmra.mxu3 %vm169_vm8, %v3683_v44  ;;  %v3950_v28 = vmul.f32 -1.442695, %v3680_v9 }
0x350a   :  { %4340 = vpow2.f32 %v3950_v28 }
0x350e   :  { %v4339_v52 = vpop.eup %4338 }
0x350f   :  { %3732 = vrot.lane.b32.xlu0 %v4339_v52, %s4517_s1 }
0x3510   :  { %v4341_v7 = vpop.eup %4340 }
0x3511   :  { %v3710_v46 = vadd.f32 1.0, %v4341_v7 }
0x3513   :  { %4342 = vrcp.f32 %v3710_v46  ;;  %v3722_v10 = vand.u32 2147483648, %v3710_v46  ;;  %vm3716_vm3 = vweird.f32 %v3710_v46  ;;  %v3720_v55 = vand.u32 2147483647, %v3710_v46 }
0x3515   :  { %v3723_v5 = vor.u32 1.1754944e-38, %v3722_v10  ;;  %vm3721_vm4 = vcmp.eq.f32.partialorder %v3720_v55, 8.507059e+37 }
0x3517   :  { %2773 = vrot.lane.b32.xlu0 %v5436_v11, %s4519_s11 }
0x3519   :  { %v4343_v62 = vpop.eup %4342 }
0x351a   :  { %v3712_v38 = vmul.f32 %v4343_v62, %v3710_v46  ;;  %vm3717_vm2 = vweird.f32 %v4343_v62 }
0x351b   :  { %vm3718_vm8 = vmor %vm3716_vm3, %vm3717_vm2 }
0x351c   :  { %v3713_v45 = vsub.f32 1.0, %v3712_v38  ;;  %v3969_v38 = vld [vmem:[%s5726_s14] ss:$0 sm:$0xff] }
0x351e   :  { %v3714_v40 = vmul.f32 %v4343_v62, %v3713_v45 }
0x3520   :  { %v3715_v20 = vadd.f32 %v4343_v62, %v3714_v40 }
0x3522   :  { %v3719_v58 = vsel %vm3718_vm8, %v4343_v62, %v3715_v20 }
0x3523   :  { %v3724_v19 = vsel %vm3721_vm4, %v3723_v5, %v3719_v58 }
0x3524   :  { %v3730_v57 = vmul.f32 %v3728_v50, %v3724_v19 }
0x3581   :  { %v3733_v11 = vpop.permute.xlu0 %3732 }
0x3582   :  { %v3735_v26 = vmul.f32 %v3733_v11, %v3724_v19 }
0x3584   :  { %3737 = vrot.lane.b32.xlu1 %v3735_v26, %s4517_s1 }
0x3589   :  { %v2774_v31 = vpop.permute.xlu0 %2773 }
0x358a   :  { %2776 = vst.msk [vmem:[#allocation2 + $0x8] sm:$0xc0] %vm302_vm14, %v2774_v31 }
0x358b   :  { %v3703_v34 = vpop.f32.mrf.mxu3 }
0x358c   :  { %v3706_v59 = vadd.f32 %v3703_v34, %v5552_v23 }
0x358e   :  { %v3951_v23 = vmul.f32 -1.442695, %v3706_v59 }
0x35f6   :  { %v3738_v0 = vpop.permute.xlu1 %3737 }
0x35f7   :  { %v3740_v1 = vadd.f32 %v3738_v0, %v3730_v57 }
0x35f9   :  { %4344 = vtanh.f32 %v3740_v1 }
0x35fa   :  { %4346 = vtanh.f32 %v3706_v59 }
0x35fb   :  { %4348 = vpow2.f32 %v3951_v23 }
0x35ff   :  { %v4345_v13 = vpop.eup %4344 }
0x3600   :  { %3743 = vrot.lane.b32.xlu2 %v4345_v13, %s4517_s1  ;;  %v4347_v2 = vpop.eup %4346 }
0x3601   :  { %v4349_v22 = vpop.eup %4348 }
0x3602   :  { %v3750_v42 = vadd.f32 1.0, %v4349_v22 }
0x3604   :  { %4350 = vrcp.f32 %v3750_v42  ;;  %vm3756_vm6 = vweird.f32 %v3750_v42 }
0x3608   :  { %3772 = vrot.lane.b32.xlu2 %v4347_v2, %s4517_s1 }
0x360a   :  { %v4351_v3 = vpop.eup %4350 }
0x360b   :  { %v3752_v51 = vmul.f32 %v4351_v3, %v3750_v42  ;;  %vm3757_vm5 = vweird.f32 %v4351_v3 }
0x360c   :  { %vm3758_vm7 = vmor %vm3756_vm6, %vm3757_vm5 }
0x360d   :  { %v3753_v54 = vsub.f32 1.0, %v3752_v51 }
0x360f   :  { %v3754_v41 = vmul.f32 %v4351_v3, %v3753_v54 }
0x3610   :  { %2913 = vrot.lane.b32.xlu2 %v5456_v49, %s4518_s4 }
0x3611   :  { %v3755_v12 = vadd.f32 %v4351_v3, %v3754_v41 }
0x3613   :  { %v3759_v63 = vsel %vm3758_vm7, %v4351_v3, %v3755_v12 }
0x3618   :  { %3066 = vrot.lane.b32.xlu2 %v5504_v37, %s4519_s11  ;;  %v3762_v37 = vand.u32 2147483648, %v3750_v42 }
0x361a   :  { %v3763_v14 = vor.u32 1.1754944e-38, %v3762_v37 }
0x3620   :  { %3355 = vrot.lane.b32.xlu2 %v5572_v47, %s4519_s11  ;;  %v3760_v47 = vand.u32 2147483647, %v3750_v42 }
0x3622   :  { %vm3761_vm2 = vcmp.eq.f32.partialorder %v3760_v47, 8.507059e+37 }
0x3623   :  { %v3764_v16 = vsel %vm3761_vm2, %v3763_v14, %v3759_v63 }
0x3628   :  { %3643 = vrot.lane.b32.xlu2 %v5614_v8, %s4518_s4  ;;  %v3805_v8 = vld [vmem:[%s5725_s13 + $0x38] sm:$0xff] }
0x3629   :  { %3821 = vmatpush.msra.mxu0 %v3805_v8 }
0x362b   :  { %3822 = vmatpush.msra.mxu0 %v3804_v36 }
0x362d   :  { %3823 = vmatpush.msra.mxu0 %v3803_v35 }
0x362f   :  { %3824 = vmatpush.msra.mxu0 %v3802_v61 }
0x3631   :  { %3825 = vmatpush.msra.mxu0 %v3801_v6 }
0x365a   :  { %v3744_v24 = vpop.permute.xlu2 %3743 }
0x365b   :  { %v3746_v49 = vmul.f32 %v3744_v24, %v3724_v19 }
0x365d   :  { %3788 = vrot.lane.b32.xlu1 %v3746_v49, %s4518_s4 }
0x3662   :  { %v3773_v25 = vpop.permute.xlu2 %3772 }
0x3663   :  { %v3775_v43 = vmul.f32 %v3773_v25, %v3764_v16 }
0x3665   :  { %3777 = vrot.lane.b32.xlu0 %v3775_v43, %s4517_s1 }
0x366a   :  { %v2914_v27 = vpop.permute.xlu2 %2913 }
0x366b   :  { %2916 = vst.msk [vmem:[#allocation2] sm:$0xc] %vm443_vm10, %v2914_v27 }
0x366d   :  { %2918 = vrot.lane.b32.xlu0 %v5470_v18, %s4519_s11  ;;  %v3800_v18 = vld [vmem:[%s5725_s13 + $0x10] sm:$0xff] }
0x366e   :  { %3826 = vmatpush.msra.mxu0 %v3800_v18 }
0x3670   :  { %3827 = vmatpush.msra.mxu0 %v3799_v4 }
0x3672   :  { %v3067_v53 = vpop.permute.xlu2 %3066 }
0x3673   :  { %3069 = vst.msk [vmem:[#allocation2 + $0x8] sm:$0xc] %vm599_vm11, %v3067_v53 }
0x3675   :  { %3206 = vrot.lane.b32.xlu0 %v5526_v60, %s4518_s4  ;;  %v3798_v60 = vld [vmem:[%s5725_s13] sm:$0xff] }
0x3676   :  { %3828 = vmatpush.msra.mxu0 %v3798_v60 }
0x367a   :  { %v3356_v15 = vpop.permute.xlu2 %3355 }
0x367d   :  { %3495 = vrot.lane.b32.xlu0 %v5588_v48, %s4518_s4 }
0x3682   :  { %v3644_v7 = vpop.permute.xlu2 %3643 }
0x3685   :  { %3648 = vrot.lane.b32.xlu0 %v5624_v29, %s4519_s11  ;;  %v3768_v29 = vrot.slane %v5619_v17, 2 }
0x3687   :  { %v3770_v39 = vmul.f32 %v3768_v29, %v3764_v16 }
0x36cf   :  { %v3789_v48 = vpop.permute.xlu1 %3788 }
0x36d0   :  { %3791 = vst.msk [vmem:[#allocation2 + $0x8] sm:$0xc0] %vm740_vm0, %v3789_v48 }
0x36d7   :  { %v3778_v32 = vpop.permute.xlu0 %3777  ;;  %v3797_v9 = vld [vmem:[#allocation2 + $0xe] sm:$0x3] }
0x36d8   :  { %v3780_v44 = vadd.f32 %v3778_v32, %v3770_v39  ;;  %3952 = vmatmul.msk.f32.vlgmr.msra.gmra.mxu0 %vm1354_vm1, %v3797_v9 }
0x36da   :  { %4352 = vtanh.f32 %v3780_v44 }
0x36df   :  { %v2919_v52 = vpop.permute.xlu0 %2918 }
0x36e0   :  { %v4353_v28 = vpop.eup %4352  ;;  %2921 = vst.msk [vmem:[#allocation2 + $0x8] sm:$0x30] %vm449_vm13, %v2919_v52 }
0x36e1   :  { %3646 = vst.msk [vmem:[#allocation2 + $0x8] sm:$0x30] %vm593_vm12, %v3644_v7  ;;  %3783 = vrot.lane.b32.xlu1 %v4353_v28, %s4517_s1 }
0x36e7   :  { %v3207_v46 = vpop.permute.xlu0 %3206 }
0x36e8   :  { %3209 = vst.msk [vmem:[#allocation2] sm:$0xc0] %vm740_vm0, %v3207_v46 }
0x36e9   :  { %3358 = vst.msk [vmem:[#allocation2] sm:$0xc0] %vm302_vm14, %v3356_v15  ;;  %3061 = vrot.lane.b32.xlu1 %v5490_v21, %s4518_s4 }
0x36ef   :  { %v3496_v17 = vpop.permute.xlu0 %3495 }
0x36f0   :  { %3498 = vst.msk [vmem:[#allocation2 + $0x8] sm:$0xc] %vm443_vm10, %v3496_v17  ;;  %vm3833_vm10 = vcmask 17408  }
0x36f1   :  { %3211 = vrot.lane.b32.xlu1 %v5536_v33, %s4519_s11 }
0x36f7   :  { %v3649_v62 = vpop.permute.xlu0 %3648 }
0x36f8   :  { %3651 = vst.msk [vmem:[#allocation2] sm:$0xc] %vm599_vm11, %v3649_v62 }
0x36f9   :  { %3500 = vrot.lane.b32.xlu1 %v5598_v56, %s4519_s11 }
0x3753   :  { %v3784_v45 = vpop.permute.xlu1 %3783 }
0x3754   :  { %v3786_v21 = vmul.f32 %v3784_v45, %v3764_v16 }
0x3755   :  { %v3830_v40 = vpop.f32.mrf.mxu0 }
0x3756   :  { %v3831_v33 = vadd.f32 %v3969_v38, %v3830_v40  ;;  %3793 = vrot.lane.b32.xlu1 %v3786_v21, %s4519_s11 }
0x3758   :  { %3834 = vst.msk [vmem:[#allocation12] sm:$0x3] %vm3833_vm10, %v3831_v33 }
0x3759   :  { %3845 = dma.vmem_to_hbm [thread:$0]  %s3841_s10, 32, %s3843_s18, [#allocation5]  }
0x375b   :  { %v3062_v56 = vpop.permute.xlu1 %3061 }
0x375c   :  { %3064 = vst.msk [vmem:[#allocation2] sm:$0x30] %vm593_vm12, %v3062_v56 }
0x3763   :  { %v3212_v20 = vpop.permute.xlu1 %3211 }
0x3764   :  { %3214 = vst.msk [vmem:[#allocation2 + $0x8] sm:$0x3] %vm746_vm15, %v3212_v20 }
0x3765   :  { %3353 = vst.msk [vmem:[#allocation2 + $0x8] sm:$0x3] %vm296_vm9, %v5568_v30 }
0x376b   :  { %v3501_v10 = vpop.permute.xlu1 %3500 }
0x376c   :  { %3503 = vst.msk [vmem:[#allocation2] sm:$0x30] %vm449_vm13, %v3501_v10 }
0x37c8   :  { %v3794_v55 = vpop.permute.xlu1 %3793 }
0x37c9   :  { %3796 = vst.msk [vmem:[#allocation2] sm:$0x3] %vm746_vm15, %v3794_v55 }
0x37ca   :  { %4504 = dma.done.wait [#allocation5], 32  }
0x37cb   :  { %4505 = vsyncadd [#allocation5], 4294967264 }
0x37cc   :  { %3850 = vsyncpa [#allocation4], 1 }
0x37cd   :  { %3851 = vsyncpa [#allocation7], 1 }
0x37ce   :  { %3852 = vsyncpa [#allocation10], 1 }
0x37cf   :  { %3853 = vsyncpa [#allocation5], 1 }

</bundles_post_ra>
